<compile_context>
chip_gen: v7x
topology: tpu7x:2x2x1
jax: 0.10.0
libtpu: 0.0.40
codegen_flags: <defaults>
</compile_context>

<pallas_src>
import functools

import jax
import jax.numpy as jnp
from jax.experimental import pallas as pl
from jax.experimental.pallas import tpu as pltpu

LANE = 128  # TPU lane width: the token dim is padded to a multiple of this.


def _channel_layer_norm(x, g, eps=1e-5):
    # x: (C, N); normalize over channels (axis 0); gain g: (C, 1); no bias; unbiased=False.
    mu = jnp.mean(x, axis=0, keepdims=True)
    var = jnp.mean((x - mu) ** 2, axis=0, keepdims=True)
    return (x - mu) * jax.lax.rsqrt(var + eps) * g


def resblock1d_kernel(
    x_ref,                       # (C, Np) f32   one batch element, tokens padded to lane width
    ln1_g_ref,                   # (C, 1) f32
    qkv_w_ref,                   # (3*hidden, C) bf16   to_qkv (no bias), scale folded into Q rows
    out_w_ref, out_b_ref,        # (C, hidden) bf16, (C, 1) f32   to_out
    ln2_g_ref,                   # (C, 1) f32
    fc_w_ref, fc_b_ref,          # (4C, C) bf16, (4C, 1) f32      mlp.c_fc
    proj_w_ref, proj_b_ref,      # (C, 4C) bf16, (C, 1) f32       mlp.c_proj
    o_ref,                       # (C, Np) f32
    ctx_ref,                     # VMEM scratch (Np, hidden) bf16  token-major attention context
    *, n_head, dim_head, n_tokens,
):
    f32, bf16 = jnp.float32, jnp.bfloat16
    dh = dim_head
    hidden = n_head * dh
    n_pad = x_ref.shape[1]

    x = x_ref[...].astype(f32)                                      # (C, Np)

    # Hoist small parameter reads (read once, reuse).
    ln1_g = ln1_g_ref[...]
    ln2_g = ln2_g_ref[...]
    out_b = out_b_ref[...]
    fc_b = fc_b_ref[...]
    proj_b = proj_b_ref[...]

    # ---------------- attention branch: x + to_out(attn(ln_1(x))) ----------------
    h1 = _channel_layer_norm(x, ln1_g)                              # (C, Np) f32
    qkv = jnp.dot(qkv_w_ref[...], h1.astype(bf16),
                  preferred_element_type=f32)                       # (3*hidden, Np) f32
    qkv_b = qkv.astype(bf16)                                        # single slab-wide cast

    # Static key-padding bias: padded token columns get -inf-ish scores (exp underflows
    # to exactly 0, so padded tokens never contaminate real tokens).
    if n_tokens < n_pad:
        lane_idx = jax.lax.broadcasted_iota(jnp.int32, (1, n_pad), 1)
        key_bias = jnp.where(lane_idx < n_tokens, 0.0, -1e30).astype(f32)
    else:
        key_bias = None

    # Short static loop over heads; each head's token-major context is written straight
    # into the bf16 (Np, hidden) scratch (no concatenate, no (N,N) transposes).
    for h in range(n_head):
        q_h = qkv_b[h * dh:(h + 1) * dh, :]                         # (dh, Np) bf16, pre-scaled
        k_h = qkv_b[hidden + h * dh:hidden + (h + 1) * dh, :]
        v_h = qkv_b[2 * hidden + h * dh:2 * hidden + (h + 1) * dh, :]

        # s[i, j] = sum_d q_h[d, i] * k_h[d, j]   (contract dim 0 of both; any lowered
        # transpose falls on a small bf16 (dh, Np) operand, not the (Np, Np) matrix)
        s = jax.lax.dot_general(q_h, k_h, (((0,), (0,)), ((), ())),
                                preferred_element_type=f32)         # (Np, Np) f32
        if key_bias is not None:
            s = s + key_bias
        s = s - jnp.max(s, axis=-1, keepdims=True)
        p = jnp.exp(s)
        p = p * pl.reciprocal(jnp.sum(p, axis=-1, keepdims=True), approx=True)

        # ctx[i, d] = sum_j p[i, j] * v_h[d, j]   (p stays un-transposed as the matmul LHS)
        ctx_h = jax.lax.dot_general(p.astype(bf16), v_h, (((1,), (1,)), ((), ())),
                                    preferred_element_type=f32)     # (Np, dh) f32
        ctx_ref[:, h * dh:(h + 1) * dh] = ctx_h.astype(bf16)

    # attn[c, n] = sum_e out_w[c, e] * ctx[n, e]   (one (Np, hidden) rhs transpose total)
    attn = jax.lax.dot_general(out_w_ref[...], ctx_ref[...], (((1,), (1,)), ((), ())),
                               preferred_element_type=f32) + out_b  # (C, Np)
    x = x + attn

    # ------------- ln_2 replaces x (matches the PyTorch forward exactly) -------------
    x = _channel_layer_norm(x, ln2_g)

    # ---------------- MLP residual: x + c_proj(QuickGELU(c_fc(x))) ----------------
    fc = jnp.dot(fc_w_ref[...], x.astype(bf16),
                 preferred_element_type=f32) + fc_b                 # (4C, Np)
    fc = fc * jax.nn.sigmoid(1.702 * fc)                            # QuickGELU
    proj = jnp.dot(proj_w_ref[...], fc.astype(bf16),
                   preferred_element_type=f32) + proj_b             # (C, Np)
    o_ref[...] = (x + proj).astype(o_ref.dtype)


def _derive_vmem_limit_bytes(C, n_pad, hidden):
    """Rough per-grid-step VMEM estimate (double-buffered x/o blocks + weights, the bf16
    ctx scratch, and the large live temporaries), with a generous fudge factor and a
    floor/ceiling.  Much better than a hardcoded cap; see TODOs for real v7x tiling."""
    f32b, bf16b = 4, 2
    act = C * n_pad * f32b
    weights = (3 * hidden * C + C * hidden + 4 * C * C + C * 4 * C) * bf16b
    biases = (9 * C) * f32b
    scratch = n_pad * hidden * bf16b
    temps = (3 * hidden * n_pad + n_pad * n_pad + 4 * C * n_pad) * (f32b + bf16b) + 6 * act
    est = 2 * (act + act) + 2 * (weights + biases) + scratch + temps
    return int(min(max(2 * est, 32 * 1024 * 1024), 100 * 1024 * 1024))


def residual_attention_block_1d(x_padded, p, *, n_head, dim_head, n_tokens):
    B, C, n_pad = x_padded.shape
    hidden = n_head * dim_head

    inputs = [
        x_padded,
        p["ln1_g"],
        p["qkv_w"],
        p["out_w"], p["out_b"],
        p["ln2_g"],
        p["fc_w"], p["fc_b"],
        p["proj_w"], p["proj_b"],
    ]
    # Weights/biases: full-array blocks with a constant block index (never re-DMAed).
    w_specs = [pl.BlockSpec(a.shape, lambda b, _nd=a.ndim: (0,) * _nd)
               for a in inputs[1:]]

    kernel = functools.partial(resblock1d_kernel, n_head=n_head, dim_head=dim_head,
                               n_tokens=n_tokens)
    return pl.pallas_call(
        kernel,
        out_shape=jax.ShapeDtypeStruct((B, C, n_pad), x_padded.dtype),
        grid=(B,),
        in_specs=[pl.BlockSpec((None, C, n_pad), lambda b: (b, 0, 0))] + w_specs,
        out_specs=pl.BlockSpec((None, C, n_pad), lambda b: (b, 0, 0)),
        scratch_shapes=[pltpu.VMEM((n_pad, hidden), jnp.bfloat16)],
        compiler_params=pltpu.CompilerParams(
            dimension_semantics=("parallel",),
            vmem_limit_bytes=_derive_vmem_limit_bytes(C, n_pad, hidden),
        ),
    )(*inputs)


@functools.partial(jax.jit, static_argnames=("n_head", "dim_head"))
def ev_transformer(x, layer_params, n_head, dim_head=32):
    """EVTransformer.forward: sequential ResidualAttentionBlock1D layers.

    x: [B, C, N] channels-first.  layer_params must come from prepare_layer_params
    (bf16 matmul weights, attention scale folded into the Q rows of to_qkv)."""
    B, C, N = x.shape
    n_pad = ((N + LANE - 1) // LANE) * LANE     # lane-dense token dim; pad once for all layers
    if n_pad != N:
        x = jnp.pad(x, ((0, 0), (0, 0), (0, n_pad - N)))
    for p in layer_params:
        x = residual_attention_block_1d(x, p, n_head=n_head, dim_head=dim_head, n_tokens=N)
    if n_pad != N:
        x = x[:, :, :N]
    return x


def init_layer_params(key, width, n_head, dim_head=32):
    """f32 parameters mirroring the PyTorch module's storage layouts."""
    C = width
    hidden = n_head * dim_head
    ks = jax.random.split(key, 7)
    s = 0.05
    f32 = jnp.float32
    return {
        "ln1_g": jnp.ones((C, 1), f32),                                   # LayerNorm.g
        "qkv_w": s * jax.random.normal(ks[0], (3 * hidden, C), f32),      # to_qkv (no bias)
        "out_w": s * jax.random.normal(ks[1], (C, hidden), f32),          # to_out weight
        "out_b": s * jax.random.normal(ks[2], (C, 1), f32),               # to_out bias
        "ln2_g": jnp.ones((C, 1), f32),
        "fc_w": s * jax.random.normal(ks[3], (4 * C, C), f32),            # mlp.c_fc
        "fc_b": s * jax.random.normal(ks[4], (4 * C, 1), f32),
        "proj_w": s * jax.random.normal(ks[5], (C, 4 * C), f32),          # mlp.c_proj
        "proj_b": s * jax.random.normal(ks[6], (C, 1), f32),
    }


def prepare_layer_params(p, n_head, dim_head=32):
    """One-time conversion for the kernel: fold 1/sqrt(dim_head) into the Q rows of
    to_qkv and cast matmul weights to bf16 (LN gains / biases stay f32)."""
    hidden = n_head * dim_head
    scale = dim_head ** -0.5
    bf16, f32 = jnp.bfloat16, jnp.float32
    qkv_w = p["qkv_w"].astype(f32).at[:hidden].multiply(scale)
    return {
        "ln1_g": p["ln1_g"].astype(f32),
        "qkv_w": qkv_w.astype(bf16),
        "out_w": p["out_w"].astype(bf16),
        "out_b": p["out_b"].astype(f32),
        "ln2_g": p["ln2_g"].astype(f32),
        "fc_w": p["fc_w"].astype(bf16),
        "fc_b": p["fc_b"].astype(f32),
        "proj_w": p["proj_w"].astype(bf16),
        "proj_b": p["proj_b"].astype(f32),
    }


def reference(x, layer_params, n_head, dim_head=32):
    # Pure-JAX f32 mirror of the PyTorch forward (attn_mask=None path), using the raw
    # (unfolded, f32) parameters.
    B, C, N = x.shape
    dh = dim_head
    hidden = n_head * dh
    scale = dh ** -0.5

    def ln(v, g):  # over channels (dim 1), unbiased=False, eps=1e-5 (f32)
        mu = jnp.mean(v, axis=1, keepdims=True)
        var = jnp.mean((v - mu) ** 2, axis=1, keepdims=True)
        return (v - mu) * jax.lax.rsqrt(var + 1e-5) * g[None]

    for p in layer_params:
        h = ln(x, p["ln1_g"])
        qkv = jnp.einsum("ec,bcn->ben", p["qkv_w"], h)                    # (B, 3*hidden, N)
        q, k, v = jnp.split(qkv, 3, axis=1)
        q = q.reshape(B, n_head, dh, N) * scale
        k = k.reshape(B, n_head, dh, N)
        v = v.reshape(B, n_head, dh, N)
        sim = jnp.einsum("bhdi,bhdj->bhij", q, k)
        attn = jax.nn.softmax(sim, axis=-1)
        out = jnp.einsum("bhij,bhdj->bhid", attn, v)                      # (B, H, N, dh)
        out = jnp.transpose(out, (0, 1, 3, 2)).reshape(B, hidden, N)      # b h n d -> b (h d) n
        out = jnp.einsum("ce,ben->bcn", p["out_w"], out) + p["out_b"][None]
        x = x + out
        x = ln(x, p["ln2_g"])                                             # replaces x
        fc = jnp.einsum("fc,bcn->bfn", p["fc_w"], x) + p["fc_b"][None]
        fc = fc * jax.nn.sigmoid(1.702 * fc)
        proj = jnp.einsum("cf,bfn->bcn", p["proj_w"], fc) + p["proj_b"][None]
        x = x + proj
    return x


if __name__ == "__main__":
    B, width, seq = 2, 64, 16
    heads, layers, dim_head = 4, 2, 32

    key = jax.random.PRNGKey(0)
    kx, kp = jax.random.split(key)
    x = jax.random.normal(kx, (B, width, seq), jnp.float32)               # [B, C, N]
    raw_params = tuple(
        init_layer_params(k, width, heads, dim_head)
        for k in jax.random.split(kp, layers)
    )
    # One-time parameter conversion (bf16 weights + folded scale), outside the forward path.
    layer_params = tuple(prepare_layer_params(p, heads, dim_head) for p in raw_params)

    y = ev_transformer(x, layer_params, n_head=heads, dim_head=dim_head)
    jax.block_until_ready(y)

    y_ref = reference(x, raw_params, heads, dim_head)
    assert y.shape == (B, width, seq) and y.dtype == jnp.float32
    # bf16 matmul inputs (f32 accumulation) + approx softmax reciprocal -> loosened tol.
    assert jnp.allclose(y, y_ref, atol=5e-2, rtol=5e-2), "mismatch vs reference"
    print("KERNEL_OK")
</pallas_src>

<mosaic_0001>
module attributes {stable_mosaic.version = 11 : i64} {
  func.func @resblock1d_kernel(%arg0: i32, %arg1: memref<1x64x128xf32, #tpu.memory_space<vmem>>, %arg2: memref<64x1xf32, #tpu.memory_space<vmem>>, %arg3: memref<384x64xbf16, #tpu.memory_space<vmem>>, %arg4: memref<64x128xbf16, #tpu.memory_space<vmem>>, %arg5: memref<64x1xf32, #tpu.memory_space<vmem>>, %arg6: memref<64x1xf32, #tpu.memory_space<vmem>>, %arg7: memref<256x64xbf16, #tpu.memory_space<vmem>>, %arg8: memref<256x1xf32, #tpu.memory_space<vmem>>, %arg9: memref<64x256xbf16, #tpu.memory_space<vmem>>, %arg10: memref<64x1xf32, #tpu.memory_space<vmem>>, %arg11: memref<1x64x128xf32, #tpu.memory_space<vmem>>, %arg12: memref<128x128xbf16, #tpu.memory_space<vmem>>) attributes {dimension_semantics = [#tpu.dimension_semantics<parallel>], iteration_bounds = array<i64: 2>, scalar_prefetch = 0 : i64, scratch_operands = 1 : i64, tpu.core_type = #tpu.core_type<tc>, window_params = [{transform_indices = @transform_0, window_bounds = array<i64: 1, 64, 128>}, {pipeline_mode = #tpu.pipeline_mode<synchronous>, transform_indices = @transform_1, window_bounds = array<i64: 64, 1>}, {pipeline_mode = #tpu.pipeline_mode<synchronous>, transform_indices = @transform_2, window_bounds = array<i64: 384, 64>}, {pipeline_mode = #tpu.pipeline_mode<synchronous>, transform_indices = @transform_3, window_bounds = array<i64: 64, 128>}, {pipeline_mode = #tpu.pipeline_mode<synchronous>, transform_indices = @transform_4, window_bounds = array<i64: 64, 1>}, {pipeline_mode = #tpu.pipeline_mode<synchronous>, transform_indices = @transform_5, window_bounds = array<i64: 64, 1>}, {pipeline_mode = #tpu.pipeline_mode<synchronous>, transform_indices = @transform_6, window_bounds = array<i64: 256, 64>}, {pipeline_mode = #tpu.pipeline_mode<synchronous>, transform_indices = @transform_7, window_bounds = array<i64: 256, 1>}, {pipeline_mode = #tpu.pipeline_mode<synchronous>, transform_indices = @transform_8, window_bounds = array<i64: 64, 256>}, {pipeline_mode = #tpu.pipeline_mode<synchronous>, transform_indices = @transform_9, window_bounds = array<i64: 64, 1>}, {transform_indices = @transform_10, window_bounds = array<i64: 1, 64, 128>}]} {
    %c0 = arith.constant 0 : index
    %c0_0 = arith.constant 0 : index
    %c0_1 = arith.constant 0 : index
    %0 = vector.load %arg1[%c0, %c0_0, %c0_1] : memref<1x64x128xf32, #tpu.memory_space<vmem>>, vector<1x64x128xf32>
    %1 = vector.shape_cast %0 : vector<1x64x128xf32> to vector<64x128xf32>
    %c0_2 = arith.constant 0 : index
    %c0_3 = arith.constant 0 : index
    %2 = vector.load %arg2[%c0_2, %c0_3] : memref<64x1xf32, #tpu.memory_space<vmem>>, vector<64x1xf32>
    %c0_4 = arith.constant 0 : index
    %c0_5 = arith.constant 0 : index
    %3 = vector.load %arg6[%c0_4, %c0_5] : memref<64x1xf32, #tpu.memory_space<vmem>>, vector<64x1xf32>
    %c0_6 = arith.constant 0 : index
    %c0_7 = arith.constant 0 : index
    %4 = vector.load %arg5[%c0_6, %c0_7] : memref<64x1xf32, #tpu.memory_space<vmem>>, vector<64x1xf32>
    %c0_8 = arith.constant 0 : index
    %c0_9 = arith.constant 0 : index
    %5 = vector.load %arg8[%c0_8, %c0_9] : memref<256x1xf32, #tpu.memory_space<vmem>>, vector<256x1xf32>
    %c0_10 = arith.constant 0 : index
    %c0_11 = arith.constant 0 : index
    %6 = vector.load %arg10[%c0_10, %c0_11] : memref<64x1xf32, #tpu.memory_space<vmem>>, vector<64x1xf32>
    %cst = arith.constant dense<0.000000e+00> : vector<128xf32>
    %7 = vector.multi_reduction <add>, %1, %cst [0] : vector<64x128xf32> to vector<128xf32>
    %8 = vector.shape_cast %7 : vector<128xf32> to vector<1x128xf32>
    %cst_12 = arith.constant 6.400000e+01 : f32
    %9 = vector.broadcast %cst_12 : f32 to vector<1x128xf32>
    %10 = arith.divf %8, %9 : vector<1x128xf32>
    %11 = vector.broadcast %10 : vector<1x128xf32> to vector<64x128xf32>
    %12 = arith.subf %1, %11 : vector<64x128xf32>
    %13 = arith.mulf %12, %12 : vector<64x128xf32>
    %cst_13 = arith.constant dense<0.000000e+00> : vector<128xf32>
    %14 = vector.multi_reduction <add>, %13, %cst_13 [0] : vector<64x128xf32> to vector<128xf32>
    %15 = vector.shape_cast %14 : vector<128xf32> to vector<1x128xf32>
    %cst_14 = arith.constant 6.400000e+01 : f32
    %16 = vector.broadcast %cst_14 : f32 to vector<1x128xf32>
    %17 = arith.divf %15, %16 : vector<1x128xf32>
    %18 = vector.broadcast %10 : vector<1x128xf32> to vector<64x128xf32>
    %19 = arith.subf %1, %18 : vector<64x128xf32>
    %cst_15 = arith.constant 9.99999974E-6 : f32
    %20 = vector.broadcast %cst_15 : f32 to vector<1x128xf32>
    %21 = arith.addf %17, %20 : vector<1x128xf32>
    %22 = math.rsqrt %21 : vector<1x128xf32>
    %23 = vector.broadcast %22 : vector<1x128xf32> to vector<64x128xf32>
    %24 = arith.mulf %19, %23 : vector<64x128xf32>
    %25 = vector.broadcast %2 : vector<64x1xf32> to vector<64x128xf32>
    %26 = arith.mulf %24, %25 : vector<64x128xf32>
    %c0_16 = arith.constant 0 : index
    %c0_17 = arith.constant 0 : index
    %27 = vector.load %arg3[%c0_16, %c0_17] : memref<384x64xbf16, #tpu.memory_space<vmem>>, vector<384x64xbf16>
    %28 = arith.truncf %26 : vector<64x128xf32> to vector<64x128xbf16>
    %cst_18 = arith.constant dense<0.000000e+00> : vector<384x128xf32>
    %29 = tpu.matmul %27, %28, %cst_18 {dimension_numbers = #tpu.dot_dimension_numbers<[1], [0], [0], [1], [0, 0, 1, 1], [], []>} : vector<384x64xbf16>, vector<64x128xbf16>, vector<384x128xf32> -> vector<384x128xf32>
    %30 = arith.truncf %29 : vector<384x128xf32> to vector<384x128xbf16>
    %31 = tpu.iota {dimensions = array<i32: 1>} : vector<1x128xi32>
    %c16_i32 = arith.constant 16 : i32
    %32 = vector.broadcast %c16_i32 : i32 to vector<1x128xi32>
    %33 = arith.cmpi slt, %31, %32 : vector<1x128xi32>
    %cst_19 = arith.constant 0.000000e+00 : f32
    %cst_20 = arith.constant -1.000000e+30 : f32
    %34 = vector.broadcast %cst_19 : f32 to vector<1x128xf32>
    %35 = vector.broadcast %cst_20 : f32 to vector<1x128xf32>
    %36 = arith.select %33, %34, %35 : vector<1x128xi1>, vector<1x128xf32>
    %37 = vector.extract_strided_slice %30 {offsets = [0, 0], sizes = [32, 128], strides = [1, 1]} : vector<384x128xbf16> to vector<32x128xbf16>
    %38 = vector.extract_strided_slice %30 {offsets = [128, 0], sizes = [32, 128], strides = [1, 1]} : vector<384x128xbf16> to vector<32x128xbf16>
    %39 = vector.extract_strided_slice %30 {offsets = [256, 0], sizes = [32, 128], strides = [1, 1]} : vector<384x128xbf16> to vector<32x128xbf16>
    %cst_21 = arith.constant dense<0.000000e+00> : vector<128x128xf32>
    %40 = tpu.matmul %37, %38, %cst_21 {dimension_numbers = #tpu.dot_dimension_numbers<[0], [0], [1], [1], [0, 1, 1, 1], [], []>} : vector<32x128xbf16>, vector<32x128xbf16>, vector<128x128xf32> -> vector<128x128xf32>
    %41 = vector.broadcast %36 : vector<1x128xf32> to vector<128x128xf32>
    %42 = arith.addf %40, %41 : vector<128x128xf32>
    %cst_22 = arith.constant dense<0xFF800000> : vector<128xf32>
    %43 = vector.multi_reduction <maximumf>, %42, %cst_22 [1] : vector<128x128xf32> to vector<128xf32>
    %44 = vector.shape_cast %43 : vector<128xf32> to vector<128x1xf32>
    %45 = vector.broadcast %44 : vector<128x1xf32> to vector<128x128xf32>
    %46 = arith.subf %42, %45 : vector<128x128xf32>
    %47 = math.exp %46 : vector<128x128xf32>
    %cst_23 = arith.constant dense<0.000000e+00> : vector<128xf32>
    %48 = vector.multi_reduction <add>, %47, %cst_23 [1] : vector<128x128xf32> to vector<128xf32>
    %49 = vector.shape_cast %48 : vector<128xf32> to vector<128x1xf32>
    %50 = tpu.reciprocal %49 {approx = true} : vector<128x1xf32> -> vector<128x1xf32>
    %51 = vector.broadcast %50 : vector<128x1xf32> to vector<128x128xf32>
    %52 = arith.mulf %47, %51 : vector<128x128xf32>
    %53 = arith.truncf %52 : vector<128x128xf32> to vector<128x128xbf16>
    %cst_24 = arith.constant dense<0.000000e+00> : vector<128x32xf32>
    %54 = tpu.matmul %53, %39, %cst_24 {dimension_numbers = #tpu.dot_dimension_numbers<[1], [1], [0], [0], [0, 0, 1, 0], [], []>} : vector<128x128xbf16>, vector<32x128xbf16>, vector<128x32xf32> -> vector<128x32xf32>
    %55 = arith.truncf %54 : vector<128x32xf32> to vector<128x32xbf16>
    %c0_25 = arith.constant 0 : index
    %c0_26 = arith.constant 0 : index
    %56 = vector.load %arg12[%c0_25, %c0_26] : memref<128x128xbf16, #tpu.memory_space<vmem>>, vector<128x32xbf16>
    tpu.vector_store %arg12[%c0_25, %c0_26], %55 {strides = array<i32>} : memref<128x128xbf16, #tpu.memory_space<vmem>>, vector<128x32xbf16>,
    %57 = vector.extract_strided_slice %30 {offsets = [32, 0], sizes = [32, 128], strides = [1, 1]} : vector<384x128xbf16> to vector<32x128xbf16>
    %58 = vector.extract_strided_slice %30 {offsets = [160, 0], sizes = [32, 128], strides = [1, 1]} : vector<384x128xbf16> to vector<32x128xbf16>
    %59 = vector.extract_strided_slice %30 {offsets = [288, 0], sizes = [32, 128], strides = [1, 1]} : vector<384x128xbf16> to vector<32x128xbf16>
    %cst_27 = arith.constant dense<0.000000e+00> : vector<128x128xf32>
    %60 = tpu.matmul %57, %58, %cst_27 {dimension_numbers = #tpu.dot_dimension_numbers<[0], [0], [1], [1], [0, 1, 1, 1], [], []>} : vector<32x128xbf16>, vector<32x128xbf16>, vector<128x128xf32> -> vector<128x128xf32>
    %61 = vector.broadcast %36 : vector<1x128xf32> to vector<128x128xf32>
    %62 = arith.addf %60, %61 : vector<128x128xf32>
    %cst_28 = arith.constant dense<0xFF800000> : vector<128xf32>
    %63 = vector.multi_reduction <maximumf>, %62, %cst_28 [1] : vector<128x128xf32> to vector<128xf32>
    %64 = vector.shape_cast %63 : vector<128xf32> to vector<128x1xf32>
    %65 = vector.broadcast %64 : vector<128x1xf32> to vector<128x128xf32>
    %66 = arith.subf %62, %65 : vector<128x128xf32>
    %67 = math.exp %66 : vector<128x128xf32>
    %cst_29 = arith.constant dense<0.000000e+00> : vector<128xf32>
    %68 = vector.multi_reduction <add>, %67, %cst_29 [1] : vector<128x128xf32> to vector<128xf32>
    %69 = vector.shape_cast %68 : vector<128xf32> to vector<128x1xf32>
    %70 = tpu.reciprocal %69 {approx = true} : vector<128x1xf32> -> vector<128x1xf32>
    %71 = vector.broadcast %70 : vector<128x1xf32> to vector<128x128xf32>
    %72 = arith.mulf %67, %71 : vector<128x128xf32>
    %73 = arith.truncf %72 : vector<128x128xf32> to vector<128x128xbf16>
    %cst_30 = arith.constant dense<0.000000e+00> : vector<128x32xf32>
    %74 = tpu.matmul %73, %59, %cst_30 {dimension_numbers = #tpu.dot_dimension_numbers<[1], [1], [0], [0], [0, 0, 1, 0], [], []>} : vector<128x128xbf16>, vector<32x128xbf16>, vector<128x32xf32> -> vector<128x32xf32>
    %75 = arith.truncf %74 : vector<128x32xf32> to vector<128x32xbf16>
    %c0_31 = arith.constant 0 : index
    %c32 = arith.constant 32 : index
    %76 = vector.load %arg12[%c0_31, %c32] : memref<128x128xbf16, #tpu.memory_space<vmem>>, vector<128x32xbf16>
    tpu.vector_store %arg12[%c0_31, %c32], %75 {strides = array<i32>} : memref<128x128xbf16, #tpu.memory_space<vmem>>, vector<128x32xbf16>,
    %77 = vector.extract_strided_slice %30 {offsets = [64, 0], sizes = [32, 128], strides = [1, 1]} : vector<384x128xbf16> to vector<32x128xbf16>
    %78 = vector.extract_strided_slice %30 {offsets = [192, 0], sizes = [32, 128], strides = [1, 1]} : vector<384x128xbf16> to vector<32x128xbf16>
    %79 = vector.extract_strided_slice %30 {offsets = [320, 0], sizes = [32, 128], strides = [1, 1]} : vector<384x128xbf16> to vector<32x128xbf16>
    %cst_32 = arith.constant dense<0.000000e+00> : vector<128x128xf32>
    %80 = tpu.matmul %77, %78, %cst_32 {dimension_numbers = #tpu.dot_dimension_numbers<[0], [0], [1], [1], [0, 1, 1, 1], [], []>} : vector<32x128xbf16>, vector<32x128xbf16>, vector<128x128xf32> -> vector<128x128xf32>
    %81 = vector.broadcast %36 : vector<1x128xf32> to vector<128x128xf32>
    %82 = arith.addf %80, %81 : vector<128x128xf32>
    %cst_33 = arith.constant dense<0xFF800000> : vector<128xf32>
    %83 = vector.multi_reduction <maximumf>, %82, %cst_33 [1] : vector<128x128xf32> to vector<128xf32>
    %84 = vector.shape_cast %83 : vector<128xf32> to vector<128x1xf32>
    %85 = vector.broadcast %84 : vector<128x1xf32> to vector<128x128xf32>
    %86 = arith.subf %82, %85 : vector<128x128xf32>
    %87 = math.exp %86 : vector<128x128xf32>
    %cst_34 = arith.constant dense<0.000000e+00> : vector<128xf32>
    %88 = vector.multi_reduction <add>, %87, %cst_34 [1] : vector<128x128xf32> to vector<128xf32>
    %89 = vector.shape_cast %88 : vector<128xf32> to vector<128x1xf32>
    %90 = tpu.reciprocal %89 {approx = true} : vector<128x1xf32> -> vector<128x1xf32>
    %91 = vector.broadcast %90 : vector<128x1xf32> to vector<128x128xf32>
    %92 = arith.mulf %87, %91 : vector<128x128xf32>
    %93 = arith.truncf %92 : vector<128x128xf32> to vector<128x128xbf16>
    %cst_35 = arith.constant dense<0.000000e+00> : vector<128x32xf32>
    %94 = tpu.matmul %93, %79, %cst_35 {dimension_numbers = #tpu.dot_dimension_numbers<[1], [1], [0], [0], [0, 0, 1, 0], [], []>} : vector<128x128xbf16>, vector<32x128xbf16>, vector<128x32xf32> -> vector<128x32xf32>
    %95 = arith.truncf %94 : vector<128x32xf32> to vector<128x32xbf16>
    %c0_36 = arith.constant 0 : index
    %c64 = arith.constant 64 : index
    %96 = vector.load %arg12[%c0_36, %c64] : memref<128x128xbf16, #tpu.memory_space<vmem>>, vector<128x32xbf16>
    tpu.vector_store %arg12[%c0_36, %c64], %95 {strides = array<i32>} : memref<128x128xbf16, #tpu.memory_space<vmem>>, vector<128x32xbf16>,
    %97 = vector.extract_strided_slice %30 {offsets = [96, 0], sizes = [32, 128], strides = [1, 1]} : vector<384x128xbf16> to vector<32x128xbf16>
    %98 = vector.extract_strided_slice %30 {offsets = [224, 0], sizes = [32, 128], strides = [1, 1]} : vector<384x128xbf16> to vector<32x128xbf16>
    %99 = vector.extract_strided_slice %30 {offsets = [352, 0], sizes = [32, 128], strides = [1, 1]} : vector<384x128xbf16> to vector<32x128xbf16>
    %cst_37 = arith.constant dense<0.000000e+00> : vector<128x128xf32>
    %100 = tpu.matmul %97, %98, %cst_37 {dimension_numbers = #tpu.dot_dimension_numbers<[0], [0], [1], [1], [0, 1, 1, 1], [], []>} : vector<32x128xbf16>, vector<32x128xbf16>, vector<128x128xf32> -> vector<128x128xf32>
    %101 = vector.broadcast %36 : vector<1x128xf32> to vector<128x128xf32>
    %102 = arith.addf %100, %101 : vector<128x128xf32>
    %cst_38 = arith.constant dense<0xFF800000> : vector<128xf32>
    %103 = vector.multi_reduction <maximumf>, %102, %cst_38 [1] : vector<128x128xf32> to vector<128xf32>
    %104 = vector.shape_cast %103 : vector<128xf32> to vector<128x1xf32>
    %105 = vector.broadcast %104 : vector<128x1xf32> to vector<128x128xf32>
    %106 = arith.subf %102, %105 : vector<128x128xf32>
    %107 = math.exp %106 : vector<128x128xf32>
    %cst_39 = arith.constant dense<0.000000e+00> : vector<128xf32>
    %108 = vector.multi_reduction <add>, %107, %cst_39 [1] : vector<128x128xf32> to vector<128xf32>
    %109 = vector.shape_cast %108 : vector<128xf32> to vector<128x1xf32>
    %110 = tpu.reciprocal %109 {approx = true} : vector<128x1xf32> -> vector<128x1xf32>
    %111 = vector.broadcast %110 : vector<128x1xf32> to vector<128x128xf32>
    %112 = arith.mulf %107, %111 : vector<128x128xf32>
    %113 = arith.truncf %112 : vector<128x128xf32> to vector<128x128xbf16>
    %cst_40 = arith.constant dense<0.000000e+00> : vector<128x32xf32>
    %114 = tpu.matmul %113, %99, %cst_40 {dimension_numbers = #tpu.dot_dimension_numbers<[1], [1], [0], [0], [0, 0, 1, 0], [], []>} : vector<128x128xbf16>, vector<32x128xbf16>, vector<128x32xf32> -> vector<128x32xf32>
    %115 = arith.truncf %114 : vector<128x32xf32> to vector<128x32xbf16>
    %c0_41 = arith.constant 0 : index
    %c96 = arith.constant 96 : index
    %116 = vector.load %arg12[%c0_41, %c96] : memref<128x128xbf16, #tpu.memory_space<vmem>>, vector<128x32xbf16>
    tpu.vector_store %arg12[%c0_41, %c96], %115 {strides = array<i32>} : memref<128x128xbf16, #tpu.memory_space<vmem>>, vector<128x32xbf16>,
    %c0_42 = arith.constant 0 : index
    %c0_43 = arith.constant 0 : index
    %117 = vector.load %arg4[%c0_42, %c0_43] : memref<64x128xbf16, #tpu.memory_space<vmem>>, vector<64x128xbf16>
    %c0_44 = arith.constant 0 : index
    %c0_45 = arith.constant 0 : index
    %118 = vector.load %arg12[%c0_44, %c0_45] : memref<128x128xbf16, #tpu.memory_space<vmem>>, vector<128x128xbf16>
    %cst_46 = arith.constant dense<0.000000e+00> : vector<64x128xf32>
    %119 = tpu.matmul %117, %118, %cst_46 {dimension_numbers = #tpu.dot_dimension_numbers<[1], [1], [0], [0], [0, 0, 1, 0], [], []>} : vector<64x128xbf16>, vector<128x128xbf16>, vector<64x128xf32> -> vector<64x128xf32>
    %120 = vector.broadcast %4 : vector<64x1xf32> to vector<64x128xf32>
    %121 = arith.addf %119, %120 : vector<64x128xf32>
    %122 = arith.addf %1, %121 : vector<64x128xf32>
    %cst_47 = arith.constant dense<0.000000e+00> : vector<128xf32>
    %123 = vector.multi_reduction <add>, %122, %cst_47 [0] : vector<64x128xf32> to vector<128xf32>
    %124 = vector.shape_cast %123 : vector<128xf32> to vector<1x128xf32>
    %cst_48 = arith.constant 6.400000e+01 : f32
    %125 = vector.broadcast %cst_48 : f32 to vector<1x128xf32>
    %126 = arith.divf %124, %125 : vector<1x128xf32>
    %127 = vector.broadcast %126 : vector<1x128xf32> to vector<64x128xf32>
    %128 = arith.subf %122, %127 : vector<64x128xf32>
    %129 = arith.mulf %128, %128 : vector<64x128xf32>
    %cst_49 = arith.constant dense<0.000000e+00> : vector<128xf32>
    %130 = vector.multi_reduction <add>, %129, %cst_49 [0] : vector<64x128xf32> to vector<128xf32>
    %131 = vector.shape_cast %130 : vector<128xf32> to vector<1x128xf32>
    %cst_50 = arith.constant 6.400000e+01 : f32
    %132 = vector.broadcast %cst_50 : f32 to vector<1x128xf32>
    %133 = arith.divf %131, %132 : vector<1x128xf32>
    %134 = vector.broadcast %126 : vector<1x128xf32> to vector<64x128xf32>
    %135 = arith.subf %122, %134 : vector<64x128xf32>
    %cst_51 = arith.constant 9.99999974E-6 : f32
    %136 = vector.broadcast %cst_51 : f32 to vector<1x128xf32>
    %137 = arith.addf %133, %136 : vector<1x128xf32>
    %138 = math.rsqrt %137 : vector<1x128xf32>
    %139 = vector.broadcast %138 : vector<1x128xf32> to vector<64x128xf32>
    %140 = arith.mulf %135, %139 : vector<64x128xf32>
    %141 = vector.broadcast %3 : vector<64x1xf32> to vector<64x128xf32>
    %142 = arith.mulf %140, %141 : vector<64x128xf32>
    %c0_52 = arith.constant 0 : index
    %c0_53 = arith.constant 0 : index
    %143 = vector.load %arg7[%c0_52, %c0_53] : memref<256x64xbf16, #tpu.memory_space<vmem>>, vector<256x64xbf16>
    %144 = arith.truncf %142 : vector<64x128xf32> to vector<64x128xbf16>
    %cst_54 = arith.constant dense<0.000000e+00> : vector<256x128xf32>
    %145 = tpu.matmul %143, %144, %cst_54 {dimension_numbers = #tpu.dot_dimension_numbers<[1], [0], [0], [1], [0, 0, 1, 1], [], []>} : vector<256x64xbf16>, vector<64x128xbf16>, vector<256x128xf32> -> vector<256x128xf32>
    %146 = vector.broadcast %5 : vector<256x1xf32> to vector<256x128xf32>
    %147 = arith.addf %145, %146 : vector<256x128xf32>
    %cst_55 = arith.constant 1.702000e+00 : f32
    %148 = vector.broadcast %cst_55 : f32 to vector<256x128xf32>
    %149 = arith.mulf %148, %147 : vector<256x128xf32>
    %150 = arith.negf %149 : vector<256x128xf32>
    %151 = math.exp %150 : vector<256x128xf32>
    %cst_56 = arith.constant 1.000000e+00 : f32
    %152 = vector.broadcast %cst_56 : f32 to vector<256x128xf32>
    %153 = arith.addf %152, %151 : vector<256x128xf32>
    %154 = arith.divf %152, %153 : vector<256x128xf32>
    %155 = arith.mulf %147, %154 : vector<256x128xf32>
    %c0_57 = arith.constant 0 : index
    %c0_58 = arith.constant 0 : index
    %156 = vector.load %arg9[%c0_57, %c0_58] : memref<64x256xbf16, #tpu.memory_space<vmem>>, vector<64x256xbf16>
    %157 = arith.truncf %155 : vector<256x128xf32> to vector<256x128xbf16>
    %cst_59 = arith.constant dense<0.000000e+00> : vector<64x128xf32>
    %158 = tpu.matmul %156, %157, %cst_59 {dimension_numbers = #tpu.dot_dimension_numbers<[1], [0], [0], [1], [0, 0, 1, 1], [], []>} : vector<64x256xbf16>, vector<256x128xbf16>, vector<64x128xf32> -> vector<64x128xf32>
    %159 = vector.broadcast %6 : vector<64x1xf32> to vector<64x128xf32>
    %160 = arith.addf %158, %159 : vector<64x128xf32>
    %161 = arith.addf %142, %160 : vector<64x128xf32>
    %c0_60 = arith.constant 0 : index
    %c0_61 = arith.constant 0 : index
    %c0_62 = arith.constant 0 : index
    %162 = vector.load %arg11[%c0_60, %c0_61, %c0_62] : memref<1x64x128xf32, #tpu.memory_space<vmem>>, vector<1x64x128xf32>
    %163 = vector.shape_cast %162 : vector<1x64x128xf32> to vector<64x128xf32>
    %164 = vector.shape_cast %161 : vector<64x128xf32> to vector<1x64x128xf32>
    tpu.vector_store %arg11[%c0_60, %c0_61, %c0_62], %164 {strides = array<i32>} : memref<1x64x128xf32, #tpu.memory_space<vmem>>, vector<1x64x128xf32>,
    return
  }
  func.func @transform_0(%arg0: i32) -> (i32, i32, i32) {
    %c0_i32 = arith.constant 0 : i32
    %c0_i32_0 = arith.constant 0 : i32
    %c0_i32_1 = arith.constant 0 : i32
    return %arg0, %c0_i32, %c0_i32_0 : i32, i32, i32
  }
  func.func @transform_1(%arg0: i32) -> (i32, i32) {
    %c0_i32 = arith.constant 0 : i32
    %c0_i32_0 = arith.constant 0 : i32
    %c0_i32_1 = arith.constant 0 : i32
    return %c0_i32, %c0_i32_0 : i32, i32
  }
  func.func @transform_2(%arg0: i32) -> (i32, i32) {
    %c0_i32 = arith.constant 0 : i32
    %c0_i32_0 = arith.constant 0 : i32
    %c0_i32_1 = arith.constant 0 : i32
    return %c0_i32, %c0_i32_0 : i32, i32
  }
  func.func @transform_3(%arg0: i32) -> (i32, i32) {
    %c0_i32 = arith.constant 0 : i32
    %c0_i32_0 = arith.constant 0 : i32
    %c0_i32_1 = arith.constant 0 : i32
    return %c0_i32, %c0_i32_0 : i32, i32
  }
  func.func @transform_4(%arg0: i32) -> (i32, i32) {
    %c0_i32 = arith.constant 0 : i32
    %c0_i32_0 = arith.constant 0 : i32
    %c0_i32_1 = arith.constant 0 : i32
    return %c0_i32, %c0_i32_0 : i32, i32
  }
  func.func @transform_5(%arg0: i32) -> (i32, i32) {
    %c0_i32 = arith.constant 0 : i32
    %c0_i32_0 = arith.constant 0 : i32
    %c0_i32_1 = arith.constant 0 : i32
    return %c0_i32, %c0_i32_0 : i32, i32
  }
  func.func @transform_6(%arg0: i32) -> (i32, i32) {
    %c0_i32 = arith.constant 0 : i32
    %c0_i32_0 = arith.constant 0 : i32
    %c0_i32_1 = arith.constant 0 : i32
    return %c0_i32, %c0_i32_0 : i32, i32
  }
  func.func @transform_7(%arg0: i32) -> (i32, i32) {
    %c0_i32 = arith.constant 0 : i32
    %c0_i32_0 = arith.constant 0 : i32
    %c0_i32_1 = arith.constant 0 : i32
    return %c0_i32, %c0_i32_0 : i32, i32
  }
  func.func @transform_8(%arg0: i32) -> (i32, i32) {
    %c0_i32 = arith.constant 0 : i32
    %c0_i32_0 = arith.constant 0 : i32
    %c0_i32_1 = arith.constant 0 : i32
    return %c0_i32, %c0_i32_0 : i32, i32
  }
  func.func @transform_9(%arg0: i32) -> (i32, i32) {
    %c0_i32 = arith.constant 0 : i32
    %c0_i32_0 = arith.constant 0 : i32
    %c0_i32_1 = arith.constant 0 : i32
    return %c0_i32, %c0_i32_0 : i32, i32
  }
  func.func @transform_10(%arg0: i32) -> (i32, i32, i32) {
    %c0_i32 = arith.constant 0 : i32
    %c0_i32_0 = arith.constant 0 : i32
    %c0_i32_1 = arith.constant 0 : i32
    return %arg0, %c0_i32, %c0_i32_0 : i32, i32, i32
  }
}

</mosaic_0001>

<bundles_post_ra>
// kernel: ev_transformer.2
= control target key start
LH: loop header
LB: loop body
LE: loop exit
PB: predicated region body
PF: predicated region fallthrough
CT: control target
= control target key end

     0   :  { %s5142_s13 = smov 0   ;;  %s6728_s0 = inlined_call_operand.vmem [shape: f32[2,64,128], index: 0, kind: input, shape index: {}]   ;;  %s6729_s1 = inlined_call_operand.vmem [shape: f32[64,1], index: 1, kind: input, shape index: {}]   ;;  %s6730_s2 = inlined_call_operand.vmem [shape: bf16[384,64], index: 2, kind: input, shape index: {}]   ;;  %s6731_s3 = inlined_call_operand.vmem [shape: bf16[64,128], index: 3, kind: input, shape index: {}]   ;;  %s6732_s4 = inlined_call_operand.vmem [shape: f32[64,1], index: 4, kind: input, shape index: {}]   ;;  %s6733_s5 = inlined_call_operand.vmem [shape: f32[64,1], index: 5, kind: input, shape index: {}]   ;;  %s6734_s6 = inlined_call_operand.vmem [shape: bf16[256,64], index: 6, kind: input, shape index: {}]   ;;  %s6735_s7 = inlined_call_operand.vmem [shape: f32[256,1], index: 7, kind: input, shape index: {}]   ;;  %s6736_s8 = inlined_call_operand.vmem [shape: bf16[64,256], index: 8, kind: input, shape index: {}]   ;;  %s6737_s9 = inlined_call_operand.vmem [shape: f32[64,1], index: 9, kind: input, shape index: {}]   ;;  %s6738_s10 = inlined_call_operand.vmem [shape: f32[2,64,128], index: 10, kind: output, shape index: {}]  }
   0x1 LB: > { %s3978_s14 = sadd.s32 4294967295, %s5080_s13   ;;  %p3982_p0 = scmp.ge.s32.totalorder %s5080_s13, 1  ;;  %s5080_s13 = sphi %s5142_s13, %s20_s13  }
   0x2   : > { %p312_p1 = scmp.lt.s32.totalorder %s5080_s13, 3 }
   0x4   : > { %p313_p2 = pnand %p3982_p0, %p312_p1 }
   0x6   : > { %316 = sbr.rel (%p313_p2) target bundleno = 3039 (0xbdf), region = 60 }
   0xd   : > { %v371_v0 = vld [vmem:[%s6729_s1 + $0x10] sm:$0xff]  ;;  %v369_v1 = vld [vmem:[%s6729_s1] sm:$0xff]  ;;  %p350_p3 = scmp.lt.s32.totalorder %s3978_s14, 1  ;;  %v5082_v2 = vmov 0   ;;  %v372_v3 = vld [vmem:[%s6729_s1 + $0x18] sm:$0xff]  ;;  %vm708_vm0 = vcmask 523264  }
   0xe   : > { %4621 = vset.pattern.permute.xlu1 %v5082_v2  ;;  %4620 = vset.pattern.permute.xlu0 %v5082_v2  ;;  %v370_v4 = vld [vmem:[%s6729_s1 + $0x8] sm:$0xff]  ;;  %v373_v9 = vld [vmem:[%s6729_s1 + $0x20] sm:$0xff]  ;;  %v376_v13 = vld [vmem:[%s6729_s1 + $0x38] sm:$0xff]  ;;  %vm1050_vm1 = vcmask 261120   ;;  %s5084_s17 = smov 32   ;;  %s5085_s18 = smov 64  }
   0xf   : > { %500 = vperm.xlu1 %4621, %v371_v0   ;;  %490 = vperm.xlu0 %4620, %v369_v1   ;;  %s6759_s14 = smov (!%p350_p3, %s3978_s14), 1  ;;  %v374_v8 = vld [vmem:[%s6729_s1 + $0x28] sm:$0xff]  ;;  %v375_v14 = vld [vmem:[%s6729_s1 + $0x30] sm:$0xff]  ;;  %v4622_v26 = vld [vmem:[%s6730_s2] sm:$0xff]   ;;  %s5086_s19 = smov 96   ;;  %vm1863_vm3 = vcmask 523520  }
  0x10   : > { %s4145_s23 = sshll.u32 %s6759_s14, 6  ;;  %4335 = vmatprep.mubr.msk.bf16.mxu0 %vm708_vm0, %v4622_v26  ;;  %vm2298_vm4 = vcmask 785920   ;;  %vm2733_vm5 = vcmask 1048320  }
  0x11   : > { %s5170_s26 = scalar_lea.vmem %s6728_s0, %s4145_s23  ;;  %s6707_s29 = scalar_lea.vmem %s6738_s10, %s4145_s23 }
  0x12   : > { %v361_v5 = vld [vmem:[%s5170_s26] sm:$0xff]  ;;  %v362_v6 = vld [vmem:[%s5170_s26 + $0x8] sm:$0xff]  ;;  %v363_v7 = vld [vmem:[%s5170_s26 + $0x10] sm:$0xff] }
  0x13   : > { %505 = vperm.xlu1 %4621, %v372_v3   ;;  %495 = vperm.xlu0 %4620, %v370_v4   ;;  %v433_v10 = vadd.f32 %v362_v6, %v361_v5  ;;  %v364_v11 = vld [vmem:[%s5170_s26 + $0x18] sm:$0xff]  ;;  %v365_v12 = vld [vmem:[%s5170_s26 + $0x20] sm:$0xff]  ;;  %v366_v16 = vld [vmem:[%s5170_s26 + $0x28] sm:$0xff] }
  0x14   : > { %v367_v18 = vld [vmem:[%s5170_s26 + $0x30] sm:$0xff]  ;;  %v368_v20 = vld [vmem:[%s5170_s26 + $0x38] sm:$0xff] }
  0x15   : > { %v434_v15 = vadd.f32 %v433_v10, %v363_v7 }
  0x17   : > { %515 = vperm.xlu1 %4621, %v374_v8   ;;  %510 = vperm.xlu0 %4620, %v373_v9   ;;  %v435_v17 = vadd.f32 %v434_v15, %v364_v11 }
  0x19   : > { %v436_v19 = vadd.f32 %v435_v17, %v365_v12 }
  0x1b   : > { %525 = vperm.xlu1 %4621, %v376_v13   ;;  %520 = vperm.xlu0 %4620, %v375_v14   ;;  %v437_v21 = vadd.f32 %v436_v19, %v366_v16 }
  0x1d   : > { %v438_v22 = vadd.f32 %v437_v21, %v367_v18 }
  0x1f   : > { %v439_v23 = vadd.f32 %v438_v22, %v368_v20 }
  0x21   : > { %v440_v24 = vrot.slane %v439_v23, 4 }
  0x23   : > { %v441_v25 = vadd.f32 %v440_v24, %v439_v23 }
  0x25   : > { %v442_v27 = vrot.slane %v441_v25, 2 }
  0x27   : > { %v443_v28 = vadd.f32 %v442_v27, %v441_v25 }
  0x29   : > { %v444_v29 = vrot.slane %v443_v28, 1 }
  0x2b   : > { %v445_v30 = vadd.f32 %v444_v29, %v443_v28  ;;  %v4623_v28 = vld [vmem:[%s6730_s2 + $0x8] sm:$0xff]   ;;  %v4624_v29 = vld [vmem:[%s6730_s2 + $0x10] sm:$0xff]  }
  0x2d   : > { %v447_v31 = vmul.f32 0.015625, %v445_v30  ;;  %v4625_v30 = vld [vmem:[%s6730_s2 + $0x18] sm:$0xff]  }
  0x2f   : > { %v448_v32 = vsub.f32 %v361_v5, %v447_v31  ;;  %v449_v33 = vsub.f32 %v362_v6, %v447_v31  ;;  %v450_v34 = vsub.f32 %v363_v7, %v447_v31  ;;  %v451_v37 = vsub.f32 %v364_v11, %v447_v31 }
  0x30   : > { %v452_v40 = vsub.f32 %v365_v12, %v447_v31  ;;  %v453_v43 = vsub.f32 %v366_v16, %v447_v31  ;;  %v454_v46 = vsub.f32 %v367_v18, %v447_v31  ;;  %v455_v49 = vsub.f32 %v368_v20, %v447_v31  ;;  %v4626_v31 = vld [vmem:[%s6730_s2 + $0x20] sm:$0xff]  }
  0x31   : > { %v456_v35 = vmul.f32 %v448_v32, %v448_v32  ;;  %v457_v36 = vmul.f32 %v449_v33, %v449_v33  ;;  %v458_v38 = vmul.f32 %v450_v34, %v450_v34  ;;  %v459_v41 = vmul.f32 %v451_v37, %v451_v37 }
  0x32   : > { %v460_v44 = vmul.f32 %v452_v40, %v452_v40  ;;  %v461_v47 = vmul.f32 %v453_v43, %v453_v43  ;;  %v462_v50 = vmul.f32 %v454_v46, %v454_v46  ;;  %v463_v52 = vmul.f32 %v455_v49, %v455_v49 }
  0x33   : > { %v464_v39 = vadd.f32 %v457_v36, %v456_v35  ;;  %v4630_v35 = vld [vmem:[%s6730_s2 + $0x40] sm:$0xff]   ;;  %v4631_v36 = vld [vmem:[%s6730_s2 + $0x48] sm:$0xff]  }
  0x35   : > { %v465_v42 = vadd.f32 %v464_v39, %v458_v38 }
  0x37   : > { %v466_v45 = vadd.f32 %v465_v42, %v459_v41 }
  0x39   : > { %v467_v48 = vadd.f32 %v466_v45, %v460_v44 }
  0x3b   : > { %v468_v51 = vadd.f32 %v467_v48, %v461_v47 }
  0x3d   : > { %v469_v53 = vadd.f32 %v468_v51, %v462_v50 }
  0x3f   : > { %v470_v54 = vadd.f32 %v469_v53, %v463_v52 }
  0x41   : > { %v471_v55 = vrot.slane %v470_v54, 4 }
  0x43   : > { %v472_v56 = vadd.f32 %v471_v55, %v470_v54 }
  0x45   : > { %v473_v57 = vrot.slane %v472_v56, 2 }
  0x47   : > { %v474_v58 = vadd.f32 %v473_v57, %v472_v56 }
  0x49   : > { %v475_v59 = vrot.slane %v474_v58, 1 }
  0x4b   : > { %v476_v60 = vadd.f32 %v475_v59, %v474_v58 }
  0x4d   : > { %v477_v61 = vmul.f32 0.015625, %v476_v60 }
  0x4f   : > { %v478_v62 = vadd.f32 1e-05, %v477_v61 }
  0x51   : > { %4678 = vrsqrt.f32 %v478_v62 }
  0x5b   : > { %v4679_v63 = vpop.eup %4678 }
  0x5c   : > { %v482_v2 = vmul.f32 %v4679_v63, %v450_v34  ;;  %v480_v3 = vmul.f32 %v4679_v63, %v448_v32  ;;  %v483_v4 = vmul.f32 %v4679_v63, %v451_v37  ;;  %v481_v5 = vmul.f32 %v4679_v63, %v449_v33  ;;  %v4627_v32 = vld [vmem:[%s6730_s2 + $0x28] sm:$0xff]   ;;  %v4628_v33 = vld [vmem:[%s6730_s2 + $0x30] sm:$0xff]   ;;  %v4629_v34 = vld [vmem:[%s6730_s2 + $0x38] sm:$0xff]  }
  0x5d   : > { %v485_v8 = vmul.f32 %v4679_v63, %v453_v43  ;;  %v484_v9 = vmul.f32 %v4679_v63, %v452_v40  ;;  %v487_v17 = vmul.f32 %v4679_v63, %v455_v49  ;;  %v486_v21 = vmul.f32 %v4679_v63, %v454_v46 }
  0x8e   : > { %v501_v0 = vpop.permute.xlu1 %500  ;;  %v491_v1 = vpop.permute.xlu0 %490 }
  0x8f   : > { %v530_v10 = vmul.f32 %v501_v0, %v482_v2  ;;  %v528_v11 = vmul.f32 %v491_v1, %v480_v3 }
  0x92   : > { %v506_v6 = vpop.permute.xlu1 %505  ;;  %v496_v7 = vpop.permute.xlu0 %495 }
  0x93   : > { %v531_v12 = vmul.f32 %v506_v6, %v483_v4  ;;  %v529_v13 = vmul.f32 %v496_v7, %v481_v5 }
  0x95   : > { %v584_v14 = vpack.c.bf16 %v529_v13, %v528_v11  ;;  %v585_v18 = vpack.c.bf16 %v531_v12, %v530_v10  ;;  %v4632_v11 = vld [vmem:[%s6730_s2 + $0x50] sm:$0xff]   ;;  %v4633_v12 = vld [vmem:[%s6730_s2 + $0x58] sm:$0xff]   ;;  %v4634_v13 = vld [vmem:[%s6730_s2 + $0x60] sm:$0xff]  }
  0x96   : > { %v516_v15 = vpop.permute.xlu1 %515  ;;  %v511_v16 = vpop.permute.xlu0 %510 }
  0x97   : > { %v533_v19 = vmul.f32 %v516_v15, %v485_v8  ;;  %v532_v20 = vmul.f32 %v511_v16, %v484_v9  ;;  %4327 = vmatprep.subr.bf16.mxu0 %v584_v14  ;;  %v4636_v15 = vld [vmem:[%s6730_s2 + $0x70] sm:$0xff]   ;;  %v4637_v16 = vld [vmem:[%s6730_s2 + $0x78] sm:$0xff]  }
  0x98   : > { %4328 = vmatpush3.bf16.msra.mxu0 %v584_v14  ;;  %v4635_v14 = vld [vmem:[%s6730_s2 + $0x68] sm:$0xff]  }
  0x99   : > { %4329 = vmatprep.subr.bf16.mxu0 %v585_v18  ;;  %v586_v24 = vpack.c.bf16 %v533_v19, %v532_v20  ;;  %v1030_v19 = vlaneseq }
  0x9a   : > { %v526_v22 = vpop.permute.xlu1 %525  ;;  %v521_v23 = vpop.permute.xlu0 %520 }
  0x9b   : > { %v535_v25 = vmul.f32 %v526_v22, %v487_v17  ;;  %v534_v26 = vmul.f32 %v521_v23, %v486_v21  ;;  %v4638_v17 = vld [vmem:[%s6730_s2 + $0x80] sm:$0xff]   ;;  %v1031_v20 = vand.u32 127, %v1030_v19  ;;  %v5083_v21 = vmov -1e+30  }
  0x9c   : > { %4330 = vmatpush3.bf16.msra.mxu0 %v585_v18  ;;  %v4639_v18 = vld [vmem:[%s6730_s2 + $0x88] sm:$0xff]  }
  0x9d   : > { %4331 = vmatprep.subr.bf16.mxu0 %v586_v24  ;;  %v587_v27 = vpack.c.bf16 %v535_v25, %v534_v26  ;;  %vm1032_vm2 = vcmp.lt.s32.totalorder %v1031_v20, 16 }
  0x9e   : > { %v5308_v22 = vsel %vm1032_vm2, 0.0, %v5083_v21 }
  0xa0   : > { %4332 = vmatpush3.bf16.msra.mxu0 %v586_v24 }
  0xa1   : > { %4333 = vmatprep.subr.bf16.mxu0 %v587_v27 }
  0xa4   : > { %4334 = vmatpush3.bf16.msra.mxu0 %v587_v27 }
  0xa7   : > { %4336 = vmatmul.mubr.msk.bf16.vlgmr.msra.gmra.mrb[0].mxu0 %vm708_vm0, %v4623_v28 }
  0xa8   : > { %4339 = vmatprep.mubr.msk.bf16.mxu0 %vm708_vm0, %v4624_v29 }
  0xaf   : > { %4340 = vmatmul.mubr.msk.bf16.gmra.mrb[4].mxu0 %vm708_vm0, %v4625_v30 }
  0xb0   : > { %4343 = vmatprep.mubr.msk.bf16.mxu0 %vm708_vm0, %v4626_v31 }
  0xb7   : > { %4344 = vmatmul.mubr.msk.bf16.gmra.mrb[8].mxu0 %vm708_vm0, %v4627_v32 }
  0xb8   : > { %4347 = vmatprep.mubr.msk.bf16.mxu0 %vm708_vm0, %v4628_v33 }
  0xbf   : > { %4348 = vmatmul.mubr.msk.bf16.gmra.mrb[12].mxu0 %vm708_vm0, %v4629_v34 }
  0xc0   : > { %4351 = vmatprep.mubr.msk.bf16.mxu0 %vm708_vm0, %v4630_v35 }
  0xc7   : > { %4352 = vmatmul.mubr.msk.bf16.gmra.mrb[16].mxu0 %vm708_vm0, %v4631_v36 }
  0xc8   : > { %4355 = vmatprep.mubr.msk.bf16.mxu0 %vm708_vm0, %v4632_v11 }
  0xcf   : > { %4356 = vmatmul.mubr.msk.bf16.gmra.mrb[20].mxu0 %vm708_vm0, %v4633_v12 }
  0xd0   : > { %4359 = vmatprep.mubr.msk.bf16.mxu0 %vm708_vm0, %v4634_v13 }
  0xd7   : > { %4360 = vmatmul.mubr.msk.bf16.gmra.mrb[24].mxu0 %vm708_vm0, %v4635_v14 }
  0xd8   : > { %4363 = vmatprep.mubr.msk.bf16.mxu0 %vm708_vm0, %v4636_v15 }
  0xdf   : > { %4364 = vmatmul.mubr.msk.bf16.gmra.mrb[28].mxu0 %vm708_vm0, %v4637_v16 }
  0xe0   : > { %4367 = vmatprep.mubr.msk.bf16.mxu0 %vm708_vm0, %v4638_v17 }
  0xe7   : > { %4368 = vmatmul.mubr.msk.bf16.gmra.mrb[32].mxu0 %vm708_vm0, %v4639_v18 }
 0x17a   : > { %v4337_v37 = vpop.f32.mrb[0].mxu0 }
 0x17b   : > { %v815_v38 = vpop.f32.mrb[1].mxu0 }
 0x17c   : > { %v4338_v39 = vpop.f32.mrb[2].mxu0 }
 0x17d   : > { %v1007_v40 = vpack.c.bf16 %v4338_v39, %v4337_v37  ;;  %v818_v41 = vpop.f32.mrb[3].mxu0 }
 0x17e   : > { %v1006_v42 = vpack.c.bf16 %v818_v41, %v815_v38 }
 0x180   : > { %1034 = vxpose.xlu0.c.b16.start [1/2] (short) %v1006_v42, 128 }
 0x182   : > { %v5232_v43 = vpop.f32.mrb[4].mxu0 }
 0x183   : > { %v5234_v44 = vpop.f32.mrb[5].mxu0 }
 0x184   : > { %1035 = vxpose.xlu0.c.b16.end [2/2] (short) %v1007_v40, 128  ;;  %v5236_v45 = vpop.f32.mrb[6].mxu0 }
 0x185   : > { %v1009_v46 = vpack.c.bf16 %v5236_v45, %v5232_v43  ;;  %v5240_v47 = vpop.f32.mrb[7].mxu0 }
 0x186   : > { %v1008_v48 = vpack.c.bf16 %v5240_v47, %v5234_v44 }
 0x18a   : > { %v5244_v49 = vpop.f32.mrb[8].mxu0 }
 0x18b   : > { %v5246_v50 = vpop.f32.mrb[9].mxu0 }
 0x18c   : > { %v5248_v51 = vpop.f32.mrb[10].mxu0 }
 0x18d   : > { %v1011_v52 = vpack.c.bf16 %v5248_v51, %v5244_v49  ;;  %v5252_v53 = vpop.f32.mrb[11].mxu0 }
 0x18e   : > { %v1010_v54 = vpack.c.bf16 %v5252_v53, %v5246_v50 }
 0x192   : > { %v5256_v55 = vpop.f32.mrb[12].mxu0 }
 0x193   : > { %v5258_v56 = vpop.f32.mrb[13].mxu0 }
 0x194   : > { %v5260_v57 = vpop.f32.mrb[14].mxu0 }
 0x195   : > { %v1013_v58 = vpack.c.bf16 %v5260_v57, %v5256_v55  ;;  %v5264_v59 = vpop.f32.mrb[15].mxu0 }
 0x196   : > { %v1012_v60 = vpack.c.bf16 %v5264_v59, %v5258_v56 }
 0x19a   : > { %v4353_v61 = vpop.f32.mrb[16].mxu0 }
 0x19b   : > { %v879_v62 = vpop.f32.mrb[17].mxu0 }
 0x19c   : > { %v4354_v63 = vpop.f32.mrb[18].mxu0 }
 0x19d   : > { %v1015_v0 = vpack.c.bf16 %v4354_v63, %v4353_v61  ;;  %v882_v1 = vpop.f32.mrb[19].mxu0 }
 0x19e   : > { %v1014_v2 = vpack.c.bf16 %v882_v1, %v879_v62 }
 0x1a0   : > { %4383 = vmatprep.subr.bf16.mxu1 %v1014_v2 }
 0x1a1   : > { %4384 = vmatpush3.bf16.msra.mxu1 %v1014_v2 }
 0x1a2   : > { %4385 = vmatprep.subr.bf16.mxu1 %v1015_v0 }
 0x1a5   : > { %4386 = vmatpush3.bf16.msra.mxu1 %v1015_v0 }
 0x1e6   : > { %v1042_v3 = vpop.trf.xlu0 }
 0x1e7   : > { %4387 = vmatprep.mubr.msk.bf16.mxu1 %vm1050_vm1, %v1042_v3 }
 0x1ea   : > { %v1043_v4 = vpop.trf.xlu0 }
 0x1eb   : > { %4388 = vmatmul.mubr.msk.bf16.vlgmr.msra.gmra.mrb[0].mxu1 %vm1050_vm1, %v1043_v4 }
 0x1ee   : > { %v1044_v5 = vpop.trf.xlu0 }
 0x1ef   : > { %4391 = vmatprep.mubr.msk.bf16.mxu1 %vm1050_vm1, %v1044_v5 }
 0x1f2   : > { %v1045_v6 = vpop.trf.xlu0 }
 0x1f3   : > { %4392 = vmatmul.mubr.msk.bf16.gmra.mrb[4].mxu1 %vm1050_vm1, %v1045_v6 }
 0x1f6   : > { %v1046_v7 = vpop.trf.xlu0 }
 0x1f7   : > { %4395 = vmatprep.mubr.msk.bf16.mxu1 %vm1050_vm1, %v1046_v7 }
 0x1fa   : > { %v1047_v8 = vpop.trf.xlu0 }
 0x1fb   : > { %4396 = vmatmul.mubr.msk.bf16.gmra.mrb[8].mxu1 %vm1050_vm1, %v1047_v8 }
 0x1fe   : > { %v1048_v9 = vpop.trf.xlu0 }
 0x1ff   : > { %4399 = vmatprep.mubr.msk.bf16.mxu1 %vm1050_vm1, %v1048_v9  ;;  %v4357_v9 = vpop.f32.mrb[20].mxu0 }
 0x202   : > { %v1049_v10 = vpop.trf.xlu0 }
 0x203   : > { %4400 = vmatmul.mubr.msk.bf16.gmra.mrb[12].mxu1 %vm1050_vm1, %v1049_v10  ;;  %v895_v10 = vpop.f32.mrb[21].mxu0 }
 0x204   : > { %v4358_v11 = vpop.f32.mrb[22].mxu0 }
 0x205   : > { %v5374_v12 = vpack.c.bf16 %v4358_v11, %v4357_v9  ;;  %v898_v13 = vpop.f32.mrb[23].mxu0 }
 0x206   : > { %v5376_v14 = vpack.c.bf16 %v898_v13, %v895_v10  ;;  %v4361_v15 = vpop.f32.mrb[24].mxu0 }
 0x207   : > { %v911_v16 = vpop.f32.mrb[25].mxu0 }
 0x208   : > { %v4362_v17 = vpop.f32.mrb[26].mxu0 }
 0x209   : > { %v1019_v18 = vpack.c.bf16 %v4362_v17, %v4361_v15  ;;  %v914_v19 = vpop.f32.mrb[27].mxu0 }
 0x20a   : > { %v1018_v20 = vpack.c.bf16 %v914_v19, %v911_v16  ;;  %v4365_v21 = vpop.f32.mrb[28].mxu0 }
 0x20c   : > { %4463 = vmatprep.subr.bf16.mxu0 %v1018_v20 }
 0x20d   : > { %4464 = vmatpush3.bf16.msra.mxu0 %v1018_v20 }
 0x20e   : > { %4465 = vmatprep.subr.bf16.mxu0 %v1019_v18 }
 0x211   : > { %4466 = vmatpush3.bf16.msra.mxu0 %v1019_v18 }
 0x2be   : > { %v4389_v23 = vpop.f32.mrb[0].mxu1 }
 0x2bf   : > { %v1109_v24 = vpop.f32.mrb[1].mxu1  ;;  %v5318_v29 = vadd.f32 %v4389_v23, %v5308_v22  ;;  %v927_v23 = vpop.f32.mrb[29].mxu0 }
 0x2c0   : > { %v5311_v25 = vadd.f32 %v1109_v24, %v5308_v22  ;;  %v4390_v26 = vpop.f32.mrb[2].mxu1  ;;  %v4366_v24 = vpop.f32.mrb[30].mxu0 }
 0x2c1   : > { %v1112_v27 = vpop.f32.mrb[3].mxu1  ;;  %v5323_v32 = vadd.f32 %v4390_v26, %v5308_v22  ;;  %v5378_v26 = vpack.c.bf16 %v4366_v24, %v4365_v21 }
 0x2c2   : > { %v5314_v28 = vadd.f32 %v1112_v27, %v5308_v22  ;;  %1172 = vmax.xlane.f32.xlu1 %v5311_v25  ;;  %v930_v27 = vpop.f32.mrb[31].mxu0 }
 0x2c4   : > { %1174 = vmax.xlane.f32.xlu0 %v5314_v28 }
 0x2c6   : > { %1176 = vmax.xlane.f32.xlu1 %v5318_v29  ;;  %v4393_v30 = vpop.f32.mrb[4].mxu1 }
 0x2c7   : > { %v1125_v31 = vpop.f32.mrb[5].mxu1  ;;  %v5326_v35 = vadd.f32 %v4393_v30, %v5308_v22  ;;  %v5380_v30 = vpack.c.bf16 %v930_v27, %v927_v23 }
 0x2c8   : > { %v4394_v33 = vpop.f32.mrb[6].mxu1  ;;  %v5331_v38 = vadd.f32 %v1125_v31, %v5308_v22  ;;  %v4369_v31 = vpop.f32.mrb[32].mxu0 }
 0x2c9   : > { %v1128_v34 = vpop.f32.mrb[7].mxu1  ;;  %v5339_v42 = vadd.f32 %v4394_v33, %v5308_v22  ;;  %v943_v33 = vpop.f32.mrb[33].mxu0  ;;  %4503 = vmatprep.subr.bf16.mxu0 %v5380_v30 }
 0x2ca   : > { %1178 = vmax.xlane.f32.xlu1 %v5323_v32  ;;  %v5343_v63 = vadd.f32 %v1128_v34, %v5308_v22  ;;  %v4370_v34 = vpop.f32.mrb[34].mxu0 }
 0x2ce   : > { %v4397_v36 = vpop.f32.mrb[8].mxu1  ;;  %1184 = vmax.xlane.f32.xlu1 %v5326_v35 }
 0x2cf   : > { %v1141_v37 = vpop.f32.mrb[9].mxu1  ;;  %v5363_v6 = vadd.f32 %v4397_v36, %v5308_v22  ;;  %v1023_v36 = vpack.c.bf16 %v4370_v34, %v4369_v31 }
 0x2d0   : > { %v4398_v39 = vpop.f32.mrb[10].mxu1  ;;  %v5346_v2 = vadd.f32 %v1141_v37, %v5308_v22  ;;  %v946_v37 = vpop.f32.mrb[35].mxu0 }
 0x2d1   : > { %v5334_v40 = vadd.f32 %v4398_v39, %v5308_v22  ;;  %v1144_v41 = vpop.f32.mrb[11].mxu1  ;;  %v1022_v39 = vpack.c.bf16 %v946_v37, %v943_v33 }
 0x2d2   : > { %1180 = vmax.xlane.f32.xlu1 %v5331_v38  ;;  %v5358_v5 = vadd.f32 %v1144_v41, %v5308_v22 }
 0x2d3   : > { %1194 = vmax.xlane.f32.xlu0 %v5334_v40  ;;  %4403 = vmatprep.subr.bf16.mxu1 %v1022_v39 }
 0x2d4   : > { %4404 = vmatpush3.bf16.xpose.msra.mxu1 %v1022_v39 }
 0x2d5   : > { %4405 = vmatprep.subr.bf16.mxu1 %v1023_v36 }
 0x2d6   : > { %v4401_v61 = vpop.f32.mrb[12].mxu1  ;;  %1186 = vmax.xlane.f32.xlu1 %v5339_v42 }
 0x2d7   : > { %v1157_v62 = vpop.f32.mrb[13].mxu1  ;;  %v5371_v8 = vadd.f32 %v4401_v61, %v5308_v22 }
 0x2d8   : > { %v4402_v0 = vpop.f32.mrb[14].mxu1  ;;  %v5367_v7 = vadd.f32 %v1157_v62, %v5308_v22 }
 0x2d9   : > { %v1160_v1 = vpop.f32.mrb[15].mxu1  ;;  %v5353_v4 = vadd.f32 %v4402_v0, %v5308_v22 }
 0x2da   : > { %v5349_v3 = vadd.f32 %v1160_v1, %v5308_v22  ;;  %1182 = vmax.xlane.f32.xlu1 %v5343_v63 }
 0x2dc   : > { %1198 = vmax.xlane.f32.xlu0 %v5349_v3  ;;  %4406 = vmatpush3.bf16.xpose.msra.mxu1 %v1023_v36 }
 0x2dd   : > { %4423 = vmatprep.subr.bf16.mxu1 %v5376_v14 }
 0x2de   : > { %1188 = vmax.xlane.f32.xlu1 %v5346_v2 }
 0x2e0   : > { %1202 = vmax.xlane.f32.xlu0 %v5353_v4 }
 0x2e2   : > { %1190 = vmax.xlane.f32.xlu1 %v5358_v5 }
 0x2e6   : > { %1192 = vmax.xlane.f32.xlu1 %v5363_v6 }
 0x2ea   : > { %1196 = vmax.xlane.f32.xlu1 %v5367_v7 }
 0x2ee   : > { %1200 = vmax.xlane.f32.xlu1 %v5371_v8 }
 0x34f   : > { %v1173_v41 = vpop.xlane.xlu1 %1172 }
 0x350   : > { %v1204_v61 = vsub.f32 %v5311_v25, %v1173_v41 }
 0x351   : > { %v1175_v62 = vpop.xlane.xlu0 %1174 }
 0x352   : > { %v1220_v0 = vmul.f32 1.442695, %v1204_v61  ;;  %v1205_v1 = vsub.f32 %v5314_v28, %v1175_v62 }
 0x353   : > { %v1177_v9 = vpop.xlane.xlu1 %1176 }
 0x354   : > { %4680 = vpow2.f32 %v1220_v0  ;;  %v1222_v10 = vmul.f32 1.442695, %v1205_v1  ;;  %v1206_v11 = vsub.f32 %v5318_v29, %v1177_v9 }
 0x356   : > { %4682 = vpow2.f32 %v1222_v10  ;;  %v1224_v13 = vmul.f32 1.442695, %v1206_v11 }
 0x357   : > { %v1179_v15 = vpop.xlane.xlu1 %1178 }
 0x358   : > { %4684 = vpow2.f32 %v1224_v13  ;;  %v1207_v16 = vsub.f32 %v5323_v32, %v1179_v15 }
 0x35a   : > { %v1226_v17 = vmul.f32 1.442695, %v1207_v16 }
 0x35b   : > { %v1185_v25 = vpop.xlane.xlu1 %1184 }
 0x35c   : > { %4686 = vpow2.f32 %v1226_v17  ;;  %v1210_v20 = vsub.f32 %v5326_v35, %v1185_v25 }
 0x35e   : > { %v5388_v18 = vpop.eup %4680  ;;  %v1232_v24 = vmul.f32 1.442695, %v1210_v20 }
 0x35f   : > { %1252 = vadd.xlane.f32.xlu1 %v5388_v18  ;;  %v1181_v19 = vpop.xlane.xlu1 %1180 }
 0x360   : > { %v5391_v28 = vpop.eup %4682  ;;  %v1208_v29 = vsub.f32 %v5331_v38, %v1181_v19  ;;  %v1195_v38 = vpop.xlane.xlu0 %1194 }
 0x361   : > { %1254 = vadd.xlane.f32.xlu0 %v5391_v28  ;;  %v1215_v0 = vsub.f32 %v5334_v40, %v1195_v38  ;;  %v4641_v38 = vld [vmem:[%s6730_s2 + $0x98] sm:$0xff]  }
 0x362   : > { %v5396_v21 = vpop.eup %4684  ;;  %v1228_v23 = vmul.f32 1.442695, %v1208_v29 }
 0x363   : > { %1256 = vadd.xlane.f32.xlu1 %v5396_v21  ;;  %v1187_v32 = vpop.xlane.xlu1 %1186  ;;  %v1242_v10 = vmul.f32 1.442695, %v1215_v0 }
 0x364   : > { %4688 = vpow2.f32 %v1228_v23  ;;  %v1211_v31 = vsub.f32 %v5339_v42, %v1187_v32 }
 0x365   : > { %4690 = vpow2.f32 %v1232_v24 }
 0x366   : > { %v5399_v27 = vpop.eup %4686  ;;  %v1234_v36 = vmul.f32 1.442695, %v1211_v31 }
 0x367   : > { %1258 = vadd.xlane.f32.xlu0 %v5399_v27  ;;  %v1183_v33 = vpop.xlane.xlu1 %1182 }
 0x368   : > { %v1209_v35 = vsub.f32 %v5343_v63, %v1183_v33 }
 0x369   : > { %v1199_v61 = vpop.xlane.xlu0 %1198 }
 0x36a   : > { %v1230_v34 = vmul.f32 1.442695, %v1209_v35  ;;  %v1217_v11 = vsub.f32 %v5349_v3, %v1199_v61  ;;  %v4644_v61 = vld [vmem:[%s6730_s2 + $0xb0] sm:$0xff]  }
 0x36b   : > { %v1189_v37 = vpop.xlane.xlu1 %1188 }
 0x36c   : > { %4692 = vpow2.f32 %v1230_v34  ;;  %v1212_v39 = vsub.f32 %v5346_v2, %v1189_v37  ;;  %v1246_v17 = vmul.f32 1.442695, %v1217_v11  ;;  %v4642_v37 = vld [vmem:[%s6730_s2 + $0xa0] sm:$0xff]  }
 0x36d   : > { %4694 = vpow2.f32 %v1234_v36  ;;  %v1203_v13 = vpop.xlane.xlu0 %1202 }
 0x36e   : > { %v5405_v41 = vpop.eup %4688  ;;  %v1236_v62 = vmul.f32 1.442695, %v1212_v39  ;;  %v4643_v39 = vld [vmem:[%s6730_s2 + $0xa8] sm:$0xff]  }
 0x36f   : > { %1260 = vadd.xlane.f32.xlu1 %v5405_v41  ;;  %v1191_v42 = vpop.xlane.xlu1 %1190  ;;  %v5410_v1 = vpop.eup %4690 }
 0x370   : > { %4696 = vpow2.f32 %v1236_v62  ;;  %v1213_v63 = vsub.f32 %v5358_v5, %v1191_v42  ;;  %v1219_v5 = vsub.f32 %v5353_v4, %v1203_v13  ;;  %v4645_v62 = vld [vmem:[%s6730_s2 + $0xb8] sm:$0xff]  }
 0x372   : > { %v1238_v9 = vmul.f32 1.442695, %v1213_v63 }
 0x373   : > { %1264 = vadd.xlane.f32.xlu1 %v5410_v1  ;;  %v1193_v2 = vpop.xlane.xlu1 %1192 }
 0x374   : > { %4698 = vpow2.f32 %v1238_v9  ;;  %v1214_v40 = vsub.f32 %v5363_v6, %v1193_v2  ;;  %v1250_v6 = vmul.f32 1.442695, %v1219_v5 }
 0x375   : > { %4700 = vpow2.f32 %v1242_v10 }
 0x376   : > { %v5415_v15 = vpop.eup %4692  ;;  %v1240_v16 = vmul.f32 1.442695, %v1214_v40 }
 0x377   : > { %1262 = vadd.xlane.f32.xlu0 %v5415_v15  ;;  %v1197_v25 = vpop.xlane.xlu1 %1196  ;;  %v5420_v19 = vpop.eup %4694 }
 0x378   : > { %4702 = vpow2.f32 %v1240_v16  ;;  %v1216_v3 = vsub.f32 %v5367_v7, %v1197_v25 }
 0x379   : > { %4704 = vpow2.f32 %v1246_v17 }
 0x37a   : > { %v5422_v20 = vpop.eup %4696  ;;  %v1244_v29 = vmul.f32 1.442695, %v1216_v3 }
 0x37b   : > { %1266 = vadd.xlane.f32.xlu0 %v5420_v19  ;;  %1268 = vadd.xlane.f32.xlu1 %v5422_v20  ;;  %v1201_v23 = vpop.xlane.xlu1 %1200 }
 0x37c   : > { %4706 = vpow2.f32 %v1244_v29  ;;  %v1218_v4 = vsub.f32 %v5371_v8, %v1201_v23  ;;  %v4640_v8 = vld [vmem:[%s6730_s2 + $0x90] sm:$0xff]  }
 0x37d   : > { %4708 = vpow2.f32 %v1250_v6  ;;  %4371 = vmatprep.mubr.msk.bf16.mxu0 %vm708_vm0, %v4640_v8 }
 0x37e   : > { %v5427_v32 = vpop.eup %4698  ;;  %v1248_v24 = vmul.f32 1.442695, %v1218_v4  ;;  %4372 = vmatmul.mubr.msk.bf16.gmra.mrb[36].mxu0 %vm708_vm0, %v4641_v38 }
 0x37f   : > { %1270 = vadd.xlane.f32.xlu0 %v5427_v32  ;;  %v5430_v7 = vpop.eup %4700  ;;  %4375 = vmatprep.mubr.msk.bf16.mxu0 %vm708_vm0, %v4642_v37 }
 0x380   : > { %4710 = vpow2.f32 %v1248_v24 }
 0x382   : > { %v5432_v31 = vpop.eup %4702 }
 0x383   : > { %1274 = vadd.xlane.f32.xlu0 %v5430_v7  ;;  %1272 = vadd.xlane.f32.xlu1 %v5432_v31  ;;  %v5436_v33 = vpop.eup %4704 }
 0x386   : > { %v5441_v35 = vpop.eup %4706  ;;  %4376 = vmatmul.mubr.msk.bf16.gmra.mrb[40].mxu0 %vm708_vm0, %v4643_v39 }
 0x387   : > { %1278 = vadd.xlane.f32.xlu0 %v5436_v33  ;;  %1276 = vadd.xlane.f32.xlu1 %v5441_v35  ;;  %v5449_v34 = vpop.eup %4708 }
 0x388   : > { %4379 = vmatprep.mubr.msk.bf16.mxu0 %vm708_vm0, %v4644_v61 }
 0x38a   : > { %v5452_v36 = vpop.eup %4710 }
 0x38b   : > { %1282 = vadd.xlane.f32.xlu0 %v5449_v34  ;;  %1280 = vadd.xlane.f32.xlu1 %v5452_v36 }
 0x38e   : > { %4380 = vmatmul.mubr.msk.bf16.gmra.mrb[44].mxu0 %vm708_vm0, %v4645_v62 }
 0x3b8   : > { %1872 = vxpose.xlu0.c.b16.start [1/2] (short) %v1010_v54, 128  ;;  %1437 = vxpose.xlu1.c.b16.start [1/2] (short) %v1008_v48, 128 }
 0x3bc   : > { %1873 = vxpose.xlu0.c.b16.end [2/2] (short) %v1011_v52, 128  ;;  %1438 = vxpose.xlu1.c.b16.end [2/2] (short) %v1009_v46, 128 }
 0x3d5   : > { %2307 = vxpose.xlu1.c.b16.start [1/2] (short) %v1012_v60, 128 }
 0x3d9   : > { %2308 = vxpose.xlu1.c.b16.end [2/2] (short) %v1013_v58, 128 }
 0x3ec   : > { %v1253_v50 = vpop.xlane.xlu1 %1252 }
 0x3ed   : > { %4712 = vrcp.f32 %v1253_v50 }
 0x3ee   : > { %v1255_v44 = vpop.xlane.xlu0 %1254 }
 0x3ef   : > { %4714 = vrcp.f32 %v1255_v44 }
 0x3f0   : > { %v1257_v47 = vpop.xlane.xlu1 %1256 }
 0x3f1   : > { %4716 = vrcp.f32 %v1257_v47 }
 0x3f4   : > { %v1259_v48 = vpop.xlane.xlu0 %1258 }
 0x3f5   : > { %4718 = vrcp.f32 %v1259_v48 }
 0x3f7   : > { %v4713_v49 = vpop.eup %4712 }
 0x3f8   : > { %v1300_v43 = vmul.f32 %v4713_v49, %v5388_v18 }
 0x3f9   : > { %v4715_v51 = vpop.eup %4714 }
 0x3fa   : > { %v1301_v45 = vmul.f32 %v4715_v51, %v5391_v28 }
 0x3fb   : > { %v4717_v52 = vpop.eup %4716 }
 0x3fc   : > { %v1316_v46 = vpack.c.bf16 %v1301_v45, %v1300_v43  ;;  %v1261_v53 = vpop.xlane.xlu1 %1260  ;;  %v1302_v55 = vmul.f32 %v4717_v52, %v5396_v21 }
 0x3fd   : > { %4720 = vrcp.f32 %v1261_v53 }
 0x3fe   : > { %4407 = vmatprep.mubr.bf16.mxu1 %v1316_v46 }
 0x3ff   : > { %v4719_v54 = vpop.eup %4718 }
 0x400   : > { %v1303_v56 = vmul.f32 %v4719_v54, %v5399_v27  ;;  %v1265_v58 = vpop.xlane.xlu1 %1264 }
 0x402   : > { %v1317_v57 = vpack.c.bf16 %v1303_v56, %v1302_v55 }
 0x404   : > { %v1263_v59 = vpop.xlane.xlu0 %1262  ;;  %4408 = vmatmul.mubr.bf16.vlgmr.msra.gmra.mrb[16].mxu1 %v1317_v57 }
 0x405   : > { %4722 = vrcp.f32 %v1263_v59  ;;  %4424 = vmatpush3.bf16.msra.mxu1 %v5376_v14 }
 0x406   : > { %4425 = vmatprep.subr.bf16.mxu1 %v5374_v12  ;;  %4724 = vrcp.f32 %v1265_v58 }
 0x407   : > { %v4721_v21 = vpop.eup %4720 }
 0x408   : > { %v1267_v60 = vpop.xlane.xlu0 %1266  ;;  %v1269_v18 = vpop.xlane.xlu1 %1268  ;;  %v1304_v63 = vmul.f32 %v4721_v21, %v5405_v41 }
 0x409   : > { %4726 = vrcp.f32 %v1267_v60  ;;  %4426 = vmatpush3.bf16.msra.mxu1 %v5374_v12 }
 0x40a   : > { %4728 = vrcp.f32 %v1269_v18 }
 0x40c   : > { %v1271_v28 = vpop.xlane.xlu0 %1270 }
 0x40d   : > { %4730 = vrcp.f32 %v1271_v28 }
 0x40f   : > { %v4723_v27 = vpop.eup %4722 }
 0x410   : > { %v1275_v0 = vpop.xlane.xlu0 %1274  ;;  %v1273_v42 = vpop.xlane.xlu1 %1272  ;;  %v1305_v9 = vmul.f32 %v4723_v27, %v5415_v15 }
 0x411   : > { %v4725_v14 = vpop.eup %4724  ;;  %4732 = vrcp.f32 %v1275_v0 }
 0x412   : > { %4734 = vrcp.f32 %v1273_v42  ;;  %v1318_v10 = vpack.c.bf16 %v1305_v9, %v1304_v63  ;;  %v1306_v12 = vmul.f32 %v4725_v14, %v5410_v1 }
 0x413   : > { %v4727_v11 = vpop.eup %4726 }
 0x414   : > { %v1279_v2 = vpop.xlane.xlu0 %1278  ;;  %v1277_v13 = vpop.xlane.xlu1 %1276  ;;  %4411 = vmatprep.mubr.bf16.mxu1 %v1318_v10  ;;  %v1307_v40 = vmul.f32 %v4727_v11, %v5420_v19 }
 0x415   : > { %v4729_v16 = vpop.eup %4728  ;;  %4736 = vrcp.f32 %v1279_v2 }
 0x416   : > { %4738 = vrcp.f32 %v1277_v13  ;;  %v1319_v17 = vpack.c.bf16 %v1307_v40, %v1306_v12  ;;  %v1308_v15 = vmul.f32 %v4729_v16, %v5422_v20 }
 0x417   : > { %v4731_v5 = vpop.eup %4730 }
 0x418   : > { %v1283_v41 = vpop.xlane.xlu0 %1282  ;;  %v1281_v25 = vpop.xlane.xlu1 %1280  ;;  %4412 = vmatmul.mubr.bf16.gmra.mrb[20].mxu1 %v1319_v17  ;;  %v1309_v3 = vmul.f32 %v4731_v5, %v5427_v32 }
 0x419   : > { %4740 = vrcp.f32 %v1283_v41 }
 0x41a   : > { %4742 = vrcp.f32 %v1281_v25  ;;  %v1320_v29 = vpack.c.bf16 %v1309_v3, %v1308_v15 }
 0x41b   : > { %v4733_v6 = vpop.eup %4732 }
 0x41c   : > { %v4735_v23 = vpop.eup %4734  ;;  %4415 = vmatprep.mubr.bf16.mxu1 %v1320_v29  ;;  %v1311_v1 = vmul.f32 %v4733_v6, %v5430_v7 }
 0x41d   : > { %v1310_v19 = vmul.f32 %v4735_v23, %v5432_v31 }
 0x41e   : > { %v1880_v4 = vpop.trf.xlu0  ;;  %v1445_v24 = vpop.trf.xlu1 }
 0x41f   : > { %v4737_v8 = vpop.eup %4736  ;;  %v1321_v38 = vpack.c.bf16 %v1311_v1, %v1310_v19  ;;  %4467 = vmatprep.mubr.msk.bf16.mxu0 %vm1050_vm1, %v1880_v4 }
 0x420   : > { %v4739_v37 = vpop.eup %4738  ;;  %v1313_v20 = vmul.f32 %v4737_v8, %v5436_v33 }
 0x421   : > { %4416 = vmatmul.mubr.bf16.gmra.mrb[24].mxu1 %v1321_v38  ;;  %v1312_v32 = vmul.f32 %v4739_v37, %v5441_v35 }
 0x422   : > { %v1881_v39 = vpop.trf.xlu0  ;;  %v1446_v61 = vpop.trf.xlu1 }
 0x423   : > { %v4741_v62 = vpop.eup %4740  ;;  %4468 = vmatmul.mubr.msk.bf16.vlgmr.msra.gmra.mrb[48].mxu0 %vm1050_vm1, %v1881_v39  ;;  %v1322_v7 = vpack.c.bf16 %v1313_v20, %v1312_v32 }
 0x424   : > { %v4743_v50 = vpop.eup %4742  ;;  %4504 = vmatpush3.bf16.msra.mxu0 %v5380_v30  ;;  %v1315_v31 = vmul.f32 %v4741_v62, %v5449_v34 }
 0x425   : > { %4419 = vmatprep.mubr.bf16.mxu1 %v1322_v7  ;;  %4505 = vmatprep.subr.bf16.mxu0 %v5378_v26  ;;  %v1314_v44 = vmul.f32 %v4743_v50, %v5452_v36 }
 0x426   : > { %v1447_v33 = vpop.trf.xlu1  ;;  %v1882_v47 = vpop.trf.xlu0 }
 0x427   : > { %v1323_v48 = vpack.c.bf16 %v1315_v31, %v1314_v44  ;;  %4471 = vmatprep.mubr.msk.bf16.mxu0 %vm1050_vm1, %v1882_v47 }
 0x428   : > { %4506 = vmatpush3.bf16.msra.mxu0 %v5378_v26 }
 0x429   : > { %4420 = vmatmul.mubr.bf16.gmra.mrb[28].mxu1 %v1323_v48 }
 0x42a   : > { %4427 = vmatprep.mubr.msk.bf16.mxu1 %vm1050_vm1, %v1445_v24  ;;  %v1448_v35 = vpop.trf.xlu1  ;;  %v1883_v49 = vpop.trf.xlu0 }
 0x42b   : > { %4472 = vmatmul.mubr.msk.bf16.gmra.mrb[52].mxu0 %vm1050_vm1, %v1883_v49 }
 0x42e   : > { %v1449_v30 = vpop.trf.xlu1  ;;  %v1884_v34 = vpop.trf.xlu0 }
 0x42f   : > { %4475 = vmatprep.mubr.msk.bf16.mxu0 %vm1050_vm1, %v1884_v34 }
 0x431   : > { %4428 = vmatmul.mubr.msk.bf16.vlgmr.msra.gmra.mrb[32].mxu1 %vm1050_vm1, %v1446_v61 }
 0x432   : > { %4431 = vmatprep.mubr.msk.bf16.mxu1 %vm1050_vm1, %v1447_v33  ;;  %v1450_v36 = vpop.trf.xlu1  ;;  %v1885_v51 = vpop.trf.xlu0 }
 0x433   : > { %4476 = vmatmul.mubr.msk.bf16.gmra.mrb[56].mxu0 %vm1050_vm1, %v1885_v51 }
 0x436   : > { %v1451_v26 = vpop.trf.xlu1  ;;  %v1886_v43 = vpop.trf.xlu0 }
 0x437   : > { %4479 = vmatprep.mubr.msk.bf16.mxu0 %vm1050_vm1, %v1886_v43 }
 0x439   : > { %4432 = vmatmul.mubr.msk.bf16.gmra.mrb[36].mxu1 %vm1050_vm1, %v1448_v35 }
 0x43a   : > { %4435 = vmatprep.mubr.msk.bf16.mxu1 %vm1050_vm1, %v1449_v30  ;;  %v1452_v45 = vpop.trf.xlu1  ;;  %v1887_v46 = vpop.trf.xlu0 }
 0x43b   : > { %4480 = vmatmul.mubr.msk.bf16.gmra.mrb[60].mxu0 %vm1050_vm1, %v1887_v46 }
 0x43e   : > { %v2315_v52 = vpop.trf.xlu1 }
 0x43f   : > { %4507 = vmatprep.mubr.msk.bf16.mxu0 %vm1050_vm1, %v2315_v52 }
 0x441   : > { %4436 = vmatmul.mubr.msk.bf16.gmra.mrb[40].mxu1 %vm1050_vm1, %v1450_v36 }
 0x442   : > { %4439 = vmatprep.mubr.msk.bf16.mxu1 %vm1050_vm1, %v1451_v26  ;;  %v2316_v53 = vpop.trf.xlu1 }
 0x443   : > { %4508 = vmatmul.mubr.msk.bf16.vlgmr.msra.gmra.mrb[64].mxu0 %vm1050_vm1, %v2316_v53 }
 0x446   : > { %v2317_v54 = vpop.trf.xlu1 }
 0x447   : > { %4511 = vmatprep.mubr.msk.bf16.mxu0 %vm1050_vm1, %v2317_v54 }
 0x449   : > { %4440 = vmatmul.mubr.msk.bf16.gmra.mrb[44].mxu1 %vm1050_vm1, %v1452_v45 }
 0x44a   : > { %v2318_v55 = vpop.trf.xlu1 }
 0x44b   : > { %4512 = vmatmul.mubr.msk.bf16.gmra.mrb[68].mxu0 %vm1050_vm1, %v2318_v55 }
 0x44e   : > { %v2319_v56 = vpop.trf.xlu1 }
 0x44f   : > { %4515 = vmatprep.mubr.msk.bf16.mxu0 %vm1050_vm1, %v2319_v56 }
 0x451   : > { %v4373_v60 = vpop.f32.mrb[36].mxu0 }
 0x452   : > { %v2320_v57 = vpop.trf.xlu1  ;;  %v959_v18 = vpop.f32.mrb[37].mxu0 }
 0x453   : > { %4516 = vmatmul.mubr.msk.bf16.gmra.mrb[72].mxu0 %vm1050_vm1, %v2320_v57  ;;  %v4374_v28 = vpop.f32.mrb[38].mxu0 }
 0x454   : > { %v1025_v21 = vpack.c.bf16 %v4374_v28, %v4373_v60  ;;  %v962_v27 = vpop.f32.mrb[39].mxu0 }
 0x455   : > { %v1024_v0 = vpack.c.bf16 %v962_v27, %v959_v18 }
 0x456   : > { %v2321_v58 = vpop.trf.xlu1 }
 0x457   : > { %4519 = vmatprep.mubr.msk.bf16.mxu0 %vm1050_vm1, %v2321_v58  ;;  %4443 = vmatprep.subr.bf16.mxu1 %v1024_v0 }
 0x458   : > { %4444 = vmatpush3.bf16.xpose.msra.mxu1 %v1024_v0 }
 0x459   : > { %4445 = vmatprep.subr.bf16.mxu1 %v1025_v21  ;;  %v4377_v42 = vpop.f32.mrb[40].mxu0 }
 0x45a   : > { %v2322_v59 = vpop.trf.xlu1  ;;  %v975_v63 = vpop.f32.mrb[41].mxu0 }
 0x45b   : > { %4520 = vmatmul.mubr.msk.bf16.gmra.mrb[76].mxu0 %vm1050_vm1, %v2322_v59  ;;  %v4378_v9 = vpop.f32.mrb[42].mxu0 }
 0x45c   : > { %v5536_v14 = vpack.c.bf16 %v4378_v9, %v4377_v42  ;;  %v978_v10 = vpop.f32.mrb[43].mxu0 }
 0x45d   : > { %v5538_v11 = vpack.c.bf16 %v978_v10, %v975_v63 }
 0x45e   : > { %6744 = vst [vmem:[#allocation3_spill] sm:$0xff] %v5536_v14 }
 0x45f   : > { %6745 = vst [vmem:[#allocation4_spill] sm:$0xff] %v5538_v11 }
 0x460   : > { %4446 = vmatpush3.bf16.xpose.msra.mxu1 %v1025_v21 }
 0x461   : > { %v4381_v2 = vpop.f32.mrb[44].mxu0  ;;  %4483 = vmatprep.subr.bf16.mxu1 %v5538_v11 }
 0x462   : > { %v991_v13 = vpop.f32.mrb[45].mxu0 }
 0x463   : > { %v4382_v12 = vpop.f32.mrb[46].mxu0 }
 0x464   : > { %v5541_v40 = vpack.c.bf16 %v4382_v12, %v4381_v2  ;;  %v994_v16 = vpop.f32.mrb[47].mxu0 }
 0x465   : > { %v5543_v17 = vpack.c.bf16 %v994_v16, %v991_v13 }
 0x466   : > { %6746 = vst [vmem:[#allocation5_spill] sm:$0xff] %v5541_v40 }
 0x467   : > { %6747 = vst [vmem:[#allocation6_spill] sm:$0xff] %v5543_v17 }
 0x4d7   : > { %v4409_v5 = vpop.f32.mrb[16].mxu1 }
 0x4d8   : > { %v1358_v41 = vpop.f32.mrb[17].mxu1 }
 0x4d9   : > { %v4410_v25 = vpop.f32.mrb[18].mxu1 }
 0x4da   : > { %v1422_v15 = vpack.c.bf16 %v4410_v25, %v4409_v5  ;;  %v1361_v3 = vpop.f32.mrb[19].mxu1 }
 0x4db   : > { %v1421_v29 = vpack.c.bf16 %v1361_v3, %v1358_v41 }
 0x4dc   : > { %1430 = vst.msk [vmem:[#allocation2 + $0x8] sm:$0xff] %vm1050_vm1, %v1422_v15 }
 0x4dd   : > { %1429 = vst.msk [vmem:[#allocation2] sm:$0xff] %vm1050_vm1, %v1421_v29 }
 0x4eb   : > { %v4413_v6 = vpop.f32.mrb[20].mxu1 }
 0x4ec   : > { %v1374_v23 = vpop.f32.mrb[21].mxu1 }
 0x4ed   : > { %v4414_v1 = vpop.f32.mrb[22].mxu1 }
 0x4ee   : > { %v1424_v19 = vpack.c.bf16 %v4414_v1, %v4413_v6  ;;  %v1377_v4 = vpop.f32.mrb[23].mxu1 }
 0x4ef   : > { %v1423_v24 = vpack.c.bf16 %v1377_v4, %v1374_v23 }
 0x4f0   : > { %1432 = vst.msk [vmem:[#allocation2 + $0x18] sm:$0xff] %vm1050_vm1, %v1424_v19 }
 0x4f1   : > { %1431 = vst.msk [vmem:[#allocation2 + $0x10] sm:$0xff] %vm1050_vm1, %v1423_v24 }
 0x4f4   : > { %v4417_v8 = vpop.f32.mrb[24].mxu1 }
 0x4f5   : > { %v1390_v38 = vpop.f32.mrb[25].mxu1 }
 0x4f6   : > { %v4418_v37 = vpop.f32.mrb[26].mxu1  ;;  %v4469_v20 = vpop.f32.mrb[48].mxu0 }
 0x4f7   : > { %v1426_v32 = vpack.c.bf16 %v4418_v37, %v4417_v8  ;;  %v1393_v39 = vpop.f32.mrb[27].mxu1  ;;  %v1946_v61 = vpop.f32.mrb[49].mxu0  ;;  %v5603_v10 = vadd.f32 %v4469_v20, %v5308_v22 }
 0x4f8   : > { %v1425_v62 = vpack.c.bf16 %v1393_v39, %v1390_v38  ;;  %v5550_v7 = vadd.f32 %v1946_v61, %v5308_v22  ;;  %v4470_v50 = vpop.f32.mrb[50].mxu0 }
 0x4f9   : > { %1434 = vst.msk [vmem:[#allocation2 + $0x28] sm:$0xff] %vm1050_vm1, %v1426_v32  ;;  %v1949_v31 = vpop.f32.mrb[51].mxu0  ;;  %v5598_v63 = vadd.f32 %v4470_v50, %v5308_v22 }
 0x4fa   : > { %1433 = vst.msk [vmem:[#allocation2 + $0x20] sm:$0xff] %vm1050_vm1, %v1425_v62  ;;  %2009 = vmax.xlane.f32.xlu0 %v5550_v7  ;;  %v5586_v59 = vadd.f32 %v1949_v31, %v5308_v22 }
 0x4fc   : > { %v4421_v44 = vpop.f32.mrb[28].mxu1 }
 0x4fd   : > { %v1406_v33 = vpop.f32.mrb[29].mxu1 }
 0x4fe   : > { %v4422_v47 = vpop.f32.mrb[30].mxu1  ;;  %v5555_v48 = vpop.f32.mrb[52].mxu0 }
 0x4ff   : > { %v1428_v35 = vpack.c.bf16 %v4422_v47, %v4421_v44  ;;  %v1409_v49 = vpop.f32.mrb[31].mxu1  ;;  %v5557_v30 = vpop.f32.mrb[53].mxu0 }
 0x500   : > { %v1427_v34 = vpack.c.bf16 %v1409_v49, %v1406_v33  ;;  %v5559_v36 = vpop.f32.mrb[54].mxu0 }
 0x501   : > { %1436 = vst.msk [vmem:[#allocation2 + $0x38] sm:$0xff] %vm1050_vm1, %v1428_v35  ;;  %v5562_v51 = vpop.f32.mrb[55].mxu0 }
 0x502   : > { %1435 = vst.msk [vmem:[#allocation2 + $0x30] sm:$0xff] %vm1050_vm1, %v1427_v34  ;;  %v5650_v44 = vadd.f32 %v5562_v51, %v5308_v22  ;;  %v5658_v34 = vadd.f32 %v5559_v36, %v5308_v22 }
 0x504   : > { %v4429_v26 = vpop.f32.mrb[32].mxu1 }
 0x505   : > { %v5566_v43 = vadd.f32 %v4429_v26, %v5308_v22  ;;  %v1511_v45 = vpop.f32.mrb[33].mxu1 }
 0x506   : > { %v4430_v46 = vpop.f32.mrb[34].mxu1  ;;  %v5568_v52 = vpop.f32.mrb[56].mxu0  ;;  %v5579_v57 = vadd.f32 %v1511_v45, %v5308_v22 }
 0x507   : > { %v1514_v53 = vpop.f32.mrb[35].mxu1  ;;  %1578 = vmax.xlane.f32.xlu0 %v5566_v43  ;;  %v5571_v54 = vpop.f32.mrb[57].mxu0  ;;  %v5589_v18 = vadd.f32 %v4430_v46, %v5308_v22 }
 0x508   : > { %v5574_v55 = vadd.f32 %v1514_v53, %v5308_v22  ;;  %v5576_v56 = vpop.f32.mrb[58].mxu0 }
 0x509   : > { %v5581_v58 = vpop.f32.mrb[59].mxu0 }
 0x50a   : > { %1576 = vmax.xlane.f32.xlu1 %v5574_v55  ;;  %v5668_v45 = vadd.f32 %v5581_v58, %v5308_v22  ;;  %v5685_v58 = vadd.f32 %v5557_v30, %v5308_v22  ;;  %v5704_v30 = vadd.f32 %v5571_v54, %v5308_v22 }
 0x50b   : > { %1574 = vmax.xlane.f32.xlu0 %v5579_v57 }
 0x50c   : > { %v4433_v60 = vpop.f32.mrb[36].mxu1 }
 0x50d   : > { %v1527_v28 = vpop.f32.mrb[37].mxu1  ;;  %v5607_v13 = vadd.f32 %v4433_v60, %v5308_v22 }
 0x50e   : > { %2011 = vmax.xlane.f32.xlu1 %v5586_v59  ;;  %v4434_v21 = vpop.f32.mrb[38].mxu1  ;;  %v5592_v27 = vpop.f32.mrb[60].mxu0  ;;  %v5619_v6 = vadd.f32 %v1527_v28, %v5308_v22  ;;  %v5680_v28 = vadd.f32 %v5576_v56, %v5308_v22 }
 0x50f   : > { %1580 = vmax.xlane.f32.xlu0 %v5589_v18  ;;  %v1530_v0 = vpop.f32.mrb[39].mxu1  ;;  %v5595_v42 = vpop.f32.mrb[61].mxu0  ;;  %v5627_v4 = vadd.f32 %v4434_v21, %v5308_v22 }
 0x510   : > { %v5600_v9 = vpop.f32.mrb[62].mxu0  ;;  %v5637_v61 = vadd.f32 %v1530_v0, %v5308_v22  ;;  %v5722_v54 = vadd.f32 %v5595_v42, %v5308_v22 }
 0x511   : > { %v1997_v2 = vpop.f32.mrb[63].mxu0  ;;  %v5699_v56 = vadd.f32 %v5600_v9, %v5308_v22 }
 0x512   : > { %2015 = vmax.xlane.f32.xlu1 %v5598_v63  ;;  %v5690_v0 = vadd.f32 %v1997_v2, %v5308_v22 }
 0x513   : > { %2013 = vmax.xlane.f32.xlu0 %v5603_v10 }
 0x514   : > { %v4437_v12 = vpop.f32.mrb[40].mxu1 }
 0x515   : > { %v1543_v16 = vpop.f32.mrb[41].mxu1  ;;  %v5645_v31 = vadd.f32 %v4437_v12, %v5308_v22  ;;  %v5694_v12 = vadd.f32 %v5555_v48, %v5308_v22  ;;  %v5713_v48 = vadd.f32 %v5568_v52, %v5308_v22  ;;  %v5731_v52 = vadd.f32 %v5592_v27, %v5308_v22 }
 0x516   : > { %v4438_v5 = vpop.f32.mrb[42].mxu1  ;;  %v5610_v41 = vpop.f32.mrb[64].mxu0  ;;  %v5654_v49 = vadd.f32 %v1543_v16, %v5308_v22 }
 0x517   : > { %v5613_v25 = vadd.f32 %v4438_v5, %v5308_v22  ;;  %1586 = vmax.xlane.f32.xlu0 %v5607_v13  ;;  %v1546_v15 = vpop.f32.mrb[43].mxu1  ;;  %v5616_v3 = vpop.f32.mrb[65].mxu0  ;;  %v5749_v27 = vadd.f32 %v5610_v41, %v5308_v22 }
 0x518   : > { %v4510_v29 = vpop.f32.mrb[66].mxu0  ;;  %v5623_v23 = vadd.f32 %v1546_v15, %v5308_v22  ;;  %v5740_v42 = vadd.f32 %v5616_v3, %v5308_v22 }
 0x519   : > { %1596 = vmax.xlane.f32.xlu1 %v5613_v25  ;;  %v2384_v1 = vpop.f32.mrb[67].mxu0  ;;  %v5717_v9 = vadd.f32 %v4510_v29, %v5308_v22 }
 0x51a   : > { %v5709_v2 = vadd.f32 %v2384_v1, %v5308_v22 }
 0x51b   : > { %1582 = vmax.xlane.f32.xlu0 %v5619_v6 }
 0x51c   : > { %v4441_v19 = vpop.f32.mrb[44].mxu1 }
 0x51d   : > { %v1559_v24 = vpop.f32.mrb[45].mxu1  ;;  %1592 = vmax.xlane.f32.xlu1 %v5623_v23  ;;  %v5663_v51 = vadd.f32 %v4441_v19, %v5308_v22 }
 0x51e   : > { %v4442_v8 = vpop.f32.mrb[46].mxu1  ;;  %v5630_v38 = vpop.f32.mrb[68].mxu0  ;;  %v5676_v60 = vadd.f32 %v1559_v24, %v5308_v22 }
 0x51f   : > { %v5633_v37 = vadd.f32 %v4442_v8, %v5308_v22  ;;  %1588 = vmax.xlane.f32.xlu0 %v5627_v4  ;;  %v1562_v20 = vpop.f32.mrb[47].mxu1  ;;  %v2397_v32 = vpop.f32.mrb[69].mxu0  ;;  %v5766_v41 = vadd.f32 %v5630_v38, %v5308_v22 }
 0x520   : > { %v4514_v39 = vpop.f32.mrb[70].mxu0  ;;  %v5641_v62 = vadd.f32 %v1562_v20, %v5308_v22  ;;  %v5757_v3 = vadd.f32 %v2397_v32, %v5308_v22 }
 0x521   : > { %1604 = vmax.xlane.f32.xlu1 %v5633_v37  ;;  %v2400_v50 = vpop.f32.mrb[71].mxu0  ;;  %v5735_v5 = vadd.f32 %v4514_v39, %v5308_v22 }
 0x522   : > { %v5727_v16 = vadd.f32 %v2400_v50, %v5308_v22 }
 0x523   : > { %1584 = vmax.xlane.f32.xlu0 %v5637_v61 }
 0x525   : > { %1600 = vmax.xlane.f32.xlu1 %v5641_v62 }
 0x526   : > { %v4517_v33 = vpop.f32.mrb[72].mxu0 }
 0x527   : > { %1594 = vmax.xlane.f32.xlu0 %v5645_v31  ;;  %v2413_v47 = vpop.f32.mrb[73].mxu0  ;;  %v5775_v24 = vadd.f32 %v4517_v33, %v5308_v22 }
 0x528   : > { %v4518_v35 = vpop.f32.mrb[74].mxu0  ;;  %v5771_v19 = vadd.f32 %v2413_v47, %v5308_v22 }
 0x529   : > { %2019 = vmax.xlane.f32.xlu1 %v5650_v44  ;;  %v2416_v26 = vpop.f32.mrb[75].mxu0  ;;  %v5753_v29 = vadd.f32 %v4518_v35, %v5308_v22 }
 0x52a   : > { %v5745_v15 = vadd.f32 %v2416_v26, %v5308_v22 }
 0x52b   : > { %1590 = vmax.xlane.f32.xlu0 %v5654_v49 }
 0x52d   : > { %2023 = vmax.xlane.f32.xlu1 %v5658_v34 }
 0x52e   : > { %v5670_v46 = vpop.f32.mrb[76].mxu0 }
 0x52f   : > { %1602 = vmax.xlane.f32.xlu0 %v5663_v51  ;;  %v2429_v36 = vpop.f32.mrb[77].mxu0 }
 0x530   : > { %v5673_v53 = vpop.f32.mrb[78].mxu0  ;;  %v5779_v8 = vadd.f32 %v2429_v36, %v5308_v22 }
 0x531   : > { %2027 = vmax.xlane.f32.xlu1 %v5668_v45  ;;  %v2432_v21 = vpop.f32.mrb[79].mxu0 }
 0x532   : > { %v5762_v1 = vadd.f32 %v2432_v21, %v5308_v22 }
 0x533   : > { %1598 = vmax.xlane.f32.xlu0 %v5676_v60 }
 0x535   : > { %2031 = vmax.xlane.f32.xlu1 %v5680_v28 }
 0x537   : > { %2017 = vmax.xlane.f32.xlu0 %v5685_v58 }
 0x539   : > { %2035 = vmax.xlane.f32.xlu1 %v5690_v0 }
 0x53b   : > { %2021 = vmax.xlane.f32.xlu0 %v5694_v12 }
 0x53d   : > { %2039 = vmax.xlane.f32.xlu1 %v5699_v56 }
 0x53f   : > { %2025 = vmax.xlane.f32.xlu0 %v5704_v30 }
 0x541   : > { %2446 = vmax.xlane.f32.xlu1 %v5709_v2 }
 0x543   : > { %2029 = vmax.xlane.f32.xlu0 %v5713_v48 }
 0x545   : > { %2450 = vmax.xlane.f32.xlu1 %v5717_v9 }
 0x547   : > { %2033 = vmax.xlane.f32.xlu0 %v5722_v54 }
 0x549   : > { %2454 = vmax.xlane.f32.xlu1 %v5727_v16 }
 0x54b   : > { %2037 = vmax.xlane.f32.xlu0 %v5731_v52 }
 0x54d   : > { %2458 = vmax.xlane.f32.xlu1 %v5735_v5 }
 0x54f   : > { %2444 = vmax.xlane.f32.xlu0 %v5740_v42 }
 0x551   : > { %2462 = vmax.xlane.f32.xlu1 %v5745_v15 }
 0x553   : > { %2448 = vmax.xlane.f32.xlu0 %v5749_v27 }
 0x555   : > { %2466 = vmax.xlane.f32.xlu1 %v5753_v29 }
 0x557   : > { %2452 = vmax.xlane.f32.xlu0 %v5757_v3 }
 0x559   : > { %2470 = vmax.xlane.f32.xlu1 %v5762_v1 }
 0x55b   : > { %2456 = vmax.xlane.f32.xlu0 %v5766_v41 }
 0x55f   : > { %2460 = vmax.xlane.f32.xlu0 %v5771_v19 }
 0x563   : > { %2464 = vmax.xlane.f32.xlu0 %v5775_v24 }
 0x567   : > { %2468 = vmax.xlane.f32.xlu0 %v5779_v8 }
 0x587   : > { %v5783_v38 = vpop.xlane.xlu0 %2009 }
 0x594   : > { %v1579_v20 = vpop.xlane.xlu0 %1578 }
 0x595   : > { %v1608_v32 = vsub.f32 %v5566_v43, %v1579_v20 }
 0x597   : > { %v1626_v39 = vmul.f32 1.442695, %v1608_v32  ;;  %v1577_v50 = vpop.xlane.xlu1 %1576 }
 0x598   : > { %v1575_v47 = vpop.xlane.xlu0 %1574  ;;  %v1607_v21 = vsub.f32 %v5574_v55, %v1577_v50 }
 0x599   : > { %4744 = vpow2.f32 %v1626_v39  ;;  %v1606_v33 = vsub.f32 %v5579_v57, %v1575_v47 }
 0x59a   : > { %v1624_v11 = vmul.f32 1.442695, %v1607_v21 }
 0x59b   : > { %v1622_v35 = vmul.f32 1.442695, %v1606_v33  ;;  %v5787_v26 = vpop.xlane.xlu1 %2011 }
 0x59c   : > { %v1581_v36 = vpop.xlane.xlu0 %1580 }
 0x59d   : > { %4746 = vpow2.f32 %v1622_v35  ;;  %v1609_v40 = vsub.f32 %v5589_v18, %v1581_v36 }
 0x59f   : > { %v1628_v17 = vmul.f32 1.442695, %v1609_v40  ;;  %v5793_v43 = vpop.xlane.xlu1 %2015 }
 0x5a0   : > { %v5791_v14 = vpop.xlane.xlu0 %2013 }
 0x5a1   : > { %4748 = vpow2.f32 %v1628_v17 }
 0x5a2   : > { %4750 = vpow2.f32 %v1624_v11 }
 0x5a3   : > { %v5795_v20 = vpop.eup %4744 }
 0x5a4   : > { %6748 = vst [vmem:[#allocation7_spill] sm:$0xff] %v5795_v20  ;;  %1658 = vadd.xlane.f32.xlu0 %v5795_v20  ;;  %v1587_v57 = vpop.xlane.xlu0 %1586 }
 0x5a5   : > { %v1612_v32 = vsub.f32 %v5607_v13, %v1587_v57 }
 0x5a6   : > { %v1597_v39 = vpop.xlane.xlu1 %1596 }
 0x5a7   : > { %v5799_v55 = vpop.eup %4746  ;;  %v1634_v50 = vmul.f32 1.442695, %v1612_v32  ;;  %v1617_v57 = vsub.f32 %v5613_v25, %v1597_v39 }
 0x5a8   : > { %1654 = vadd.xlane.f32.xlu0 %v5799_v55  ;;  %v1583_v40 = vpop.xlane.xlu0 %1582 }
 0x5a9   : > { %4752 = vpow2.f32 %v1634_v50  ;;  %v1610_v17 = vsub.f32 %v5619_v6, %v1583_v40  ;;  %v1644_v20 = vmul.f32 1.442695, %v1617_v57 }
 0x5aa   : > { %v1593_v18 = vpop.xlane.xlu1 %1592 }
 0x5ab   : > { %v5803_v47 = vpop.eup %4748  ;;  %v1630_v33 = vmul.f32 1.442695, %v1610_v17 }
 0x5ac   : > { %1660 = vadd.xlane.f32.xlu1 %v5803_v47  ;;  %v1589_v35 = vpop.xlane.xlu0 %1588  ;;  %v5807_v36 = vpop.eup %4750 }
 0x5ad   : > { %4754 = vpow2.f32 %v1630_v33  ;;  %v1613_v11 = vsub.f32 %v5627_v4, %v1589_v35  ;;  %v1615_v33 = vsub.f32 %v5623_v23, %v1593_v18 }
 0x5ae   : > { %v1605_v13 = vpop.xlane.xlu1 %1604 }
 0x5af   : > { %v1636_v21 = vmul.f32 1.442695, %v1613_v11 }
 0x5b0   : > { %1656 = vadd.xlane.f32.xlu1 %v5807_v36  ;;  %v1585_v32 = vpop.xlane.xlu0 %1584 }
 0x5b1   : > { %4756 = vpow2.f32 %v1636_v21  ;;  %v1611_v6 = vsub.f32 %v5637_v61, %v1585_v32  ;;  %v1640_v61 = vmul.f32 1.442695, %v1615_v33  ;;  %v1621_v21 = vsub.f32 %v5633_v37, %v1605_v13 }
 0x5b2   : > { %v1601_v50 = vpop.xlane.xlu1 %1600 }
 0x5b3   : > { %v5812_v40 = vpop.eup %4752  ;;  %v1632_v17 = vmul.f32 1.442695, %v1611_v6  ;;  %v1652_v6 = vmul.f32 1.442695, %v1621_v21 }
 0x5b4   : > { %1666 = vadd.xlane.f32.xlu0 %v5812_v40  ;;  %v1595_v4 = vpop.xlane.xlu0 %1594 }
 0x5b5   : > { %4758 = vpow2.f32 %v1632_v17  ;;  %v1616_v35 = vsub.f32 %v5645_v31, %v1595_v4  ;;  %v1619_v17 = vsub.f32 %v5641_v62, %v1601_v50 }
 0x5b6   : > { %v5817_v25 = vpop.xlane.xlu1 %2019  ;;  %4760 = vpow2.f32 %v1644_v20 }
 0x5b7   : > { %v5819_v39 = vpop.eup %4754  ;;  %v1642_v11 = vmul.f32 1.442695, %v1616_v35  ;;  %v1648_v4 = vmul.f32 1.442695, %v1619_v17  ;;  %v2044_v17 = vsub.f32 %v5598_v63, %v5793_v43 }
 0x5b8   : > { %1662 = vadd.xlane.f32.xlu0 %v5819_v39  ;;  %v1591_v57 = vpop.xlane.xlu0 %1590 }
 0x5b9   : > { %4762 = vpow2.f32 %v1642_v11  ;;  %v1614_v23 = vsub.f32 %v5654_v49, %v1591_v57 }
 0x5ba   : > { %v5824_v18 = vpop.xlane.xlu1 %2023  ;;  %4764 = vpow2.f32 %v1640_v61 }
 0x5bb   : > { %v5826_v32 = vpop.eup %4756  ;;  %v1638_v31 = vmul.f32 1.442695, %v1614_v23  ;;  %v2042_v23 = vsub.f32 %v5586_v59, %v5787_v26 }
 0x5bc   : > { %1668 = vadd.xlane.f32.xlu1 %v5826_v32  ;;  %v1603_v20 = vpop.xlane.xlu0 %1602 }
 0x5bd   : > { %4766 = vpow2.f32 %v1638_v31  ;;  %v1620_v37 = vsub.f32 %v5663_v51, %v1603_v20  ;;  %v2041_v51 = vsub.f32 %v5550_v7, %v5783_v38  ;;  %v2059_v38 = vmul.f32 1.442695, %v2042_v23 }
 0x5be   : > { %v5831_v13 = vpop.xlane.xlu1 %2027  ;;  %4768 = vpow2.f32 %v1652_v6  ;;  %v2043_v20 = vsub.f32 %v5603_v10, %v5791_v14 }
 0x5bf   : > { %v5833_v33 = vpop.eup %4758  ;;  %v1650_v49 = vmul.f32 1.442695, %v1620_v37  ;;  %v2057_v6 = vmul.f32 1.442695, %v2041_v51  ;;  %v2048_v51 = vsub.f32 %v5658_v34, %v5824_v18  ;;  %v2050_v34 = vsub.f32 %v5668_v45, %v5831_v13 }
 0x5c0   : > { %1664 = vadd.xlane.f32.xlu1 %v5833_v33  ;;  %v1599_v35 = vpop.xlane.xlu0 %1598  ;;  %v5837_v62 = vpop.eup %4760  ;;  %v2061_v43 = vmul.f32 1.442695, %v2043_v20 }
 0x5c1   : > { %4770 = vpow2.f32 %v1650_v49  ;;  %v1618_v11 = vsub.f32 %v5676_v60, %v1599_v35  ;;  %v2063_v49 = vmul.f32 1.442695, %v2044_v17 }
 0x5c2   : > { %v5841_v21 = vpop.xlane.xlu1 %2031  ;;  %4772 = vpow2.f32 %v1648_v4  ;;  %v2046_v4 = vsub.f32 %v5650_v44, %v5817_v25 }
 0x5c3   : > { %v5839_v50 = vpop.eup %4762  ;;  %v1646_v61 = vmul.f32 1.442695, %v1618_v11 }
 0x5c4   : > { %1676 = vadd.xlane.f32.xlu1 %v5837_v62  ;;  %1674 = vadd.xlane.f32.xlu0 %v5839_v50  ;;  %v2018_v57 = vpop.xlane.xlu0 %2017  ;;  %v5849_v60 = vpop.eup %4764 }
 0x5c5   : > { %4774 = vpow2.f32 %v1646_v61  ;;  %v2045_v35 = vsub.f32 %v5685_v58, %v2018_v57  ;;  %v2067_v61 = vmul.f32 1.442695, %v2046_v4  ;;  %v5879_v58 = vadd.f32 %v5670_v46, %v5308_v22 }
 0x5c6   : > { %v2036_v37 = vpop.xlane.xlu1 %2035  ;;  %4776 = vpow2.f32 %v2057_v6  ;;  %v5883_v57 = vadd.f32 %v5673_v53, %v5308_v22  ;;  %v2071_v6 = vmul.f32 1.442695, %v2048_v51  ;;  %v2075_v22 = vmul.f32 1.442695, %v2050_v34 }
 0x5c7   : > { %v5851_v31 = vpop.eup %4766  ;;  %4778 = vpow2.f32 %v2059_v38  ;;  %v2065_v25 = vmul.f32 1.442695, %v2045_v35  ;;  %v2052_v53 = vsub.f32 %v5680_v28, %v5841_v21 }
 0x5c8   : > { %1672 = vadd.xlane.f32.xlu1 %v5849_v60  ;;  %1670 = vadd.xlane.f32.xlu0 %v5851_v31  ;;  %v2022_v7 = vpop.xlane.xlu0 %2021  ;;  %v5859_v59 = vpop.eup %4768  ;;  %4780 = vpow2.f32 %v2063_v49 }
 0x5c9   : > { %4782 = vpow2.f32 %v2061_v43  ;;  %v2047_v23 = vsub.f32 %v5694_v12, %v2022_v7  ;;  %v2054_v43 = vsub.f32 %v5690_v0, %v2036_v37 }
 0x5ca   : > { %v2040_v11 = vpop.xlane.xlu1 %2039  ;;  %4784 = vpow2.f32 %v2067_v61 }
 0x5cb   : > { %v5861_v26 = vpop.eup %4770  ;;  %4786 = vpow2.f32 %v2065_v25  ;;  %v2069_v12 = vmul.f32 1.442695, %v2047_v23  ;;  %v2083_v51 = vmul.f32 1.442695, %v2054_v43 }
 0x5cc   : > { %1684 = vadd.xlane.f32.xlu1 %v5859_v59  ;;  %1682 = vadd.xlane.f32.xlu0 %v5861_v26  ;;  %v2026_v63 = vpop.xlane.xlu0 %2025  ;;  %v5868_v14 = vpop.eup %4772  ;;  %4788 = vpow2.f32 %v2071_v6 }
 0x5cd   : > { %v2049_v17 = vsub.f32 %v5704_v30, %v2026_v63  ;;  %4790 = vpow2.f32 %v2069_v12  ;;  %v2079_v63 = vmul.f32 1.442695, %v2052_v53 }
 0x5ce   : > { %v2447_v46 = vpop.xlane.xlu1 %2446  ;;  %4792 = vpow2.f32 %v2075_v22 }
 0x5cf   : > { %v5870_v10 = vpop.eup %4774  ;;  %v2073_v13 = vmul.f32 1.442695, %v2049_v17 }
 0x5d0   : > { %1680 = vadd.xlane.f32.xlu1 %v5868_v14  ;;  %1678 = vadd.xlane.f32.xlu0 %v5870_v10  ;;  %v2030_v44 = vpop.xlane.xlu0 %2029  ;;  %v5890_v7 = vpop.eup %4776 }
 0x5d1   : > { %v5892_v38 = vpop.eup %4778  ;;  %v2051_v20 = vsub.f32 %v5713_v48, %v2030_v44  ;;  %4794 = vpow2.f32 %v2073_v13  ;;  %v2056_v44 = vsub.f32 %v5699_v56, %v2040_v11 }
 0x5d2   : > { %v5899_v30 = vpop.eup %4780  ;;  %v2451_v4 = vpop.xlane.xlu1 %2450  ;;  %4796 = vpow2.f32 %v2079_v63 }
 0x5d3   : > { %v5901_v49 = vpop.eup %4782  ;;  %v2077_v21 = vmul.f32 1.442695, %v2051_v20  ;;  %v2087_v34 = vmul.f32 1.442695, %v2056_v44 }
 0x5d4   : > { %2474 = vmax.xlane.f32.xlu1 %v5883_v57  ;;  %2472 = vmax.xlane.f32.xlu0 %v5879_v58  ;;  %v2034_v18 = vpop.xlane.xlu0 %2033  ;;  %v5907_v61 = vpop.eup %4784 }
 0x5d5   : > { %v2053_v35 = vsub.f32 %v5722_v54, %v2034_v18  ;;  %v5909_v48 = vpop.eup %4786  ;;  %4798 = vpow2.f32 %v2077_v21  ;;  %v2477_v18 = vsub.f32 %v5709_v2, %v2447_v46 }
 0x5d6   : > { %v2455_v25 = vpop.xlane.xlu1 %2454  ;;  %v5915_v6 = vpop.eup %4788  ;;  %4800 = vpow2.f32 %v2083_v51 }
 0x5d7   : > { %v2081_v37 = vmul.f32 1.442695, %v2053_v35  ;;  %v5917_v54 = vpop.eup %4790  ;;  %v2494_v53 = vmul.f32 1.442695, %v2477_v18  ;;  %v2481_v43 = vsub.f32 %v5727_v16, %v2455_v25 }
 0x5d8   : > { %2091 = vadd.xlane.f32.xlu1 %v5892_v38  ;;  %2089 = vadd.xlane.f32.xlu0 %v5890_v7  ;;  %v2038_v45 = vpop.xlane.xlu0 %2037  ;;  %v5923_v17 = vpop.eup %4792 }
 0x5d9   : > { %v2055_v23 = vsub.f32 %v5731_v52, %v2038_v45  ;;  %4802 = vpow2.f32 %v2081_v37  ;;  %v2479_v45 = vsub.f32 %v5717_v9, %v2451_v4  ;;  %v2502_v51 = vmul.f32 1.442695, %v2481_v43 }
 0x5da   : > { %v2459_v22 = vpop.xlane.xlu1 %2458  ;;  %4804 = vpow2.f32 %v2087_v34 }
 0x5db   : > { %v2085_v11 = vmul.f32 1.442695, %v2055_v23  ;;  %v5925_v52 = vpop.eup %4794  ;;  %v2498_v63 = vmul.f32 1.442695, %v2479_v45  ;;  %v2483_v44 = vsub.f32 %v5735_v5, %v2459_v22 }
 0x5dc   : > { %2095 = vadd.xlane.f32.xlu1 %v5899_v30  ;;  %2093 = vadd.xlane.f32.xlu0 %v5901_v49  ;;  %v2445_v28 = vpop.xlane.xlu0 %2444  ;;  %v5931_v20 = vpop.eup %4796 }
 0x5dd   : > { %v2476_v12 = vsub.f32 %v5740_v42, %v2445_v28  ;;  %4806 = vpow2.f32 %v2085_v11  ;;  %v2506_v23 = vmul.f32 1.442695, %v2483_v44 }
 0x5de   : > { %4808 = vpow2.f32 %v2494_v53  ;;  %v2463_v9 = vpop.xlane.xlu1 %2462 }
 0x5df   : > { %v2492_v46 = vmul.f32 1.442695, %v2476_v12  ;;  %v5933_v42 = vpop.eup %4798  ;;  %v2485_v34 = vsub.f32 %v5745_v15, %v2463_v9 }
 0x5e0   : > { %2099 = vadd.xlane.f32.xlu1 %v5907_v61  ;;  %2097 = vadd.xlane.f32.xlu0 %v5909_v48  ;;  %v2449_v0 = vpop.xlane.xlu0 %2448  ;;  %v5939_v21 = vpop.eup %4800 }
 0x5e1   : > { %v2478_v13 = vsub.f32 %v5749_v27, %v2449_v0  ;;  %4810 = vpow2.f32 %v2492_v46  ;;  %v2510_v12 = vmul.f32 1.442695, %v2485_v34 }
 0x5e2   : > { %4812 = vpow2.f32 %v2498_v63  ;;  %v2467_v25 = vpop.xlane.xlu1 %2466 }
 0x5e3   : > { %v2496_v4 = vmul.f32 1.442695, %v2478_v13  ;;  %v5941_v35 = vpop.eup %4802  ;;  %v2487_v22 = vsub.f32 %v5753_v29, %v2467_v25 }
 0x5e4   : > { %2103 = vadd.xlane.f32.xlu1 %v5915_v6  ;;  %2101 = vadd.xlane.f32.xlu0 %v5917_v54  ;;  %v2453_v56 = vpop.xlane.xlu0 %2452  ;;  %v5947_v37 = vpop.eup %4804 }
 0x5e5   : > { %v2480_v28 = vsub.f32 %v5757_v3, %v2453_v56  ;;  %4814 = vpow2.f32 %v2496_v4  ;;  %v2514_v13 = vmul.f32 1.442695, %v2487_v22 }
 0x5e6   : > { %4816 = vpow2.f32 %v2502_v51  ;;  %v2471_v15 = vpop.xlane.xlu1 %2470 }
 0x5e7   : > { %v2500_v16 = vmul.f32 1.442695, %v2480_v28  ;;  %v5949_v3 = vpop.eup %4806  ;;  %v2489_v63 = vsub.f32 %v5762_v1, %v2471_v15 }
 0x5e8   : > { %2107 = vadd.xlane.f32.xlu1 %v5923_v17  ;;  %2105 = vadd.xlane.f32.xlu0 %v5925_v52  ;;  %v2457_v2 = vpop.xlane.xlu0 %2456  ;;  %v5955_v11 = vpop.eup %4808 }
 0x5e9   : > { %v2482_v0 = vsub.f32 %v5766_v41, %v2457_v2  ;;  %4818 = vpow2.f32 %v2500_v16  ;;  %v2518_v4 = vmul.f32 1.442695, %v2489_v63 }
 0x5ea   : > { %4820 = vpow2.f32 %v2506_v23 }
 0x5eb   : > { %v2504_v5 = vmul.f32 1.442695, %v2482_v0  ;;  %v5957_v41 = vpop.eup %4810 }
 0x5ec   : > { %2111 = vadd.xlane.f32.xlu1 %v5931_v20  ;;  %2109 = vadd.xlane.f32.xlu0 %v5933_v42  ;;  %v2461_v27 = vpop.xlane.xlu0 %2460  ;;  %v5963_v2 = vpop.eup %4812 }
 0x5ed   : > { %v2484_v56 = vsub.f32 %v5771_v19, %v2461_v27  ;;  %4822 = vpow2.f32 %v2504_v5 }
 0x5ee   : > { %4824 = vpow2.f32 %v2510_v12 }
 0x5ef   : > { %v2508_v53 = vmul.f32 1.442695, %v2484_v56  ;;  %v5965_v46 = vpop.eup %4814 }
 0x5f0   : > { %2115 = vadd.xlane.f32.xlu1 %v5939_v21  ;;  %2113 = vadd.xlane.f32.xlu0 %v5941_v35  ;;  %v2465_v18 = vpop.xlane.xlu0 %2464  ;;  %v5971_v9 = vpop.eup %4816 }
 0x5f1   : > { %v2486_v45 = vsub.f32 %v5775_v24, %v2465_v18  ;;  %4826 = vpow2.f32 %v2508_v53 }
 0x5f2   : > { %4828 = vpow2.f32 %v2514_v13 }
 0x5f3   : > { %v2512_v29 = vmul.f32 1.442695, %v2486_v45  ;;  %v5973_v24 = vpop.eup %4818 }
 0x5f4   : > { %2119 = vadd.xlane.f32.xlu1 %v5947_v37  ;;  %2117 = vadd.xlane.f32.xlu0 %v5949_v3  ;;  %v2469_v19 = vpop.xlane.xlu0 %2468  ;;  %v5977_v28 = vpop.eup %4820 }
 0x5f5   : > { %v2488_v43 = vsub.f32 %v5779_v8, %v2469_v19  ;;  %4830 = vpow2.f32 %v2512_v29 }
 0x5f6   : > { %4832 = vpow2.f32 %v2518_v4 }
 0x5f7   : > { %v2516_v1 = vmul.f32 1.442695, %v2488_v43  ;;  %v5979_v27 = vpop.eup %4822  ;;  %v6749_v43 = vld [vmem:[#allocation7_spill] sm:$0xff] }
 0x5f8   : > { %2526 = vadd.xlane.f32.xlu1 %v5955_v11  ;;  %2524 = vadd.xlane.f32.xlu0 %v5957_v41  ;;  %v5983_v8 = vpop.eup %4824 }
 0x5f9   : > { %4834 = vpow2.f32 %v2516_v1 }
 0x5fb   : > { %v5985_v51 = vpop.eup %4826 }
 0x5fc   : > { %2530 = vadd.xlane.f32.xlu1 %v5963_v2  ;;  %2528 = vadd.xlane.f32.xlu0 %v5965_v46  ;;  %v5989_v44 = vpop.eup %4828 }
 0x5ff   : > { %v5991_v16 = vpop.eup %4830 }
 0x600   : > { %2534 = vadd.xlane.f32.xlu1 %v5971_v9  ;;  %2532 = vadd.xlane.f32.xlu0 %v5973_v24  ;;  %v5995_v0 = vpop.eup %4832 }
 0x603   : > { %v5997_v25 = vpop.eup %4834 }
 0x604   : > { %2538 = vadd.xlane.f32.xlu1 %v5977_v28  ;;  %2536 = vadd.xlane.f32.xlu0 %v5979_v27 }
 0x608   : > { %2542 = vadd.xlane.f32.xlu1 %v5983_v8  ;;  %2540 = vadd.xlane.f32.xlu0 %v5985_v51 }
 0x60c   : > { %2546 = vadd.xlane.f32.xlu1 %v5989_v44  ;;  %2544 = vadd.xlane.f32.xlu0 %v5991_v16 }
 0x610   : > { %2550 = vadd.xlane.f32.xlu1 %v5995_v0  ;;  %2548 = vadd.xlane.f32.xlu0 %v5997_v25 }
 0x631   : > { %v1659_v23 = vpop.xlane.xlu0 %1658 }
 0x635   : > { %v1655_v34 = vpop.xlane.xlu0 %1654 }
 0x639   : > { %v1661_v18 = vpop.xlane.xlu1 %1660 }
 0x63a   : > { %4836 = vrcp.f32 %v1661_v18  ;;  %v6750_v18 = vld [vmem:[#allocation4_spill] sm:$0xff] }
 0x63b   : > { %4838 = vrcp.f32 %v1655_v34 }
 0x63c   : > { %4840 = vrcp.f32 %v1659_v23 }
 0x63d   : > { %v1657_v5 = vpop.xlane.xlu1 %1656 }
 0x63e   : > { %4842 = vrcp.f32 %v1657_v5 }
 0x641   : > { %v1667_v56 = vpop.xlane.xlu0 %1666 }
 0x644   : > { %v4837_v12 = vpop.eup %4836 }
 0x645   : > { %v4839_v22 = vpop.eup %4838  ;;  %v1705_v45 = vmul.f32 %v4837_v12, %v5803_v47  ;;  %v1663_v19 = vpop.xlane.xlu0 %1662  ;;  %v6751_v47 = vld [vmem:[#allocation3_spill] sm:$0xff] }
 0x646   : > { %v4841_v15 = vpop.eup %4840  ;;  %v1702_v63 = vmul.f32 %v4839_v22, %v5799_v55 }
 0x647   : > { %v1704_v4 = vmul.f32 %v4841_v15, %v6749_v43 }
 0x648   : > { %v4843_v53 = vpop.eup %4842 }
 0x649   : > { %v1669_v13 = vpop.xlane.xlu1 %1668  ;;  %v1703_v29 = vmul.f32 %v4843_v53, %v5807_v36  ;;  %v1719_v23 = vpack.c.bf16 %v1705_v45, %v1704_v4  ;;  %v6752_v45 = vld [vmem:[#allocation6_spill] sm:$0xff] }
 0x64a   : > { %4844 = vrcp.f32 %v1669_v13 }
 0x64b   : > { %v1718_v1 = vpack.c.bf16 %v1703_v29, %v1702_v63  ;;  %4846 = vrcp.f32 %v1663_v19 }
 0x64c   : > { %4848 = vrcp.f32 %v1667_v56 }
 0x64d   : > { %v1665_v34 = vpop.xlane.xlu1 %1664  ;;  %4447 = vmatprep.mubr.bf16.mxu1 %v1718_v1 }
 0x64e   : > { %4850 = vrcp.f32 %v1665_v34  ;;  %4448 = vmatmul.mubr.bf16.vlgmr.msra.gmra.mrb[48].mxu1 %v1719_v23 }
 0x64f   : > { %4484 = vmatpush3.bf16.xpose.msra.mxu1 %v6750_v18 }
 0x650   : > { %4485 = vmatprep.subr.bf16.mxu1 %v6751_v47 }
 0x651   : > { %v1677_v5 = vpop.xlane.xlu1 %1676  ;;  %v1675_v12 = vpop.xlane.xlu0 %1674 }
 0x652   : > { %4852 = vrcp.f32 %v1677_v5 }
 0x653   : > { %4854 = vrcp.f32 %v1675_v12 }
 0x654   : > { %v4845_v55 = vpop.eup %4844 }
 0x655   : > { %v1673_v36 = vpop.xlane.xlu1 %1672  ;;  %v1671_v22 = vpop.xlane.xlu0 %1670  ;;  %v1709_v19 = vmul.f32 %v4845_v55, %v5826_v32 }
 0x656   : > { %v4847_v15 = vpop.eup %4846  ;;  %4856 = vrcp.f32 %v1673_v36 }
 0x657   : > { %v4849_v53 = vpop.eup %4848  ;;  %4858 = vrcp.f32 %v1671_v22  ;;  %4486 = vmatpush3.bf16.xpose.msra.mxu1 %v6751_v47  ;;  %v1706_v29 = vmul.f32 %v4847_v15, %v5819_v39 }
 0x658   : > { %v4851_v56 = vpop.eup %4850  ;;  %4523 = vmatprep.subr.bf16.mxu1 %v6752_v45  ;;  %v1708_v4 = vmul.f32 %v4849_v53, %v5812_v40 }
 0x659   : > { %v1685_v13 = vpop.xlane.xlu1 %1684  ;;  %v1683_v63 = vpop.xlane.xlu0 %1682  ;;  %v1707_v43 = vmul.f32 %v4851_v56, %v5833_v33 }
 0x65a   : > { %4860 = vrcp.f32 %v1685_v13  ;;  %v1721_v23 = vpack.c.bf16 %v1709_v19, %v1708_v4 }
 0x65b   : > { %v1720_v1 = vpack.c.bf16 %v1707_v43, %v1706_v29  ;;  %4862 = vrcp.f32 %v1683_v63 }
 0x65c   : > { %v4853_v34 = vpop.eup %4852 }
 0x65d   : > { %v1681_v18 = vpop.xlane.xlu1 %1680  ;;  %4451 = vmatprep.mubr.bf16.mxu1 %v1720_v1  ;;  %v1679_v47 = vpop.xlane.xlu0 %1678  ;;  %v1713_v36 = vmul.f32 %v4853_v34, %v5837_v62 }
 0x65e   : > { %v4855_v5 = vpop.eup %4854  ;;  %4864 = vrcp.f32 %v1681_v18  ;;  %4452 = vmatmul.mubr.bf16.gmra.mrb[52].mxu1 %v1721_v23 }
 0x65f   : > { %4866 = vrcp.f32 %v1679_v47  ;;  %v1712_v40 = vmul.f32 %v4855_v5, %v5839_v50 }
 0x660   : > { %v4857_v32 = vpop.eup %4856 }
 0x661   : > { %v4859_v12 = vpop.eup %4858  ;;  %v2475_v55 = vpop.xlane.xlu1 %2474  ;;  %v1711_v33 = vmul.f32 %v4857_v32, %v5849_v60  ;;  %v1723_v4 = vpack.c.bf16 %v1713_v36, %v1712_v40 }
 0x662   : > { %v2473_v39 = vpop.xlane.xlu0 %2472  ;;  %v2491_v22 = vsub.f32 %v5883_v57, %v2475_v55  ;;  %v1710_v53 = vmul.f32 %v4859_v12, %v5851_v31 }
 0x663   : > { %v2490_v15 = vsub.f32 %v5879_v58, %v2473_v39 }
 0x664   : > { %v2522_v56 = vmul.f32 1.442695, %v2491_v22  ;;  %v1722_v13 = vpack.c.bf16 %v1711_v33, %v1710_v53  ;;  %v4861_v63 = vpop.eup %4860 }
 0x665   : > { %v2520_v19 = vmul.f32 1.442695, %v2490_v15  ;;  %v2092_v29 = vpop.xlane.xlu1 %2091  ;;  %v4863_v1 = vpop.eup %4862  ;;  %v1717_v23 = vmul.f32 %v4861_v63, %v5859_v59 }
 0x666   : > { %v2090_v43 = vpop.xlane.xlu0 %2089  ;;  %4868 = vpow2.f32 %v2522_v56  ;;  %4455 = vmatprep.mubr.bf16.mxu1 %v1722_v13  ;;  %v1716_v57 = vmul.f32 %v4863_v1, %v5861_v26 }
 0x667   : > { %4870 = vpow2.f32 %v2520_v19  ;;  %4456 = vmatmul.mubr.bf16.gmra.mrb[56].mxu1 %v1723_v4 }
 0x668   : > { %v4865_v50 = vpop.eup %4864  ;;  %4872 = vrcp.f32 %v2092_v29  ;;  %v1725_v32 = vpack.c.bf16 %v1717_v23, %v1716_v57 }
 0x669   : > { %v4867_v62 = vpop.eup %4866  ;;  %4874 = vrcp.f32 %v2090_v43  ;;  %v2096_v60 = vpop.xlane.xlu1 %2095  ;;  %v1715_v31 = vmul.f32 %v4865_v50, %v5868_v14 }
 0x66a   : > { %v2094_v58 = vpop.xlane.xlu0 %2093  ;;  %4876 = vrcp.f32 %v2096_v60  ;;  %v1714_v34 = vmul.f32 %v4867_v62, %v5870_v10 }
 0x66b   : > { %4878 = vrcp.f32 %v2094_v58 }
 0x66c   : > { %v1724_v18 = vpack.c.bf16 %v1715_v31, %v1714_v34 }
 0x66d   : > { %v2100_v47 = vpop.xlane.xlu1 %2099 }
 0x66e   : > { %v2098_v5 = vpop.xlane.xlu0 %2097  ;;  %4880 = vrcp.f32 %v2100_v47  ;;  %4459 = vmatprep.mubr.bf16.mxu1 %v1724_v18 }
 0x66f   : > { %4882 = vrcp.f32 %v2098_v5  ;;  %4460 = vmatmul.mubr.bf16.gmra.mrb[60].mxu1 %v1725_v32 }
 0x670   : > { %v6023_v12 = vpop.eup %4868 }
 0x671   : > { %v6025_v55 = vpop.eup %4870  ;;  %2554 = vadd.xlane.f32.xlu1 %v6023_v12  ;;  %v2104_v26 = vpop.xlane.xlu1 %2103 }
 0x672   : > { %v2102_v59 = vpop.xlane.xlu0 %2101  ;;  %v4873_v14 = vpop.eup %4872  ;;  %4884 = vrcp.f32 %v2104_v26  ;;  %2552 = vadd.xlane.f32.xlu0 %v6025_v55 }
 0x673   : > { %v4875_v10 = vpop.eup %4874  ;;  %4886 = vrcp.f32 %v2102_v59  ;;  %v2138_v39 = vmul.f32 %v4873_v14, %v5892_v38 }
 0x674   : > { %v4877_v33 = vpop.eup %4876  ;;  %v2137_v40 = vmul.f32 %v4875_v10, %v5890_v7 }
 0x675   : > { %v4879_v36 = vpop.eup %4878  ;;  %v2140_v22 = vmul.f32 %v4877_v33, %v5899_v30  ;;  %v2108_v15 = vpop.xlane.xlu1 %2107 }
 0x676   : > { %v2106_v53 = vpop.xlane.xlu0 %2105  ;;  %v2139_v56 = vmul.f32 %v4879_v36, %v5901_v49  ;;  %4888 = vrcp.f32 %v2108_v15  ;;  %v2153_v19 = vpack.c.bf16 %v2138_v39, %v2137_v40  ;;  %v6753_v49 = vld [vmem:[#allocation5_spill] sm:$0xff] }
 0x677   : > { %4890 = vrcp.f32 %v2106_v53 }
 0x678   : > { %v4881_v13 = vpop.eup %4880  ;;  %4487 = vmatprep.mubr.bf16.mxu1 %v2153_v19  ;;  %v2154_v63 = vpack.c.bf16 %v2140_v22, %v2139_v56 }
 0x679   : > { %v4883_v29 = vpop.eup %4882  ;;  %v2112_v43 = vpop.xlane.xlu1 %2111  ;;  %v2142_v38 = vmul.f32 %v4881_v13, %v5907_v61 }
 0x67a   : > { %v2110_v4 = vpop.xlane.xlu0 %2109  ;;  %4892 = vrcp.f32 %v2112_v43  ;;  %4488 = vmatmul.mubr.bf16.vlgmr.msra.gmra.mrb[64].mxu1 %v2154_v63  ;;  %v2141_v7 = vmul.f32 %v4883_v29, %v5909_v48 }
 0x67b   : > { %4894 = vrcp.f32 %v2110_v4  ;;  %4524 = vmatpush3.bf16.xpose.msra.mxu1 %v6752_v45 }
 0x67c   : > { %v4885_v30 = vpop.eup %4884  ;;  %4525 = vmatprep.subr.bf16.mxu1 %v6753_v49  ;;  %v2155_v1 = vpack.c.bf16 %v2142_v38, %v2141_v7 }
 0x67d   : > { %v4887_v50 = vpop.eup %4886  ;;  %v2116_v62 = vpop.xlane.xlu1 %2115  ;;  %v2144_v58 = vmul.f32 %v4885_v30, %v5915_v6 }
 0x67e   : > { %v2114_v60 = vpop.xlane.xlu0 %2113  ;;  %4896 = vrcp.f32 %v2116_v62  ;;  %4491 = vmatprep.mubr.bf16.mxu1 %v2155_v1  ;;  %v2143_v61 = vmul.f32 %v4887_v50, %v5917_v54 }
 0x67f   : > { %4898 = vrcp.f32 %v2114_v60 }
 0x680   : > { %v4889_v31 = vpop.eup %4888  ;;  %v2156_v57 = vpack.c.bf16 %v2144_v58, %v2143_v61 }
 0x681   : > { %v4891_v48 = vpop.eup %4890  ;;  %v2120_v23 = vpop.xlane.xlu1 %2119  ;;  %v2146_v45 = vmul.f32 %v4889_v31, %v5923_v17 }
 0x682   : > { %v2118_v34 = vpop.xlane.xlu0 %2117  ;;  %4900 = vrcp.f32 %v2120_v23  ;;  %4492 = vmatmul.mubr.bf16.gmra.mrb[68].mxu1 %v2156_v57  ;;  %v2145_v18 = vmul.f32 %v4891_v48, %v5925_v52 }
 0x683   : > { %4902 = vrcp.f32 %v2118_v34  ;;  %4526 = vmatpush3.bf16.xpose.msra.mxu1 %v6753_v49 }
 0x684   : > { %v4893_v6 = vpop.eup %4892  ;;  %v2157_v47 = vpack.c.bf16 %v2146_v45, %v2145_v18 }
 0x685   : > { %v4895_v5 = vpop.eup %4894  ;;  %v2527_v32 = vpop.xlane.xlu1 %2526  ;;  %v2148_v26 = vmul.f32 %v4893_v6, %v5931_v20 }
 0x686   : > { %v2525_v54 = vpop.xlane.xlu0 %2524  ;;  %4904 = vrcp.f32 %v2527_v32  ;;  %4495 = vmatprep.mubr.bf16.mxu1 %v2157_v47  ;;  %v2147_v59 = vmul.f32 %v4895_v5, %v5933_v42 }
 0x687   : > { %4906 = vrcp.f32 %v2525_v54 }
 0x688   : > { %v4897_v17 = vpop.eup %4896  ;;  %v2158_v14 = vpack.c.bf16 %v2148_v26, %v2147_v59 }
 0x689   : > { %v4899_v10 = vpop.eup %4898  ;;  %v2531_v39 = vpop.xlane.xlu1 %2530  ;;  %v2150_v33 = vmul.f32 %v4897_v17, %v5939_v21 }
 0x68a   : > { %v2529_v52 = vpop.xlane.xlu0 %2528  ;;  %4908 = vrcp.f32 %v2531_v39  ;;  %4496 = vmatmul.mubr.bf16.gmra.mrb[72].mxu1 %v2158_v14  ;;  %v2149_v40 = vmul.f32 %v4899_v10, %v5941_v35 }
 0x68b   : > { %4910 = vrcp.f32 %v2529_v52 }
 0x68c   : > { %v4901_v36 = vpop.eup %4900  ;;  %v2159_v22 = vpack.c.bf16 %v2150_v33, %v2149_v40 }
 0x68d   : > { %v4903_v20 = vpop.eup %4902  ;;  %v2535_v15 = vpop.xlane.xlu1 %2534  ;;  %v2152_v42 = vmul.f32 %v4901_v36, %v5947_v37 }
 0x68e   : > { %v2533_v53 = vpop.xlane.xlu0 %2532  ;;  %4912 = vrcp.f32 %v2535_v15  ;;  %4499 = vmatprep.mubr.bf16.mxu1 %v2159_v22  ;;  %v2151_v56 = vmul.f32 %v4903_v20, %v5949_v3 }
 0x68f   : > { %4914 = vrcp.f32 %v2533_v53 }
 0x690   : > { %v4905_v19 = vpop.eup %4904  ;;  %v2160_v13 = vpack.c.bf16 %v2152_v42, %v2151_v56 }
 0x691   : > { %v4907_v21 = vpop.eup %4906  ;;  %v2539_v63 = vpop.xlane.xlu1 %2538  ;;  %v2573_v35 = vmul.f32 %v4905_v19, %v5955_v11 }
 0x692   : > { %v2537_v29 = vpop.xlane.xlu0 %2536  ;;  %4916 = vrcp.f32 %v2539_v63  ;;  %4500 = vmatmul.mubr.bf16.gmra.mrb[76].mxu1 %v2160_v13  ;;  %v2572_v43 = vmul.f32 %v4907_v21, %v5957_v41 }
 0x693   : > { %4918 = vrcp.f32 %v2537_v29 }
 0x694   : > { %v4909_v4 = vpop.eup %4908  ;;  %v2588_v38 = vpack.c.bf16 %v2573_v35, %v2572_v43 }
 0x695   : > { %v4911_v37 = vpop.eup %4910  ;;  %v2575_v7 = vmul.f32 %v4909_v4, %v5963_v2  ;;  %v2543_v30 = vpop.xlane.xlu1 %2542 }
 0x696   : > { %v2541_v3 = vpop.xlane.xlu0 %2540  ;;  %v2574_v49 = vmul.f32 %v4911_v37, %v5965_v46  ;;  %4920 = vrcp.f32 %v2543_v30  ;;  %4527 = vmatprep.mubr.bf16.mxu1 %v2588_v38 }
 0x697   : > { %4922 = vrcp.f32 %v2541_v3 }
 0x698   : > { %v4913_v1 = vpop.eup %4912  ;;  %v2589_v50 = vpack.c.bf16 %v2575_v7, %v2574_v49 }
 0x699   : > { %v4915_v11 = vpop.eup %4914  ;;  %v2547_v62 = vpop.xlane.xlu1 %2546  ;;  %v2577_v41 = vmul.f32 %v4913_v1, %v5971_v9 }
 0x69a   : > { %v2545_v60 = vpop.xlane.xlu0 %2544  ;;  %4924 = vrcp.f32 %v2547_v62  ;;  %4528 = vmatmul.mubr.bf16.vlgmr.msra.gmra.mrb[80].mxu1 %v2589_v50  ;;  %v2576_v58 = vmul.f32 %v4915_v11, %v5973_v24 }
 0x69b   : > { %4926 = vrcp.f32 %v2545_v60 }
 0x69c   : > { %v4917_v2 = vpop.eup %4916  ;;  %v2590_v61 = vpack.c.bf16 %v2577_v41, %v2576_v58 }
 0x69d   : > { %v4919_v31 = vpop.eup %4918  ;;  %v2551_v57 = vpop.xlane.xlu1 %2550  ;;  %v2579_v48 = vmul.f32 %v4917_v2, %v5977_v28 }
 0x69e   : > { %v2549_v46 = vpop.xlane.xlu0 %2548  ;;  %4928 = vrcp.f32 %v2551_v57  ;;  %4531 = vmatprep.mubr.bf16.mxu1 %v2590_v61  ;;  %v2578_v23 = vmul.f32 %v4919_v31, %v5979_v27 }
 0x69f   : > { %4930 = vrcp.f32 %v2549_v46 }
 0x6a0   : > { %v4921_v34 = vpop.eup %4920  ;;  %v2591_v45 = vpack.c.bf16 %v2579_v48, %v2578_v23 }
 0x6a1   : > { %v4923_v9 = vpop.eup %4922  ;;  %v2581_v18 = vmul.f32 %v4921_v34, %v5983_v8 }
 0x6a2   : > { %4532 = vmatmul.mubr.bf16.gmra.mrb[84].mxu1 %v2591_v45  ;;  %v2580_v24 = vmul.f32 %v4923_v9, %v5985_v51 }
 0x6a4   : > { %v4925_v6 = vpop.eup %4924  ;;  %v2592_v47 = vpack.c.bf16 %v2581_v18, %v2580_v24 }
 0x6a5   : > { %v4927_v5 = vpop.eup %4926  ;;  %v2583_v32 = vmul.f32 %v4925_v6, %v5989_v44 }
 0x6a6   : > { %4535 = vmatprep.mubr.bf16.mxu1 %v2592_v47  ;;  %v2582_v28 = vmul.f32 %v4927_v5, %v5991_v16 }
 0x6a8   : > { %v4929_v54 = vpop.eup %4928  ;;  %v2593_v26 = vpack.c.bf16 %v2583_v32, %v2582_v28 }
 0x6a9   : > { %v4931_v27 = vpop.eup %4930  ;;  %v2585_v59 = vmul.f32 %v4929_v54, %v5995_v0 }
 0x6aa   : > { %4536 = vmatmul.mubr.bf16.gmra.mrb[88].mxu1 %v2593_v26  ;;  %v2584_v17 = vmul.f32 %v4931_v27, %v5997_v25 }
 0x6ac   : > { %v2594_v8 = vpack.c.bf16 %v2585_v59, %v2584_v17 }
 0x6ae   : > { %4539 = vmatprep.mubr.bf16.mxu1 %v2594_v8 }
 0x6fe   : > { %v2555_v14 = vpop.xlane.xlu1 %2554 }
 0x6ff   : > { %4932 = vrcp.f32 %v2555_v14  ;;  %v2553_v51 = vpop.xlane.xlu0 %2552 }
 0x700   : > { %4934 = vrcp.f32 %v2553_v51 }
 0x709   : > { %v4933_v10 = vpop.eup %4932 }
 0x70a   : > { %v4935_v39 = vpop.eup %4934  ;;  %v2587_v44 = vmul.f32 %v4933_v10, %v6023_v12 }
 0x70b   : > { %v2586_v16 = vmul.f32 %v4935_v39, %v6025_v55 }
 0x70d   : > { %v2595_v52 = vpack.c.bf16 %v2587_v44, %v2586_v16 }
 0x70f   : > { %4540 = vmatmul.mubr.bf16.gmra.mrb[92].mxu1 %v2595_v52 }
 0x721   : > { %v4449_v33 = vpop.f32.mrb[48].mxu1 }
 0x722   : > { %v1760_v40 = vpop.f32.mrb[49].mxu1 }
 0x723   : > { %v4450_v0 = vpop.f32.mrb[50].mxu1 }
 0x724   : > { %v1824_v36 = vpack.c.bf16 %v4450_v0, %v4449_v33  ;;  %v1763_v22 = vpop.f32.mrb[51].mxu1 }
 0x725   : > { %v1823_v25 = vpack.c.bf16 %v1763_v22, %v1760_v40 }
 0x727   : > { %1839 = vrot.lane.b32.xlu0 %v1823_v25, %s5084_s17 }
 0x72b   : > { %1841 = vrot.lane.b32.xlu0 %v1824_v36, %s5084_s17 }
 0x731   : > { %v4453_v20 = vpop.f32.mrb[52].mxu1 }
 0x732   : > { %v1776_v15 = vpop.f32.mrb[53].mxu1 }
 0x733   : > { %v4454_v53 = vpop.f32.mrb[54].mxu1 }
 0x734   : > { %v1826_v42 = vpack.c.bf16 %v4454_v53, %v4453_v20  ;;  %v1779_v12 = vpop.f32.mrb[55].mxu1 }
 0x735   : > { %v1825_v56 = vpack.c.bf16 %v1779_v12, %v1776_v15 }
 0x73a   : > { %v6066_v55 = vpop.f32.mrb[56].mxu1 }
 0x73b   : > { %v6068_v19 = vpop.f32.mrb[57].mxu1 }
 0x73c   : > { %v6070_v13 = vpop.f32.mrb[58].mxu1 }
 0x73d   : > { %v1828_v21 = vpack.c.bf16 %v6070_v13, %v6066_v55  ;;  %v6074_v63 = vpop.f32.mrb[59].mxu1  ;;  %v386_v13 = vld [vmem:[%s6732_s4 + $0x8] sm:$0xff] }
 0x73e   : > { %v1827_v29 = vpack.c.bf16 %v6074_v63, %v6068_v19 }
 0x742   : > { %v6078_v35 = vpop.f32.mrb[60].mxu1 }
 0x743   : > { %v6080_v43 = vpop.f32.mrb[61].mxu1 }
 0x744   : > { %v6082_v4 = vpop.f32.mrb[62].mxu1 }
 0x745   : > { %v1830_v38 = vpack.c.bf16 %v6082_v4, %v6078_v35  ;;  %v6086_v37 = vpop.f32.mrb[63].mxu1  ;;  %v385_v4 = vld [vmem:[%s6732_s4] sm:$0xff] }
 0x746   : > { %v1829_v7 = vpack.c.bf16 %v6086_v37, %v6080_v43 }
 0x74d   : > { %v4489_v30 = vpop.f32.mrb[64].mxu1 }
 0x74e   : > { %v2195_v3 = vpop.f32.mrb[65].mxu1 }
 0x74f   : > { %v4490_v49 = vpop.f32.mrb[66].mxu1 }
 0x750   : > { %v2259_v1 = vpack.c.bf16 %v4490_v49, %v4489_v30  ;;  %v2198_v50 = vpop.f32.mrb[67].mxu1 }
 0x751   : > { %v2258_v11 = vpack.c.bf16 %v2198_v50, %v2195_v3  ;;  %v387_v3 = vld [vmem:[%s6732_s4 + $0x10] sm:$0xff]  ;;  %v392_v50 = vld [vmem:[%s6732_s4 + $0x38] sm:$0xff] }
 0x753   : > { %2274 = vrot.lane.b32.xlu1 %v2258_v11, %s5085_s18 }
 0x755   : > { %v4493_v62 = vpop.f32.mrb[68].mxu1 }
 0x756   : > { %v2211_v60 = vpop.f32.mrb[69].mxu1 }
 0x757   : > { %v4494_v41 = vpop.f32.mrb[70].mxu1 }
 0x758   : > { %v2261_v58 = vpack.c.bf16 %v4494_v41, %v4493_v62  ;;  %v2214_v2 = vpop.f32.mrb[71].mxu1  ;;  %v389_v62 = vld [vmem:[%s6732_s4 + $0x20] sm:$0xff]  ;;  %v378_v41 = vld [vmem:[%s6733_s5 + $0x8] sm:$0xff] }
 0x759   : > { %v2260_v61 = vpack.c.bf16 %v2214_v2, %v2211_v60 }
 0x75d   : > { %v4497_v31 = vpop.f32.mrb[72].mxu1 }
 0x75e   : > { %v2227_v57 = vpop.f32.mrb[73].mxu1 }
 0x75f   : > { %v4498_v46 = vpop.f32.mrb[74].mxu1 }
 0x760   : > { %v2263_v48 = vpack.c.bf16 %v4498_v46, %v4497_v31  ;;  %v2230_v23 = vpop.f32.mrb[75].mxu1 }
 0x761   : > { %v2262_v34 = vpack.c.bf16 %v2230_v23, %v2227_v57  ;;  %v380_v57 = vld [vmem:[%s6733_s5 + $0x18] sm:$0xff] }
 0x765   : > { %v6091_v45 = vpop.f32.mrb[76].mxu1 }
 0x766   : > { %v2243_v9 = vpop.f32.mrb[77].mxu1 }
 0x767   : > { %v6093_v18 = vpop.f32.mrb[78].mxu1 }
 0x768   : > { %v2265_v24 = vpack.c.bf16 %v6093_v18, %v6091_v45  ;;  %v2246_v6 = vpop.f32.mrb[79].mxu1  ;;  %v382_v45 = vld [vmem:[%s6733_s5 + $0x28] sm:$0xff]  ;;  %v379_v18 = vld [vmem:[%s6733_s5 + $0x10] sm:$0xff] }
 0x769   : > { %v2264_v47 = vpack.c.bf16 %v2246_v6, %v2243_v9  ;;  %v384_v6 = vld [vmem:[%s6733_s5 + $0x38] sm:$0xff] }
 0x76d   : > { %v4529_v5 = vpop.f32.mrb[80].mxu1 }
 0x76e   : > { %v2630_v32 = vpop.f32.mrb[81].mxu1 }
 0x76f   : > { %v4530_v28 = vpop.f32.mrb[82].mxu1 }
 0x770   : > { %v2694_v54 = vpack.c.bf16 %v4530_v28, %v4529_v5  ;;  %v2633_v26 = vpop.f32.mrb[83].mxu1  ;;  %v381_v5 = vld [vmem:[%s6733_s5 + $0x20] sm:$0xff]  ;;  %v410_v28 = vld [vmem:[%s6735_s7 + $0x88] sm:$0xff] }
 0x771   : > { %v2693_v27 = vpack.c.bf16 %v2633_v26, %v2630_v32  ;;  %v394_v26 = vld [vmem:[%s6735_s7 + $0x8] sm:$0xff] }
 0x772   : > { %2711 = vrot.lane.b32.xlu0 %v2694_v54, %s5086_s19  ;;  %v383_v54 = vld [vmem:[%s6733_s5 + $0x30] sm:$0xff] }
 0x773   : > { %2709 = vrot.lane.b32.xlu1 %v2693_v27, %s5086_s19  ;;  %v409_v27 = vld [vmem:[%s6735_s7 + $0x80] sm:$0xff] }
 0x775   : > { %v4533_v59 = vpop.f32.mrb[84].mxu1 }
 0x776   : > { %2278 = vrot.lane.b32.xlu0 %v2260_v61, %s5085_s18  ;;  %v2646_v17 = vpop.f32.mrb[85].mxu1  ;;  %v391_v61 = vld [vmem:[%s6732_s4 + $0x30] sm:$0xff] }
 0x777   : > { %2276 = vrot.lane.b32.xlu1 %v2259_v1, %s5085_s18  ;;  %v4534_v8 = vpop.f32.mrb[86].mxu1 }
 0x778   : > { %v2696_v14 = vpack.c.bf16 %v4534_v8, %v4533_v59  ;;  %v2649_v51 = vpop.f32.mrb[87].mxu1  ;;  %v393_v8 = vld [vmem:[%s6735_s7] sm:$0xff] }
 0x779   : > { %v2695_v10 = vpack.c.bf16 %v2649_v51, %v2646_v17  ;;  %v412_v17 = vld [vmem:[%s6735_s7 + $0x98] sm:$0xff]  ;;  %v411_v51 = vld [vmem:[%s6735_s7 + $0x90] sm:$0xff] }
 0x77a   : > { %1845 = vrot.lane.b32.xlu0 %v1826_v42, %s5084_s17 }
 0x77b   : > { %1843 = vrot.lane.b32.xlu1 %v1825_v56, %s5084_s17 }
 0x77d   : > { %v4537_v39 = vpop.f32.mrb[88].mxu1 }
 0x77e   : > { %2715 = vrot.lane.b32.xlu0 %v2696_v14, %s5086_s19  ;;  %v2662_v44 = vpop.f32.mrb[89].mxu1  ;;  %v396_v14 = vld [vmem:[%s6735_s7 + $0x18] sm:$0xff] }
 0x77f   : > { %2713 = vrot.lane.b32.xlu1 %v2695_v10, %s5086_s19  ;;  %v4538_v16 = vpop.f32.mrb[90].mxu1  ;;  %v414_v10 = vld [vmem:[%s6735_s7 + $0xa8] sm:$0xff] }
 0x780   : > { %v2698_v52 = vpack.c.bf16 %v4538_v16, %v4537_v39  ;;  %v2665_v33 = vpop.f32.mrb[91].mxu1  ;;  %v395_v39 = vld [vmem:[%s6735_s7 + $0x10] sm:$0xff]  ;;  %v413_v16 = vld [vmem:[%s6735_s7 + $0xa0] sm:$0xff] }
 0x781   : > { %v2697_v40 = vpack.c.bf16 %v2665_v33, %v2662_v44  ;;  %v398_v44 = vld [vmem:[%s6735_s7 + $0x28] sm:$0xff]  ;;  %v397_v33 = vld [vmem:[%s6735_s7 + $0x20] sm:$0xff] }
 0x782   : > { %2282 = vrot.lane.b32.xlu0 %v2262_v34, %s5085_s18 }
 0x783   : > { %2280 = vrot.lane.b32.xlu1 %v2261_v58, %s5085_s18 }
 0x786   : > { %1849 = vrot.lane.b32.xlu0 %v1828_v21, %s5084_s17 }
 0x787   : > { %1847 = vrot.lane.b32.xlu1 %v1827_v29, %s5084_s17  ;;  %v388_v29 = vld [vmem:[%s6732_s4 + $0x18] sm:$0xff] }
 0x78a   : > { %2719 = vrot.lane.b32.xlu0 %v2698_v52, %s5086_s19  ;;  %v416_v52 = vld [vmem:[%s6735_s7 + $0xb8] sm:$0xff] }
 0x78b   : > { %2717 = vrot.lane.b32.xlu1 %v2697_v40, %s5086_s19  ;;  %v400_v40 = vld [vmem:[%s6735_s7 + $0x38] sm:$0xff] }
 0x78e   : > { %2286 = vrot.lane.b32.xlu0 %v2264_v47, %s5085_s18 }
 0x78f   : > { %2284 = vrot.lane.b32.xlu1 %v2263_v48, %s5085_s18  ;;  %v377_v48 = vld [vmem:[%s6733_s5] sm:$0xff] }
 0x792   : > { %1853 = vrot.lane.b32.xlu0 %v1830_v38, %s5084_s17  ;;  %v4646_v38 = vld [vmem:[%s6731_s3] sm:$0xff]  }
 0x793   : > { %1851 = vrot.lane.b32.xlu1 %v1829_v7, %s5084_s17  ;;  %v390_v7 = vld [vmem:[%s6732_s4 + $0x28] sm:$0xff]  ;;  %4559 = vmatprep.mubr.bf16.mxu0 %v4646_v38  ;;  %v428_v38 = vld [vmem:[%s6737_s9 + $0x18] sm:$0xff] }
 0x799   : > { %v1840_v0 = vpop.permute.xlu0 %1839 }
 0x79a   : > { %1864 = vst.msk [vmem:[#allocation2] sm:$0xff] %vm1863_vm3, %v1840_v0  ;;  %v415_v0 = vld [vmem:[%s6735_s7 + $0xb0] sm:$0xff] }
 0x79d   : > { %v1842_v36 = vpop.permute.xlu0 %1841 }
 0x79e   : > { %1865 = vst.msk [vmem:[#allocation2 + $0x8] sm:$0xff] %vm1863_vm3, %v1842_v36  ;;  %v418_v36 = vld [vmem:[%s6735_s7 + $0xc8] sm:$0xff] }
 0x7c5   : > { %v2275_v22 = vpop.permute.xlu1 %2274 }
 0x7c6   : > { %2299 = vst.msk [vmem:[#allocation2] sm:$0xff] %vm2298_vm4, %v2275_v22  ;;  %v399_v22 = vld [vmem:[%s6735_s7 + $0x30] sm:$0xff] }
 0x7e2   : > { %v4541_v25 = vpop.f32.mrb[92].mxu1 }
 0x7e3   : > { %v2678_v20 = vpop.f32.mrb[93].mxu1 }
 0x7e4   : > { %v2712_v15 = vpop.permute.xlu0 %2711  ;;  %v4542_v53 = vpop.f32.mrb[94].mxu1 }
 0x7e5   : > { %v2700_v42 = vpack.c.bf16 %v4542_v53, %v4541_v25  ;;  %v2710_v12 = vpop.permute.xlu1 %2709  ;;  %v2681_v56 = vpop.f32.mrb[95].mxu1  ;;  %v402_v25 = vld [vmem:[%s6735_s7 + $0x48] sm:$0xff]  ;;  %v401_v53 = vld [vmem:[%s6735_s7 + $0x40] sm:$0xff] }
 0x7e6   : > { %2734 = vst.msk [vmem:[#allocation2] sm:$0xff] %vm2733_vm5, %v2710_v12  ;;  %v2699_v55 = vpack.c.bf16 %v2681_v56, %v2678_v20  ;;  %v417_v20 = vld [vmem:[%s6735_s7 + $0xc0] sm:$0xff]  ;;  %v419_v12 = vld [vmem:[%s6735_s7 + $0xd0] sm:$0xff]  ;;  %v422_v56 = vld [vmem:[%s6735_s7 + $0xe8] sm:$0xff] }
 0x7e7   : > { %2723 = vrot.lane.b32.xlu0 %v2700_v42, %s5086_s19  ;;  %v404_v42 = vld [vmem:[%s6735_s7 + $0x58] sm:$0xff] }
 0x7e8   : > { %v2279_v19 = vpop.permute.xlu0 %2278  ;;  %2721 = vrot.lane.b32.xlu1 %v2699_v55, %s5086_s19  ;;  %v403_v55 = vld [vmem:[%s6735_s7 + $0x50] sm:$0xff] }
 0x7e9   : > { %v2277_v21 = vpop.permute.xlu1 %2276 }
 0x7ea   : > { %2300 = vst.msk [vmem:[#allocation2 + $0x8] sm:$0xff] %vm2298_vm4, %v2277_v21  ;;  %v424_v21 = vld [vmem:[%s6735_s7 + $0xf8] sm:$0xff] }
 0x7eb   : > { %2735 = vst.msk [vmem:[#allocation2 + $0x8] sm:$0xff] %vm2733_vm5, %v2712_v15  ;;  %2765 = vperm.xlu0 %4620, %v386_v13   ;;  %v420_v15 = vld [vmem:[%s6735_s7 + $0xd8] sm:$0xff]  ;;  %v421_v13 = vld [vmem:[%s6735_s7 + $0xe0] sm:$0xff] }
 0x7ec   : > { %v1846_v63 = vpop.permute.xlu0 %1845  ;;  %2288 = vrot.lane.b32.xlu1 %v2265_v24, %s5085_s18 }
 0x7ed   : > { %1867 = vst.msk [vmem:[#allocation2 + $0x18] sm:$0xff] %vm1863_vm3, %v1846_v63  ;;  %v1844_v35 = vpop.permute.xlu1 %1843  ;;  %v2750_v43 = vld [vmem:[#allocation2] sm:$0xff] }
 0x7ee   : > { %1866 = vst.msk [vmem:[#allocation2 + $0x10] sm:$0xff] %vm1863_vm3, %v1844_v35  ;;  %4543 = vmatprep.subr.bf16.mxu0 %v2750_v43  ;;  %v405_v63 = vld [vmem:[%s6735_s7 + $0x60] sm:$0xff]  ;;  %v423_v35 = vld [vmem:[%s6735_s7 + $0xf0] sm:$0xff] }
 0x7ef   : > { %2301 = vst.msk [vmem:[#allocation2 + $0x10] sm:$0xff] %vm2298_vm4, %v2279_v19  ;;  %4544 = vmatpush3.bf16.xpose.msra.mxu0 %v2750_v43  ;;  %2775 = vperm.xlu0 %4620, %v388_v29   ;;  %v406_v19 = vld [vmem:[%s6735_s7 + $0x68] sm:$0xff]  ;;  %v408_v29 = vld [vmem:[%s6735_s7 + $0x78] sm:$0xff] }
 0x7f0   : > { %v2716_v37 = vpop.permute.xlu0 %2715  ;;  %2760 = vperm.xlu1 %4621, %v385_v4   ;;  %v426_v43 = vld [vmem:[%s6737_s9 + $0x8] sm:$0xff]  ;;  %v407_v4 = vld [vmem:[%s6735_s7 + $0x70] sm:$0xff] }
 0x7f1   : > { %v2714_v30 = vpop.permute.xlu1 %2713 }
 0x7f2   : > { %2736 = vst.msk [vmem:[#allocation2 + $0x10] sm:$0xff] %vm2733_vm5, %v2714_v30  ;;  %v2751_v49 = vld [vmem:[#allocation2 + $0x8] sm:$0xff]  ;;  %v427_v30 = vld [vmem:[%s6737_s9 + $0x10] sm:$0xff] }
 0x7f3   : > { %4545 = vmatprep.subr.bf16.mxu0 %v2751_v49  ;;  %2785 = vperm.xlu0 %4620, %v390_v7   ;;  %v430_v7 = vld [vmem:[%s6737_s9 + $0x28] sm:$0xff] }
 0x7f4   : > { %v2283_v1 = vpop.permute.xlu0 %2282  ;;  %2770 = vperm.xlu1 %4621, %v387_v3   ;;  %v432_v3 = vld [vmem:[%s6737_s9 + $0x38] sm:$0xff] }
 0x7f5   : > { %v2281_v11 = vpop.permute.xlu1 %2280 }
 0x7f6   : > { %2302 = vst.msk [vmem:[#allocation2 + $0x18] sm:$0xff] %vm2298_vm4, %v2281_v11 }
 0x7f7   : > { %2737 = vst.msk [vmem:[#allocation2 + $0x18] sm:$0xff] %vm2733_vm5, %v2716_v37  ;;  %4546 = vmatpush3.bf16.xpose.msra.mxu0 %v2751_v49  ;;  %2795 = vperm.xlu0 %4620, %v392_v50   ;;  %v425_v37 = vld [vmem:[%s6737_s9] sm:$0xff] }
 0x7f8   : > { %v1850_v60 = vpop.permute.xlu0 %1849  ;;  %2780 = vperm.xlu1 %4621, %v389_v62   ;;  %v429_v49 = vld [vmem:[%s6737_s9 + $0x20] sm:$0xff] }
 0x7f9   : > { %1869 = vst.msk [vmem:[#allocation2 + $0x28] sm:$0xff] %vm1863_vm3, %v1850_v60  ;;  %v1848_v58 = vpop.permute.xlu1 %1847  ;;  %v2752_v2 = vld [vmem:[#allocation2 + $0x10] sm:$0xff] }
 0x7fa   : > { %1868 = vst.msk [vmem:[#allocation2 + $0x20] sm:$0xff] %vm1863_vm3, %v1848_v58  ;;  %4547 = vmatprep.subr.bf16.mxu0 %v2752_v2  ;;  %v4647_v58 = vld [vmem:[%s6731_s3 + $0x8] sm:$0xff]  }
 0x7fb   : > { %2303 = vst.msk [vmem:[#allocation2 + $0x20] sm:$0xff] %vm2298_vm4, %v2283_v1  ;;  %2956 = vperm.xlu0 %4620, %v378_v41   ;;  %v431_v1 = vld [vmem:[%s6737_s9 + $0x30] sm:$0xff] }
 0x7fc   : > { %v2720_v31 = vpop.permute.xlu0 %2719  ;;  %2790 = vperm.xlu1 %4621, %v391_v61   ;;  %v4649_v61 = vld [vmem:[%s6731_s3 + $0x18] sm:$0xff]  }
 0x7fd   : > { %v2718_v46 = vpop.permute.xlu1 %2717 }
 0x7fe   : > { %2738 = vst.msk [vmem:[#allocation2 + $0x20] sm:$0xff] %vm2733_vm5, %v2718_v46  ;;  %v2753_v23 = vld [vmem:[#allocation2 + $0x18] sm:$0xff] }
 0x7ff   : > { %4548 = vmatpush3.bf16.xpose.msra.mxu0 %v2752_v2  ;;  %2966 = vperm.xlu0 %4620, %v380_v57   ;;  %v4648_v2 = vld [vmem:[%s6731_s3 + $0x10] sm:$0xff]  }
 0x800   : > { %4549 = vmatprep.subr.bf16.mxu0 %v2753_v23  ;;  %v2287_v34 = vpop.permute.xlu0 %2286  ;;  %2951 = vperm.xlu1 %4621, %v377_v48  }
 0x801   : > { %v2285_v9 = vpop.permute.xlu1 %2284 }
 0x802   : > { %2304 = vst.msk [vmem:[#allocation2 + $0x28] sm:$0xff] %vm2298_vm4, %v2285_v9 }
 0x803   : > { %2739 = vst.msk [vmem:[#allocation2 + $0x28] sm:$0xff] %vm2733_vm5, %v2720_v31  ;;  %2976 = vperm.xlu0 %4620, %v382_v45   ;;  %v4650_v31 = vld [vmem:[%s6734_s6] sm:$0xff]  }
 0x804   : > { %v1854_v24 = vpop.permute.xlu0 %1853  ;;  %2961 = vperm.xlu1 %4621, %v379_v18   ;;  %4575 = vmatprep.mubr.msk.bf16.mxu1 %vm708_vm0, %v4650_v31 }
 0x805   : > { %1871 = vst.msk [vmem:[#allocation2 + $0x38] sm:$0xff] %vm1863_vm3, %v1854_v24  ;;  %v1852_v47 = vpop.permute.xlu1 %1851  ;;  %v2754_v32 = vld [vmem:[#allocation2 + $0x20] sm:$0xff] }
 0x806   : > { %1870 = vst.msk [vmem:[#allocation2 + $0x30] sm:$0xff] %vm1863_vm3, %v1852_v47 }
 0x807   : > { %2305 = vst.msk [vmem:[#allocation2 + $0x30] sm:$0xff] %vm2298_vm4, %v2287_v34  ;;  %4550 = vmatpush3.bf16.xpose.msra.mxu0 %v2753_v23  ;;  %2986 = vperm.xlu0 %4620, %v384_v6  }
 0x808   : > { %4551 = vmatprep.subr.bf16.mxu0 %v2754_v32  ;;  %2971 = vperm.xlu1 %4621, %v381_v5  }
 0x80a   : > { %v2755_v59 = vld [vmem:[#allocation2 + $0x28] sm:$0xff] }
 0x80b   : > { %3120 = vperm.xlu0 %4620, %v410_v28  }
 0x80c   : > { %2981 = vperm.xlu1 %4621, %v383_v54  }
 0x80f   : > { %4552 = vmatpush3.bf16.xpose.msra.mxu0 %v2754_v32  ;;  %3040 = vperm.xlu0 %4620, %v394_v26   ;;  %v5066_v32 = vld [vmem:[%s5170_s26] sm:$0xff]  ;;  %v5067_v26 = vld [vmem:[%s5170_s26 + $0x8] sm:$0xff] }
 0x810   : > { %4553 = vmatprep.subr.bf16.mxu0 %v2755_v59  ;;  %3115 = vperm.xlu1 %4621, %v409_v27  }
 0x813   : > { %3130 = vperm.xlu0 %4620, %v412_v17   ;;  %v5068_v17 = vld [vmem:[%s5170_s26 + $0x10] sm:$0xff] }
 0x814   : > { %3035 = vperm.xlu1 %4621, %v393_v8  }
 0x817   : > { %4554 = vmatpush3.bf16.xpose.msra.mxu0 %v2755_v59  ;;  %3050 = vperm.xlu0 %4620, %v396_v14  }
 0x818   : > { %3125 = vperm.xlu1 %4621, %v411_v51  }
 0x81b   : > { %3140 = vperm.xlu0 %4620, %v414_v10  }
 0x81c   : > { %3045 = vperm.xlu1 %4621, %v395_v39   ;;  %v5069_v39 = vld [vmem:[%s5170_s26 + $0x18] sm:$0xff] }
 0x81f   : > { %3060 = vperm.xlu0 %4620, %v398_v44  }
 0x820   : > { %3135 = vperm.xlu1 %4621, %v413_v16  }
 0x823   : > { %3150 = vperm.xlu0 %4620, %v416_v52  }
 0x824   : > { %3055 = vperm.xlu1 %4621, %v397_v33  }
 0x827   : > { %3070 = vperm.xlu0 %4620, %v400_v40  }
 0x828   : > { %3145 = vperm.xlu1 %4621, %v415_v0  }
 0x82b   : > { %3160 = vperm.xlu0 %4620, %v418_v36  }
 0x82c   : > { %3065 = vperm.xlu1 %4621, %v399_v22   ;;  %v5070_v22 = vld [vmem:[%s5170_s26 + $0x20] sm:$0xff] }
 0x82f   : > { %3080 = vperm.xlu0 %4620, %v402_v25  }
 0x830   : > { %3155 = vperm.xlu1 %4621, %v417_v20  }
 0x833   : > { %3170 = vperm.xlu0 %4620, %v420_v15  }
 0x834   : > { %3075 = vperm.xlu1 %4621, %v401_v53  }
 0x837   : > { %3090 = vperm.xlu0 %4620, %v404_v42  }
 0x838   : > { %3165 = vperm.xlu1 %4621, %v419_v12  }
 0x83b   : > { %3180 = vperm.xlu0 %4620, %v422_v56   ;;  %v5071_v56 = vld [vmem:[%s5170_s26 + $0x28] sm:$0xff] }
 0x83c   : > { %3085 = vperm.xlu1 %4621, %v403_v55  }
 0x83f   : > { %3100 = vperm.xlu0 %4620, %v406_v19   ;;  %v5072_v19 = vld [vmem:[%s5170_s26 + $0x30] sm:$0xff] }
 0x840   : > { %3175 = vperm.xlu1 %4621, %v421_v13  }
 0x843   : > { %3190 = vperm.xlu0 %4620, %v424_v21  }
 0x844   : > { %3095 = vperm.xlu1 %4621, %v405_v63   ;;  %v5073_v63 = vld [vmem:[%s5170_s26 + $0x38] sm:$0xff] }
 0x847   : > { %3110 = vperm.xlu0 %4620, %v408_v29  }
 0x848   : > { %3185 = vperm.xlu1 %4621, %v423_v35  }
 0x84b   : > { %3769 = vperm.xlu0 %4620, %v426_v43  }
 0x84c   : > { %3105 = vperm.xlu1 %4621, %v407_v4  }
 0x84f   : > { %3779 = vperm.xlu0 %4620, %v428_v38  }
 0x850   : > { %3764 = vperm.xlu1 %4621, %v425_v37  }
 0x853   : > { %3789 = vperm.xlu0 %4620, %v430_v7  }
 0x854   : > { %3774 = vperm.xlu1 %4621, %v427_v30  }
 0x857   : > { %3799 = vperm.xlu0 %4620, %v432_v3  }
 0x858   : > { %3784 = vperm.xlu1 %4621, %v429_v49  }
 0x859   : > { %v2724_v62 = vpop.permute.xlu0 %2723 }
 0x85a   : > { %v2722_v50 = vpop.permute.xlu1 %2721 }
 0x85b   : > { %2740 = vst.msk [vmem:[#allocation2 + $0x30] sm:$0xff] %vm2733_vm5, %v2722_v50 }
 0x85c   : > { %3794 = vperm.xlu1 %4621, %v431_v1  }
 0x85e   : > { %v2289_v11 = vpop.permute.xlu1 %2288 }
 0x85f   : > { %2306 = vst.msk [vmem:[#allocation2 + $0x38] sm:$0xff] %vm2298_vm4, %v2289_v11 }
 0x860   : > { %2741 = vst.msk [vmem:[#allocation2 + $0x38] sm:$0xff] %vm2733_vm5, %v2724_v62 }
 0x862   : > { %v2756_v60 = vld [vmem:[#allocation2 + $0x30] sm:$0xff] }
 0x863   : > { %4555 = vmatprep.subr.bf16.mxu0 %v2756_v60 }
 0x864   : > { %4556 = vmatpush3.bf16.xpose.msra.mxu0 %v2756_v60 }
 0x867   : > { %v2757_v41 = vld [vmem:[#allocation2 + $0x38] sm:$0xff] }
 0x868   : > { %4557 = vmatprep.subr.bf16.mxu0 %v2757_v41 }
 0x86a   : > { %v2766_v46 = vpop.permute.xlu0 %2765 }
 0x86c   : > { %4558 = vmatpush3.bf16.xpose.msra.mxu0 %v2757_v41 }
 0x86e   : > { %v2776_v34 = vpop.permute.xlu0 %2775 }
 0x86f   : > { %v2761_v57 = vpop.permute.xlu1 %2760 }
 0x872   : > { %v2786_v59 = vpop.permute.xlu0 %2785 }
 0x873   : > { %4560 = vmatmul.mubr.bf16.vlgmr.msra.gmra.mrb[80].mxu0 %v4647_v58  ;;  %v2771_v48 = vpop.permute.xlu1 %2770 }
 0x874   : > { %4563 = vmatprep.mubr.bf16.mxu0 %v4648_v2 }
 0x876   : > { %v2796_v53 = vpop.permute.xlu0 %2795 }
 0x877   : > { %v2781_v5 = vpop.permute.xlu1 %2780 }
 0x87b   : > { %4564 = vmatmul.mubr.bf16.gmra.mrb[84].mxu0 %v4649_v61  ;;  %v2791_v40 = vpop.permute.xlu1 %2790 }
 0x946   : > { %v4561_v23 = vpop.f32.mrb[80].mxu0 }
 0x947   : > { %v2856_v45 = vpop.f32.mrb[81].mxu0  ;;  %v2865_v6 = vadd.f32 %v4561_v23, %v2771_v48 }
 0x948   : > { %v2857_v9 = vadd.f32 %v2856_v45, %v2761_v57  ;;  %v4562_v18 = vpop.f32.mrb[82].mxu0 }
 0x949   : > { %v2859_v24 = vpop.f32.mrb[83].mxu0  ;;  %v2868_v54 = vadd.f32 %v4562_v18, %v2776_v34  ;;  %v2889_v8 = vadd.f32 %v5068_v17, %v2865_v6 }
 0x94a   : > { %v2860_v47 = vadd.f32 %v2859_v24, %v2766_v46  ;;  %v2887_v28 = vadd.f32 %v5066_v32, %v2857_v9 }
 0x94b   : > { %v2890_v44 = vadd.f32 %v5069_v39, %v2868_v54 }
 0x94c   : > { %v2888_v27 = vadd.f32 %v5067_v26, %v2860_v47 }
 0x94e   : > { %v2895_v14 = vadd.f32 %v2888_v27, %v2887_v28  ;;  %v4565_v51 = vpop.f32.mrb[84].mxu0 }
 0x94f   : > { %v2872_v10 = vpop.f32.mrb[85].mxu0  ;;  %v2881_v36 = vadd.f32 %v4565_v51, %v2791_v40  ;;  %v2957_v51 = vpop.permute.xlu0 %2956 }
 0x950   : > { %v2896_v16 = vadd.f32 %v2895_v14, %v2889_v8  ;;  %v2873_v52 = vadd.f32 %v2872_v10, %v2781_v5  ;;  %v4566_v33 = vpop.f32.mrb[86].mxu0  ;;  %v2952_v10 = vpop.permute.xlu1 %2951 }
 0x951   : > { %v2875_v0 = vpop.f32.mrb[87].mxu0  ;;  %v2884_v12 = vadd.f32 %v4566_v33, %v2796_v53  ;;  %v2893_v13 = vadd.f32 %v5072_v19, %v2881_v36 }
 0x952   : > { %v2891_v25 = vadd.f32 %v5070_v22, %v2873_v52  ;;  %v2897_v20 = vadd.f32 %v2896_v16, %v2890_v44  ;;  %v2876_v15 = vadd.f32 %v2875_v0, %v2786_v59 }
 0x953   : > { %v2894_v29 = vadd.f32 %v5073_v63, %v2884_v12  ;;  %v2967_v39 = vpop.permute.xlu0 %2966 }
 0x954   : > { %v2898_v42 = vadd.f32 %v2897_v20, %v2891_v25  ;;  %v2892_v55 = vadd.f32 %v5071_v56, %v2876_v15 }
 0x956   : > { %v2899_v21 = vadd.f32 %v2898_v42, %v2892_v55 }
 0x957   : > { %v2977_v12 = vpop.permute.xlu0 %2976 }
 0x958   : > { %v2900_v35 = vadd.f32 %v2899_v21, %v2893_v13 }
 0x95a   : > { %v2901_v43 = vadd.f32 %v2900_v35, %v2894_v29 }
 0x95c   : > { %v2902_v4 = vrot.slane %v2901_v43, 4 }
 0x95e   : > { %v2903_v38 = vadd.f32 %v2902_v4, %v2901_v43 }
 0x960   : > { %v2904_v37 = vrot.slane %v2903_v38, 2 }
 0x962   : > { %v2905_v7 = vadd.f32 %v2904_v37, %v2903_v38 }
 0x964   : > { %v2906_v30 = vrot.slane %v2905_v7, 1 }
 0x966   : > { %v2907_v3 = vadd.f32 %v2906_v30, %v2905_v7  ;;  %v4651_v7 = vld [vmem:[%s6734_s6 + $0x8] sm:$0xff]   ;;  %v4652_v30 = vld [vmem:[%s6734_s6 + $0x10] sm:$0xff]  }
 0x968   : > { %v2908_v49 = vmul.f32 0.015625, %v2907_v3  ;;  %v4653_v3 = vld [vmem:[%s6734_s6 + $0x18] sm:$0xff]  }
 0x96a   : > { %v2909_v1 = vsub.f32 %v2887_v28, %v2908_v49  ;;  %v2910_v50 = vsub.f32 %v2888_v27, %v2908_v49  ;;  %v2911_v11 = vsub.f32 %v2889_v8, %v2908_v49  ;;  %v2912_v62 = vsub.f32 %v2890_v44, %v2908_v49  ;;  %v2962_v44 = vpop.permute.xlu1 %2961 }
 0x96b   : > { %v2913_v60 = vsub.f32 %v2891_v25, %v2908_v49  ;;  %v2914_v41 = vsub.f32 %v2892_v55, %v2908_v49  ;;  %v2915_v58 = vsub.f32 %v2893_v13, %v2908_v49  ;;  %v2916_v2 = vsub.f32 %v2894_v29, %v2908_v49  ;;  %v2987_v29 = vpop.permute.xlu0 %2986  ;;  %v4654_v49 = vld [vmem:[%s6734_s6 + $0x20] sm:$0xff]  }
 0x96c   : > { %v2917_v61 = vmul.f32 %v2909_v1, %v2909_v1  ;;  %v2918_v31 = vmul.f32 %v2910_v50, %v2910_v50  ;;  %v2919_v57 = vmul.f32 %v2911_v11, %v2911_v11  ;;  %v2920_v48 = vmul.f32 %v2912_v62, %v2912_v62 }
 0x96d   : > { %v2921_v34 = vmul.f32 %v2913_v60, %v2913_v60  ;;  %v2922_v9 = vmul.f32 %v2914_v41, %v2914_v41  ;;  %v2923_v24 = vmul.f32 %v2915_v58, %v2915_v58  ;;  %v2924_v47 = vmul.f32 %v2916_v2, %v2916_v2 }
 0x96e   : > { %v2925_v46 = vadd.f32 %v2918_v31, %v2917_v61  ;;  %v2972_v56 = vpop.permute.xlu1 %2971  ;;  %v4663_v61 = vld [vmem:[%s6734_s6 + $0x68] sm:$0xff]   ;;  %v4664_v31 = vld [vmem:[%s6734_s6 + $0x70] sm:$0xff]  }
 0x970   : > { %v2926_v23 = vadd.f32 %v2925_v46, %v2919_v57  ;;  %v4665_v57 = vld [vmem:[%s6734_s6 + $0x78] sm:$0xff]  }
 0x972   : > { %v2927_v45 = vadd.f32 %v2926_v23, %v2920_v48  ;;  %v2982_v35 = vpop.permute.xlu1 %2981  ;;  %v6429_v48 = vpop.permute.xlu0 %3120 }
 0x974   : > { %v2928_v18 = vadd.f32 %v2927_v45, %v2921_v34 }
 0x976   : > { %v2929_v6 = vadd.f32 %v2928_v18, %v2922_v9  ;;  %v6427_v46 = vpop.permute.xlu1 %3115  ;;  %v3041_v34 = vpop.permute.xlu0 %3040 }
 0x978   : > { %v2930_v5 = vadd.f32 %v2929_v6, %v2923_v24 }
 0x97a   : > { %v2931_v32 = vadd.f32 %v2930_v5, %v2924_v47  ;;  %v3036_v23 = vpop.permute.xlu1 %3035  ;;  %v6433_v9 = vpop.permute.xlu0 %3130 }
 0x97c   : > { %v2932_v28 = vrot.slane %v2931_v32, 4 }
 0x97e   : > { %v2933_v54 = vadd.f32 %v2932_v28, %v2931_v32  ;;  %v6431_v45 = vpop.permute.xlu1 %3125  ;;  %v3051_v24 = vpop.permute.xlu0 %3050 }
 0x980   : > { %v2934_v26 = vrot.slane %v2933_v54, 2 }
 0x982   : > { %v2935_v27 = vadd.f32 %v2934_v26, %v2933_v54  ;;  %v3046_v18 = vpop.permute.xlu1 %3045  ;;  %v6437_v47 = vpop.permute.xlu0 %3140  ;;  %v4668_v26 = vld [vmem:[%s6736_s8 + $0x4] ss:$8 sps:$4 sm:$0xff]  }
 0x983   : > { %3874 = vmatprep.mubr.bf16.mxu0 %v4668_v26 }
 0x984   : > { %v2936_v59 = vrot.slane %v2935_v27, 1 }
 0x986   : > { %v2937_v17 = vadd.f32 %v2936_v59, %v2935_v27  ;;  %v6435_v6 = vpop.permute.xlu1 %3135  ;;  %v3061_v32 = vpop.permute.xlu0 %3060 }
 0x988   : > { %v2938_v8 = vmul.f32 0.015625, %v2937_v17 }
 0x98a   : > { %v2939_v14 = vadd.f32 1e-05, %v2938_v8  ;;  %v3056_v5 = vpop.permute.xlu1 %3055  ;;  %v6441_v54 = vpop.permute.xlu0 %3150 }
 0x98c   : > { %4936 = vrsqrt.f32 %v2939_v14 }
 0x98e   : > { %v6439_v28 = vpop.permute.xlu1 %3145  ;;  %v3071_v59 = vpop.permute.xlu0 %3070 }
 0x992   : > { %v3066_v27 = vpop.permute.xlu1 %3065  ;;  %v6448_v8 = vpop.permute.xlu0 %3160 }
 0x996   : > { %v4937_v16 = vpop.eup %4936  ;;  %v6446_v17 = vpop.permute.xlu1 %3155 }
 0x997   : > { %v2946_v52 = vmul.f32 %v4937_v16, %v2914_v41  ;;  %v2941_v33 = vmul.f32 %v4937_v16, %v2909_v1  ;;  %v2942_v40 = vmul.f32 %v4937_v16, %v2910_v50  ;;  %v2943_v0 = vmul.f32 %v4937_v16, %v2911_v11  ;;  %v4655_v1 = vld [vmem:[%s6734_s6 + $0x28] sm:$0xff]   ;;  %v4656_v50 = vld [vmem:[%s6734_s6 + $0x30] sm:$0xff]   ;;  %v4657_v11 = vld [vmem:[%s6734_s6 + $0x38] sm:$0xff]  }
 0x998   : > { %v2944_v36 = vmul.f32 %v4937_v16, %v2912_v62  ;;  %v2945_v22 = vmul.f32 %v4937_v16, %v2913_v60  ;;  %v2947_v25 = vmul.f32 %v4937_v16, %v2915_v58  ;;  %v2948_v20 = vmul.f32 %v4937_v16, %v2916_v2  ;;  %v4658_v62 = vld [vmem:[%s6734_s6 + $0x40] sm:$0xff]   ;;  %v4659_v60 = vld [vmem:[%s6734_s6 + $0x48] sm:$0xff]   ;;  %v4660_v41 = vld [vmem:[%s6734_s6 + $0x50] sm:$0xff]  }
 0x999   : > { %v6343_v15 = vmul.f32 %v2952_v10, %v2941_v33  ;;  %v6345_v53 = vmul.f32 %v2957_v51, %v2942_v40  ;;  %v6347_v42 = vmul.f32 %v2962_v44, %v2943_v0  ;;  %v6357_v63 = vmul.f32 %v2977_v12, %v2946_v52  ;;  %v4661_v58 = vld [vmem:[%s6734_s6 + $0x58] sm:$0xff]   ;;  %v4662_v2 = vld [vmem:[%s6734_s6 + $0x60] sm:$0xff]   ;;  %v6450_v51 = vpop.permute.xlu0 %3080 }
 0x99a   : > { %v6349_v55 = vmul.f32 %v2967_v39, %v2944_v36  ;;  %v6355_v21 = vmul.f32 %v2972_v56, %v2945_v22  ;;  %v6361_v4 = vmul.f32 %v2982_v35, %v2947_v25  ;;  %v6363_v38 = vmul.f32 %v2987_v29, %v2948_v20  ;;  %v3076_v14 = vpop.permute.xlu1 %3075 }
 0x99b   : > { %v3029_v19 = vpack.c.bf16 %v6345_v53, %v6343_v15 }
 0x99c   : > { %v3030_v13 = vpack.c.bf16 %v6349_v55, %v6347_v42  ;;  %v3031_v43 = vpack.c.bf16 %v6357_v63, %v6355_v21  ;;  %v3032_v37 = vpack.c.bf16 %v6363_v38, %v6361_v4 }
 0x99d   : > { %4567 = vmatprep.subr.bf16.mxu1 %v3029_v19  ;;  %v6454_v39 = vpop.permute.xlu0 %3170 }
 0x99e   : > { %4568 = vmatpush3.bf16.msra.mxu1 %v3029_v19  ;;  %v6452_v10 = vpop.permute.xlu1 %3165 }
 0x99f   : > { %4569 = vmatprep.subr.bf16.mxu1 %v3030_v13 }
 0x9a1   : > { %v3091_v40 = vpop.permute.xlu0 %3090 }
 0x9a2   : > { %4570 = vmatpush3.bf16.msra.mxu1 %v3030_v13  ;;  %v3086_v44 = vpop.permute.xlu1 %3085 }
 0x9a3   : > { %4571 = vmatprep.subr.bf16.mxu1 %v3031_v43 }
 0x9a6   : > { %4572 = vmatpush3.bf16.msra.mxu1 %v3031_v43  ;;  %v6467_v29 = vpop.permute.xlu1 %3175 }
 0x9a7   : > { %4573 = vmatprep.subr.bf16.mxu1 %v3032_v37 }
 0x9aa   : > { %4574 = vmatpush3.bf16.msra.mxu1 %v3032_v37 }
 0x9ad   : > { %4576 = vmatmul.mubr.msk.bf16.vlgmr.msra.gmra.mrb[96].mxu1 %vm708_vm0, %v4651_v7  ;;  %v6470_v7 = vpop.permute.xlu0 %3180 }
 0x9ae   : > { %4579 = vmatprep.mubr.msk.bf16.mxu1 %vm708_vm0, %v4652_v30 }
 0x9b5   : > { %4580 = vmatmul.mubr.msk.bf16.gmra.mrb[100].mxu1 %vm708_vm0, %v4653_v3 }
 0x9b6   : > { %4583 = vmatprep.mubr.msk.bf16.mxu1 %vm708_vm0, %v4654_v49 }
 0x9bd   : > { %4584 = vmatmul.mubr.msk.bf16.gmra.mrb[104].mxu1 %vm708_vm0, %v4655_v1 }
 0x9be   : > { %4587 = vmatprep.mubr.msk.bf16.mxu1 %vm708_vm0, %v4656_v50 }
 0x9c5   : > { %4588 = vmatmul.mubr.msk.bf16.gmra.mrb[108].mxu1 %vm708_vm0, %v4657_v11 }
 0x9c6   : > { %4591 = vmatprep.mubr.msk.bf16.mxu1 %vm708_vm0, %v4658_v62 }
 0x9cd   : > { %4592 = vmatmul.mubr.msk.bf16.gmra.mrb[112].mxu1 %vm708_vm0, %v4659_v60 }
 0x9ce   : > { %4595 = vmatprep.mubr.msk.bf16.mxu1 %vm708_vm0, %v4660_v41 }
 0x9d5   : > { %4596 = vmatmul.mubr.msk.bf16.gmra.mrb[116].mxu1 %vm708_vm0, %v4661_v58  ;;  %v3096_v58 = vpop.permute.xlu1 %3095 }
 0x9d6   : > { %4599 = vmatprep.mubr.msk.bf16.mxu1 %vm708_vm0, %v4662_v2 }
 0x9dd   : > { %4600 = vmatmul.mubr.msk.bf16.gmra.mrb[120].mxu1 %vm708_vm0, %v4663_v61 }
 0x9de   : > { %4603 = vmatprep.mubr.msk.bf16.mxu1 %vm708_vm0, %v4664_v31 }
 0x9e5   : > { %4604 = vmatmul.mubr.msk.bf16.gmra.mrb[124].mxu1 %vm708_vm0, %v4665_v57 }
 0xa80   : > { %v4577_v16 = vpop.f32.mrb[96].mxu1 }
 0xa81   : > { %v6456_v52 = vadd.f32 %v4577_v16, %v3046_v18  ;;  %v3355_v33 = vpop.f32.mrb[97].mxu1 }
 0xa82   : > { %v6458_v0 = vadd.f32 %v3355_v33, %v3036_v23  ;;  %v4578_v36 = vpop.f32.mrb[98].mxu1  ;;  %v3101_v23 = vpop.permute.xlu0 %3100 }
 0xa83   : > { %v4105_v22 = vmul.f32 -1.702, %v6456_v52  ;;  %v6461_v25 = vadd.f32 %v4578_v36, %v3051_v24  ;;  %v3358_v20 = vpop.f32.mrb[99].mxu1 }
 0xa84   : > { %v4103_v12 = vmul.f32 -1.702, %v6458_v0  ;;  %v6464_v56 = vadd.f32 %v3358_v20, %v3041_v34 }
 0xa85   : > { %v3550_v19 = vmul.f32 1.442695, %v4105_v22  ;;  %v4106_v13 = vmul.f32 -1.702, %v6461_v25 }
 0xa86   : > { %v3546_v35 = vmul.f32 1.442695, %v4103_v12  ;;  %v4104_v43 = vmul.f32 -1.702, %v6464_v56 }
 0xa87   : > { %4938 = vpow2.f32 %v3550_v19  ;;  %v3552_v37 = vmul.f32 1.442695, %v4106_v13 }
 0xa88   : > { %4940 = vpow2.f32 %v3546_v35  ;;  %v3548_v30 = vmul.f32 1.442695, %v4104_v43  ;;  %v4581_v3 = vpop.f32.mrb[100].mxu1 }
 0xa89   : > { %4942 = vpow2.f32 %v3552_v37  ;;  %v6472_v49 = vadd.f32 %v4581_v3, %v3066_v27  ;;  %v3371_v1 = vpop.f32.mrb[101].mxu1 }
 0xa8a   : > { %4944 = vpow2.f32 %v3548_v30  ;;  %v6474_v50 = vadd.f32 %v3371_v1, %v3056_v5  ;;  %v4582_v11 = vpop.f32.mrb[102].mxu1  ;;  %v6493_v30 = vpop.permute.xlu0 %3190 }
 0xa8b   : > { %v4109_v62 = vmul.f32 -1.702, %v6472_v49  ;;  %v6477_v60 = vadd.f32 %v4582_v11, %v3071_v59  ;;  %v3374_v41 = vpop.f32.mrb[103].mxu1 }
 0xa8c   : > { %v4107_v2 = vmul.f32 -1.702, %v6474_v50  ;;  %v6480_v61 = vadd.f32 %v3374_v41, %v3061_v32  ;;  %v6486_v32 = vpop.permute.xlu1 %3185 }
 0xa8d   : > { %v3558_v31 = vmul.f32 1.442695, %v4109_v62  ;;  %v4110_v57 = vmul.f32 -1.702, %v6477_v60 }
 0xa8e   : > { %v3554_v34 = vmul.f32 1.442695, %v4107_v2  ;;  %v4108_v18 = vmul.f32 -1.702, %v6480_v61 }
 0xa8f   : > { %4946 = vpow2.f32 %v3558_v31  ;;  %v3560_v24 = vmul.f32 1.442695, %v4110_v57 }
 0xa90   : > { %4948 = vpow2.f32 %v3554_v34  ;;  %v3556_v5 = vmul.f32 1.442695, %v4108_v18  ;;  %v4585_v26 = vpop.f32.mrb[104].mxu1  ;;  %v3106_v31 = vpop.permute.xlu1 %3105 }
 0xa91   : > { %v4939_v27 = vpop.eup %4938  ;;  %4950 = vpow2.f32 %v3560_v24  ;;  %v6484_v59 = vadd.f32 %v4585_v26, %v3086_v44  ;;  %v3387_v16 = vpop.f32.mrb[105].mxu1 }
 0xa92   : > { %v4941_v33 = vpop.eup %4940  ;;  %v3612_v36 = vadd.f32 1.0, %v4939_v27  ;;  %4952 = vpow2.f32 %v3556_v5  ;;  %v6488_v22 = vadd.f32 %v3387_v16, %v3076_v14  ;;  %v4586_v20 = vpop.f32.mrb[106].mxu1 }
 0xa93   : > { %v4943_v12 = vpop.eup %4942  ;;  %v3610_v19 = vadd.f32 1.0, %v4941_v33  ;;  %v4113_v13 = vmul.f32 -1.702, %v6484_v59  ;;  %v6491_v35 = vadd.f32 %v4586_v20, %v3091_v40  ;;  %v3390_v43 = vpop.f32.mrb[107].mxu1 }
 0xa94   : > { %v4945_v37 = vpop.eup %4944  ;;  %4954 = vrcp.f32 %v3612_v36  ;;  %v3613_v44 = vadd.f32 1.0, %v4943_v12  ;;  %v4111_v3 = vmul.f32 -1.702, %v6488_v22  ;;  %v6497_v1 = vadd.f32 %v3390_v43, %v6450_v51  ;;  %v3111_v26 = vpop.permute.xlu0 %3110 }
 0xa95   : > { %4956 = vrcp.f32 %v3610_v19  ;;  %v3611_v14 = vadd.f32 1.0, %v4945_v37  ;;  %v3566_v11 = vmul.f32 1.442695, %v4113_v13  ;;  %v4114_v62 = vmul.f32 -1.702, %v6491_v35 }
 0xa96   : > { %4958 = vrcp.f32 %v3613_v44  ;;  %v3562_v41 = vmul.f32 1.442695, %v4111_v3  ;;  %v4112_v40 = vmul.f32 -1.702, %v6497_v1 }
 0xa97   : > { %4960 = vrcp.f32 %v3611_v14  ;;  %v3568_v2 = vmul.f32 1.442695, %v4114_v62 }
 0xa98   : > { %4962 = vpow2.f32 %v3566_v11  ;;  %v3564_v57 = vmul.f32 1.442695, %v4112_v40  ;;  %v4589_v34 = vpop.f32.mrb[108].mxu1 }
 0xa99   : > { %v4947_v18 = vpop.eup %4946  ;;  %4964 = vpow2.f32 %v3562_v41  ;;  %v6501_v24 = vadd.f32 %v4589_v34, %v3106_v31  ;;  %v3403_v51 = vpop.f32.mrb[109].mxu1 }
 0xa9a   : > { %v4949_v5 = vpop.eup %4948  ;;  %v3616_v27 = vadd.f32 1.0, %v4947_v18  ;;  %4966 = vpow2.f32 %v3568_v2  ;;  %v6503_v16 = vadd.f32 %v3403_v51, %v3096_v58  ;;  %v4590_v33 = vpop.f32.mrb[110].mxu1 }
 0xa9b   : > { %v4951_v36 = vpop.eup %4950  ;;  %v3614_v20 = vadd.f32 1.0, %v4949_v5  ;;  %4968 = vpow2.f32 %v3564_v57  ;;  %v4117_v12 = vmul.f32 -1.702, %v6501_v24  ;;  %v6506_v19 = vadd.f32 %v4590_v33, %v3111_v26  ;;  %v3406_v13 = vpop.f32.mrb[111].mxu1 }
 0xa9c   : > { %v4953_v43 = vpop.eup %4952  ;;  %4970 = vrcp.f32 %v3616_v27  ;;  %v3617_v37 = vadd.f32 1.0, %v4951_v36  ;;  %v4115_v44 = vmul.f32 -1.702, %v6503_v16  ;;  %v6509_v3 = vadd.f32 %v3406_v13, %v3101_v23 }
 0xa9d   : > { %4972 = vrcp.f32 %v3614_v20  ;;  %v3615_v14 = vadd.f32 1.0, %v4953_v43  ;;  %v3574_v58 = vmul.f32 1.442695, %v4117_v12  ;;  %v4118_v11 = vmul.f32 -1.702, %v6506_v19 }
 0xa9e   : > { %v4955_v62 = vpop.eup %4954  ;;  %4974 = vrcp.f32 %v3617_v37  ;;  %v3570_v41 = vmul.f32 1.442695, %v4115_v44  ;;  %v4116_v40 = vmul.f32 -1.702, %v6509_v3 }
 0xa9f   : > { %v4957_v2 = vpop.eup %4956  ;;  %4976 = vrcp.f32 %v3615_v14  ;;  %v3576_v31 = vmul.f32 1.442695, %v4118_v11  ;;  %v6514_v23 = vmul.f32 %v4955_v62, %v6456_v52 }
 0xaa0   : > { %v4959_v57 = vpop.eup %4958  ;;  %4978 = vpow2.f32 %v3574_v58  ;;  %v3572_v34 = vmul.f32 1.442695, %v4116_v40  ;;  %v4593_v18 = vpop.f32.mrb[112].mxu1  ;;  %v6523_v36 = vmul.f32 %v4957_v2, %v6458_v0 }
 0xaa1   : > { %v4961_v51 = vpop.eup %4960  ;;  %v6517_v5 = vmul.f32 %v4959_v57, %v6461_v25  ;;  %4980 = vpow2.f32 %v3570_v41  ;;  %v6520_v26 = vadd.f32 %v4593_v18, %v6431_v45  ;;  %v3419_v27 = vpop.f32.mrb[113].mxu1 }
 0xaa2   : > { %v4963_v33 = vpop.eup %4962  ;;  %v6526_v20 = vmul.f32 %v4961_v51, %v6464_v56  ;;  %4982 = vpow2.f32 %v3576_v31  ;;  %v6529_v12 = vadd.f32 %v3419_v27, %v6427_v46  ;;  %v4594_v52 = vpop.f32.mrb[114].mxu1 }
 0xaa3   : > { %v4965_v13 = vpop.eup %4964  ;;  %v3747_v25 = vpack.c.bf16 %v6517_v5, %v6514_v23  ;;  %v3620_v43 = vadd.f32 1.0, %v4963_v33  ;;  %4984 = vpow2.f32 %v3572_v34  ;;  %v4121_v45 = vmul.f32 -1.702, %v6520_v26  ;;  %v3422_v37 = vpop.f32.mrb[115].mxu1 }
 0xaa4   : > { %v4967_v44 = vpop.eup %4966  ;;  %v3746_v0 = vpack.c.bf16 %v6526_v20, %v6523_v36  ;;  %v3618_v56 = vadd.f32 1.0, %v4965_v13  ;;  %v4119_v14 = vmul.f32 -1.702, %v6529_v12  ;;  %v6538_v46 = vadd.f32 %v4594_v52, %v6433_v9 }
 0xaa5   : > { %v4969_v58 = vpop.eup %4968  ;;  %4986 = vrcp.f32 %v3620_v43  ;;  %v3621_v11 = vadd.f32 1.0, %v4967_v44  ;;  %v3582_v62 = vmul.f32 1.442695, %v4121_v45  ;;  %v6541_v41 = vadd.f32 %v3422_v37, %v6429_v48 }
 0xaa6   : > { %v4971_v40 = vpop.eup %4970  ;;  %4988 = vrcp.f32 %v3618_v56  ;;  %v3619_v2 = vadd.f32 1.0, %v4969_v58  ;;  %v3578_v31 = vmul.f32 1.442695, %v4119_v14  ;;  %v4122_v57 = vmul.f32 -1.702, %v6538_v46 }
 0xaa7   : > { %v4973_v34 = vpop.eup %4972  ;;  %4990 = vrcp.f32 %v3621_v11  ;;  %v4120_v18 = vmul.f32 -1.702, %v6541_v41  ;;  %v6546_v9 = vmul.f32 %v4971_v40, %v6472_v49 }
 0xaa8   : > { %v4975_v51 = vpop.eup %4974  ;;  %4992 = vrcp.f32 %v3619_v2  ;;  %v3584_v27 = vmul.f32 1.442695, %v4122_v57  ;;  %v4597_v33 = vpop.f32.mrb[116].mxu1  ;;  %v6555_v44 = vmul.f32 %v4973_v34, %v6474_v50 }
 0xaa9   : > { %v4977_v52 = vpop.eup %4976  ;;  %v6549_v48 = vmul.f32 %v4975_v51, %v6477_v60  ;;  %4994 = vpow2.f32 %v3582_v62  ;;  %v3580_v13 = vmul.f32 1.442695, %v4120_v18  ;;  %v6552_v43 = vadd.f32 %v4597_v33, %v6439_v28  ;;  %v3435_v45 = vpop.f32.mrb[117].mxu1 }
 0xaaa   : > { %v4979_v37 = vpop.eup %4978  ;;  %v6558_v49 = vmul.f32 %v4977_v52, %v6480_v61  ;;  %4996 = vpow2.f32 %v3578_v31  ;;  %v6561_v56 = vadd.f32 %v3435_v45, %v6435_v6  ;;  %v4598_v14 = vpop.f32.mrb[118].mxu1 }
 0xaab   : > { %v4981_v60 = vpop.eup %4980  ;;  %v3749_v58 = vpack.c.bf16 %v6549_v48, %v6546_v9  ;;  %v3624_v11 = vadd.f32 1.0, %v4979_v37  ;;  %4998 = vpow2.f32 %v3584_v27  ;;  %v4125_v28 = vmul.f32 -1.702, %v6552_v43  ;;  %v3438_v62 = vpop.f32.mrb[119].mxu1 }
 0xaac   : > { %v4983_v40 = vpop.eup %4982  ;;  %v3748_v50 = vpack.c.bf16 %v6558_v49, %v6555_v44  ;;  %v3622_v61 = vadd.f32 1.0, %v4981_v60  ;;  %5000 = vpow2.f32 %v3580_v13  ;;  %v4123_v2 = vmul.f32 -1.702, %v6561_v56 }
 0xaad   : > { %v4985_v6 = vpop.eup %4984  ;;  %5002 = vrcp.f32 %v3624_v11  ;;  %v3625_v31 = vadd.f32 1.0, %v4983_v40  ;;  %v3590_v57 = vmul.f32 1.442695, %v4125_v28  ;;  %v6570_v34 = vadd.f32 %v4598_v14, %v6441_v54 }
 0xaae   : > { %5004 = vrcp.f32 %v3622_v61  ;;  %v3623_v18 = vadd.f32 1.0, %v4985_v6  ;;  %v3586_v51 = vmul.f32 1.442695, %v4123_v2  ;;  %v6573_v27 = vadd.f32 %v3438_v62, %v6437_v47 }
 0xaaf   : > { %v4987_v33 = vpop.eup %4986  ;;  %5006 = vrcp.f32 %v3625_v31  ;;  %v4126_v52 = vmul.f32 -1.702, %v6570_v34 }
 0xab0   : > { %v4989_v13 = vpop.eup %4988  ;;  %v6577_v45 = vmul.f32 %v4987_v33, %v6484_v59  ;;  %5008 = vrcp.f32 %v3623_v18  ;;  %v4124_v37 = vmul.f32 -1.702, %v6573_v27  ;;  %v4601_v60 = vpop.f32.mrb[120].mxu1 }
 0xab1   : > { %v4991_v54 = vpop.eup %4990  ;;  %v6581_v14 = vmul.f32 %v4989_v13, %v6488_v22  ;;  %5010 = vpow2.f32 %v3590_v57  ;;  %v3592_v11 = vmul.f32 1.442695, %v4126_v52  ;;  %v6584_v47 = vadd.f32 %v4601_v60, %v6452_v10  ;;  %v3451_v28 = vpop.f32.mrb[121].mxu1 }
 0xab2   : > { %v4993_v62 = vpop.eup %4992  ;;  %v6587_v40 = vmul.f32 %v4991_v54, %v6491_v35  ;;  %5012 = vpow2.f32 %v3586_v51  ;;  %v3588_v59 = vmul.f32 1.442695, %v4124_v37  ;;  %v6590_v61 = vadd.f32 %v3451_v28, %v6446_v17  ;;  %v4602_v2 = vpop.f32.mrb[122].mxu1 }
 0xab3   : > { %v4995_v6 = vpop.eup %4994  ;;  %v6593_v22 = vmul.f32 %v4993_v62, %v6497_v1  ;;  %5014 = vpow2.f32 %v3592_v11  ;;  %v4129_v31 = vmul.f32 -1.702, %v6584_v47  ;;  %v6597_v10 = vadd.f32 %v4602_v2, %v6454_v39  ;;  %v3454_v57 = vpop.f32.mrb[123].mxu1 }
 0xab4   : > { %v4997_v18 = vpop.eup %4996  ;;  %v3628_v51 = vadd.f32 1.0, %v4995_v6  ;;  %5016 = vpow2.f32 %v3588_v59  ;;  %v4127_v17 = vmul.f32 -1.702, %v6590_v61  ;;  %v6606_v54 = vadd.f32 %v3454_v57, %v6448_v8 }
 0xab5   : > { %v4999_v33 = vpop.eup %4998  ;;  %v3626_v52 = vadd.f32 1.0, %v4997_v18  ;;  %v4130_v13 = vmul.f32 -1.702, %v6597_v10  ;;  %v3598_v60 = vmul.f32 1.442695, %v4129_v31  ;;  %v6755_v48 = vpack.c.bf16 %v6587_v40, %v6577_v45 }
 0xab6   : > { %v5001_v37 = vpop.eup %5000  ;;  %5018 = vrcp.f32 %v3628_v51  ;;  %v3629_v39 = vadd.f32 1.0, %v4999_v33  ;;  %v3594_v62 = vmul.f32 1.442695, %v4127_v17  ;;  %v4128_v6 = vmul.f32 -1.702, %v6606_v54 }
 0xab7   : > { %v5003_v11 = vpop.eup %5002  ;;  %5020 = vrcp.f32 %v3626_v52  ;;  %v3627_v28 = vadd.f32 1.0, %v5001_v37  ;;  %v3600_v2 = vmul.f32 1.442695, %v4130_v13  ;;  %v4669_v45 = vld [vmem:[%s6736_s8 + $0x14] ss:$8 sps:$4 sm:$0xff]  }
 0xab8   : > { %v5005_v59 = vpop.eup %5004  ;;  %5022 = vrcp.f32 %v3629_v39  ;;  %v4605_v35 = vpop.f32.mrb[124].mxu1  ;;  %v6610_v1 = vmul.f32 %v5003_v11, %v6501_v24  ;;  %v3596_v33 = vmul.f32 1.442695, %v4128_v6  ;;  %v4671_v40 = vld [vmem:[%s6736_s8 + $0x10] ss:$8 sps:$4 sm:$0xff]  }
 0xab9   : > { %v5007_v18 = vpop.eup %5006  ;;  %v6613_v51 = vmul.f32 %v5005_v59, %v6503_v16  ;;  %5024 = vrcp.f32 %v3627_v28  ;;  %v6616_v8 = vadd.f32 %v4605_v35, %v6486_v32  ;;  %v3467_v31 = vpop.f32.mrb[125].mxu1 }
 0xaba   : > { %v5009_v57 = vpop.eup %5008  ;;  %v6619_v17 = vmul.f32 %v5007_v18, %v6506_v19  ;;  %5026 = vpow2.f32 %v3598_v60  ;;  %v6622_v52 = vadd.f32 %v3467_v31, %v6467_v29  ;;  %v4606_v13 = vpop.f32.mrb[126].mxu1 }
 0xabb   : > { %v5011_v24 = vpop.eup %5010  ;;  %v6625_v37 = vmul.f32 %v5009_v57, %v6509_v3  ;;  %5028 = vpow2.f32 %v3594_v62  ;;  %v4133_v16 = vmul.f32 -1.702, %v6616_v8  ;;  %v6629_v32 = vadd.f32 %v4606_v13, %v6493_v30  ;;  %v3470_v35 = vpop.f32.mrb[127].mxu1 }
 0xabc   : > { %v5013_v39 = vpop.eup %5012  ;;  %v3632_v60 = vadd.f32 1.0, %v5011_v24  ;;  %5030 = vpow2.f32 %v3600_v2  ;;  %v4131_v29 = vmul.f32 -1.702, %v6622_v52  ;;  %v6638_v57 = vadd.f32 %v3470_v35, %v6470_v7 }
 0xabd   : > { %v5015_v11 = vpop.eup %5014  ;;  %v3630_v28 = vadd.f32 1.0, %v5013_v39  ;;  %5032 = vpow2.f32 %v3596_v33  ;;  %v3606_v30 = vmul.f32 1.442695, %v4133_v16  ;;  %v4134_v6 = vmul.f32 -1.702, %v6629_v32 }
 0xabe   : > { %v5017_v62 = vpop.eup %5016  ;;  %5034 = vrcp.f32 %v3632_v60  ;;  %v3633_v59 = vadd.f32 1.0, %v5015_v11  ;;  %v3602_v31 = vmul.f32 1.442695, %v4131_v29  ;;  %v4132_v39 = vmul.f32 -1.702, %v6638_v57 }
 0xabf   : > { %5036 = vrcp.f32 %v3630_v28  ;;  %v3631_v18 = vadd.f32 1.0, %v5017_v62  ;;  %v3608_v13 = vmul.f32 1.442695, %v4134_v6 }
 0xac0   : > { %v5019_v2 = vpop.eup %5018  ;;  %5038 = vrcp.f32 %v3633_v59  ;;  %v3604_v28 = vmul.f32 1.442695, %v4132_v39 }
 0xac1   : > { %v5021_v24 = vpop.eup %5020  ;;  %5040 = vrcp.f32 %v3631_v18  ;;  %v3724_v16 = vmul.f32 %v5019_v2, %v6520_v26 }
 0xac2   : > { %v5023_v33 = vpop.eup %5022  ;;  %5042 = vpow2.f32 %v3606_v30  ;;  %v3722_v7 = vmul.f32 %v5021_v24, %v6529_v12 }
 0xac3   : > { %v5025_v60 = vpop.eup %5024  ;;  %v3725_v11 = vmul.f32 %v5023_v33, %v6538_v46  ;;  %5044 = vpow2.f32 %v3602_v31 }
 0xac4   : > { %v5027_v29 = vpop.eup %5026  ;;  %v3723_v35 = vmul.f32 %v5025_v60, %v6541_v41  ;;  %5046 = vpow2.f32 %v3608_v13 }
 0xac5   : > { %v5029_v62 = vpop.eup %5028  ;;  %v3636_v59 = vadd.f32 1.0, %v5027_v29  ;;  %5048 = vpow2.f32 %v3604_v28  ;;  %v3755_v6 = vpack.c.bf16 %v3725_v11, %v3724_v16 }
 0xac6   : > { %v5031_v18 = vpop.eup %5030  ;;  %v3634_v19 = vadd.f32 1.0, %v5029_v62  ;;  %v3754_v30 = vpack.c.bf16 %v3723_v35, %v3722_v7  ;;  %v6754_v62 = vpack.c.bf16 %v6593_v22, %v6581_v14  ;;  %v6756_v14 = vpack.c.bf16 %v6625_v37, %v6613_v51  ;;  %v4666_v22 = vld [vmem:[%s6736_s8] ss:$8 sps:$4 sm:$0xff]   ;;  %v4672_v51 = vld [vmem:[%s6736_s8 + $0x24] ss:$8 sps:$4 sm:$0xff]  }
 0xac7   : > { %v5033_v3 = vpop.eup %5032  ;;  %5050 = vrcp.f32 %v3636_v59  ;;  %v3637_v26 = vadd.f32 1.0, %v5031_v18 }
 0xac8   : > { %v5035_v2 = vpop.eup %5034  ;;  %5052 = vrcp.f32 %v3634_v19  ;;  %v3635_v46 = vadd.f32 1.0, %v5033_v3  ;;  %4287 = vmatprep.subr.bf16.mxu0 %v3754_v30  ;;  %v3765_v30 = vpop.permute.xlu1 %3764 }
 0xac9   : > { %v5037_v31 = vpop.eup %5036  ;;  %5054 = vrcp.f32 %v3637_v26  ;;  %4288 = vmatpush3.bf16.msra.mxu0 %v3746_v0  ;;  %v3728_v13 = vmul.f32 %v5035_v2, %v6552_v43 }
 0xaca   : > { %v5039_v12 = vpop.eup %5038  ;;  %5056 = vrcp.f32 %v3635_v46  ;;  %4289 = vmatprep.subr.bf16.mxu0 %v3755_v6  ;;  %v3726_v33 = vmul.f32 %v5037_v31, %v6561_v56  ;;  %v3770_v31 = vpop.permute.xlu0 %3769 }
 0xacb   : > { %v5041_v41 = vpop.eup %5040  ;;  %v3729_v24 = vmul.f32 %v5039_v12, %v6570_v34 }
 0xacc   : > { %v5043_v39 = vpop.eup %5042  ;;  %v3727_v19 = vmul.f32 %v5041_v41, %v6573_v27 }
 0xacd   : > { %v5045_v3 = vpop.eup %5044  ;;  %v3640_v60 = vadd.f32 1.0, %v5043_v39  ;;  %4290 = vmatpush3.bf16.msra.mxu0 %v3747_v25  ;;  %v3757_v36 = vpack.c.bf16 %v3729_v24, %v3728_v13 }
 0xace   : > { %v5047_v20 = vpop.eup %5046  ;;  %v3638_v0 = vadd.f32 1.0, %v5045_v3  ;;  %v3756_v16 = vpack.c.bf16 %v3727_v19, %v3726_v33  ;;  %v3775_v3 = vpop.permute.xlu1 %3774 }
 0xacf   : > { %v5049_v11 = vpop.eup %5048  ;;  %5058 = vrcp.f32 %v3640_v60  ;;  %v3641_v43 = vadd.f32 1.0, %v5047_v20 }
 0xad0   : > { %5060 = vrcp.f32 %v3638_v0  ;;  %v3639_v34 = vadd.f32 1.0, %v5049_v11  ;;  %4291 = vmatprep.subr.bf16.mxu0 %v3756_v16  ;;  %v3780_v0 = vpop.permute.xlu0 %3779 }
 0xad1   : > { %v5051_v28 = vpop.eup %5050  ;;  %5062 = vrcp.f32 %v3641_v43  ;;  %4292 = vmatpush3.bf16.msra.mxu0 %v3748_v50 }
 0xad2   : > { %v5053_v56 = vpop.eup %5052  ;;  %5064 = vrcp.f32 %v3639_v34  ;;  %4293 = vmatprep.subr.bf16.mxu0 %v3757_v36  ;;  %v3732_v25 = vmul.f32 %v5051_v28, %v6584_v47 }
 0xad3   : > { %v5055_v23 = vpop.eup %5054  ;;  %v3730_v29 = vmul.f32 %v5053_v56, %v6590_v61  ;;  %v3785_v56 = vpop.permute.xlu1 %3784 }
 0xad4   : > { %v5057_v5 = vpop.eup %5056  ;;  %v3733_v27 = vmul.f32 %v5055_v23, %v6597_v10 }
 0xad5   : > { %v3731_v7 = vmul.f32 %v5057_v5, %v6606_v54  ;;  %4294 = vmatpush3.bf16.msra.mxu0 %v3749_v58 }
 0xad6   : > { %v3759_v35 = vpack.c.bf16 %v3733_v27, %v3732_v25  ;;  %v3790_v27 = vpop.permute.xlu0 %3789 }
 0xad7   : > { %v3758_v44 = vpack.c.bf16 %v3731_v7, %v3730_v29 }
 0xad9   : > { %v5059_v49 = vpop.eup %5058  ;;  %4295 = vmatprep.subr.bf16.mxu0 %v3758_v44 }
 0xada   : > { %v5061_v50 = vpop.eup %5060  ;;  %4296 = vmatpush3.bf16.msra.mxu0 %v6754_v62  ;;  %v3736_v61 = vmul.f32 %v5059_v49, %v6616_v8  ;;  %v6757_v8 = vpack.c.bf16 %v6619_v17, %v6610_v1  ;;  %v4674_v1 = vld [vmem:[%s6736_s8 + $0x20] ss:$8 sps:$4 sm:$0xff]   ;;  %v4675_v17 = vld [vmem:[%s6736_s8 + $0x34] ss:$8 sps:$4 sm:$0xff]  }
 0xadb   : > { %v5063_v47 = vpop.eup %5062  ;;  %4297 = vmatprep.subr.bf16.mxu0 %v3759_v35  ;;  %v3734_v59 = vmul.f32 %v5061_v50, %v6622_v52  ;;  %v4677_v52 = vld [vmem:[%s6736_s8 + $0x30] ss:$8 sps:$4 sm:$0xff]   ;;  %v3795_v50 = vpop.permute.xlu1 %3794 }
 0xadc   : > { %v5065_v10 = vpop.eup %5064  ;;  %v3737_v54 = vmul.f32 %v5063_v47, %v6629_v32 }
 0xadd   : > { %v3735_v9 = vmul.f32 %v5065_v10, %v6638_v57 }
 0xade   : > { %4298 = vmatpush3.bf16.msra.mxu0 %v6755_v48  ;;  %v3761_v58 = vpack.c.bf16 %v3737_v54, %v3736_v61  ;;  %v3800_v61 = vpop.permute.xlu0 %3799 }
 0xadf   : > { %v3760_v6 = vpack.c.bf16 %v3735_v9, %v3734_v59 }
 0xae1   : > { %4299 = vmatprep.subr.bf16.mxu0 %v3760_v6 }
 0xae2   : > { %4300 = vmatpush3.bf16.msra.mxu0 %v6756_v14 }
 0xae3   : > { %4301 = vmatprep.subr.bf16.mxu0 %v3761_v58 }
 0xae6   : > { %4302 = vmatpush3.bf16.msra.mxu0 %v6757_v8 }
 0xae9   : > { %3875 = vmatmul.mubr.bf16.vlgmr.msra.gmra.mrb[88].mxu0 %v4666_v22 }
 0xaea   : > { %3882 = vmatprep.mubr.bf16.mxu0 %v4669_v45 }
 0xaf1   : > { %3883 = vmatmul.mubr.bf16.gmra.mrb[92].mxu0 %v4671_v40 }
 0xaf2   : > { %3890 = vmatprep.mubr.bf16.mxu0 %v4672_v51 }
 0xaf9   : > { %3891 = vmatmul.mubr.bf16.gmra.mrb[96].mxu0 %v4674_v1 }
 0xafa   : > { %3898 = vmatprep.mubr.bf16.mxu0 %v4675_v17 }
 0xb01   : > { %3899 = vmatmul.mubr.bf16.gmra.mrb[100].mxu0 %v4677_v52 }
 0xbbc   : > { %v4303_v37 = vpop.f32.mrb[88].mxu0 }
 0xbbd   : > { %v4304_v32 = vpop.f32.mrb[89].mxu0 }
 0xbbe   : > { %v4305_v57 = vadd.f32 %v4304_v32, %v4303_v37  ;;  %v4306_v18 = vpop.f32.mrb[90].mxu0 }
 0xbbf   : > { %v4307_v26 = vpop.f32.mrb[91].mxu0 }
 0xbc0   : > { %v3877_v2 = vadd.f32 %v4305_v57, %v3765_v30  ;;  %v4308_v46 = vadd.f32 %v4307_v26, %v4306_v18 }
 0xbc2   : > { %v3907_v12 = vadd.f32 %v3877_v2, %v6343_v15  ;;  %v3880_v41 = vadd.f32 %v4308_v46, %v3770_v31 }
 0xbc4   : > { %3915 = vst [vmem:[%s6707_s29] sm:$0xff] %v3907_v12  ;;  %v3908_v13 = vadd.f32 %v3880_v41, %v6345_v53  ;;  %v4309_v24 = vpop.f32.mrb[92].mxu0 }
 0xbc5   : > { %v4310_v39 = vpop.f32.mrb[93].mxu0 }
 0xbc6   : > { %3916 = vst [vmem:[%s6707_s29 + $0x8] sm:$0xff] %v3908_v13  ;;  %v4311_v33 = vadd.f32 %v4310_v39, %v4309_v24  ;;  %v4312_v19 = vpop.f32.mrb[94].mxu0 }
 0xbc7   : > { %v4313_v60 = vpop.f32.mrb[95].mxu0 }
 0xbc8   : > { %v3885_v36 = vadd.f32 %v4311_v33, %v3775_v3  ;;  %v4314_v20 = vadd.f32 %v4313_v60, %v4312_v19 }
 0xbca   : > { %v3909_v16 = vadd.f32 %v3885_v36, %v6347_v42  ;;  %v3888_v15 = vadd.f32 %v4314_v20, %v3780_v0 }
 0xbcc   : > { %3917 = vst [vmem:[%s6707_s29 + $0x10] sm:$0xff] %v3909_v16  ;;  %v3910_v11 = vadd.f32 %v3888_v15, %v6349_v55  ;;  %v4315_v43 = vpop.f32.mrb[96].mxu0 }
 0xbcd   : > { %v4316_v53 = vpop.f32.mrb[97].mxu0 }
 0xbce   : > { %3918 = vst [vmem:[%s6707_s29 + $0x18] sm:$0xff] %v3910_v11  ;;  %v4317_v34 = vadd.f32 %v4316_v53, %v4315_v43  ;;  %v4318_v28 = vpop.f32.mrb[98].mxu0 }
 0xbcf   : > { %v4319_v23 = vpop.f32.mrb[99].mxu0 }
 0xbd0   : > { %v3893_v5 = vadd.f32 %v4317_v34, %v3785_v56  ;;  %v4320_v25 = vadd.f32 %v4319_v23, %v4318_v28 }
 0xbd2   : > { %v3911_v29 = vadd.f32 %v3893_v5, %v6355_v21  ;;  %v3896_v42 = vadd.f32 %v4320_v25, %v3790_v27 }
 0xbd4   : > { %3919 = vst [vmem:[%s6707_s29 + $0x20] sm:$0xff] %v3911_v29  ;;  %v3912_v7 = vadd.f32 %v3896_v42, %v6357_v63  ;;  %v4321_v55 = vpop.f32.mrb[100].mxu0 }
 0xbd5   : > { %v4322_v35 = vpop.f32.mrb[101].mxu0 }
 0xbd6   : > { %3920 = vst [vmem:[%s6707_s29 + $0x28] sm:$0xff] %v3912_v7  ;;  %v4323_v44 = vadd.f32 %v4322_v35, %v4321_v55  ;;  %v4324_v49 = vpop.f32.mrb[102].mxu0 }
 0xbd7   : > { %v4325_v62 = vpop.f32.mrb[103].mxu0 }
 0xbd8   : > { %v3901_v47 = vadd.f32 %v4323_v44, %v3795_v50  ;;  %v4326_v10 = vadd.f32 %v4325_v62, %v4324_v49 }
 0xbda   : > { %v3913_v54 = vadd.f32 %v3901_v47, %v6361_v4  ;;  %v3904_v59 = vadd.f32 %v4326_v10, %v3800_v61 }
 0xbdc   : > { %3921 = vst [vmem:[%s6707_s29 + $0x30] sm:$0xff] %v3913_v54  ;;  %v3914_v21 = vadd.f32 %v3904_v59, %v6363_v38 }
 0xbde   : > { %3922 = vst [vmem:[%s6707_s29 + $0x38] sm:$0xff] %v3914_v21 }
 0xbdf PF: > { %s20_s13 = sadd.s32 1, %s5080_s13  }
 0xbe0   : > { %p17_p4 = scmp.ge.s32.totalorder %s20_s13, 4  }
 0xbe2   :  { %19 = sbr.rel (!%p17_p4) target bundleno = 1 (0x1), region = 90 }

</bundles_post_ra>
